<compile_context>
chip_gen: v7x
topology: tpu7x:2x2x1
jax: 0.10.0
libtpu: 0.0.40
codegen_flags: <defaults>
</compile_context>

<pallas_src>
import functools

import jax
import jax.numpy as jnp
from jax.experimental import pallas as pl
from jax.experimental.pallas import tpu as pltpu

EPS = 1e-5


# ------------------------- Pallas kernel -------------------------

def _block_kernel(x_ref, w1_ref, w2_ref, s_ref, b_ref, o_ref, ypad_ref, *,
                  H, W, Cin, Cout):
    """Fused Block forward for one batch element (stride=1, identity residual).

    x_ref   : (1, H+2, W+2, Cin)  bf16  zero-padded NHWC input slab
    w1_ref  : (3, 3, Cin, Cout)   bf16  conv1 weights (HWIO)
    w2_ref  : (3, 3, Cout, Cout)  bf16  conv2 weights (HWIO)
    s_ref   : (1, Cout) f32  folded BN2 scale  (applied after BOTH convs,
    b_ref   : (1, Cout) f32  folded BN2 bias    matching the reference forward)
    o_ref   : (1, H*W, Cout) f32  output
    ypad_ref: VMEM scratch (H+2, W+2, Cout) bf16 — padded conv1 activation
    """
    # The scratch halo (border ring of zeros) is identical for every batch
    # element and the interior is fully rewritten below, so zero it only once.
    @pl.when(pl.program_id(0) == 0)
    def _():
        ypad_ref[...] = jnp.zeros_like(ypad_ref)

    x = x_ref[0]                       # (H+2, W+2, Cin) bf16
    s = s_ref[...]                     # (1, Cout) f32
    b = b_ref[...]

    # ---- conv1 (3x3, stride 1, pad 1): 9 shifted-window tap matmuls ----
    acc = None
    for di in range(3):
        for dj in range(3):
            tap = x[di:di + H, dj:dj + W, :].reshape(H * W, Cin)
            prod = jnp.dot(tap, w1_ref[di, dj],
                           preferred_element_type=jnp.float32)
            acc = prod if acc is None else acc + prod
    y = jnp.maximum(acc * s + b, 0.0)                     # BN2 + ReLU (f32)

    # Stage the activation into the zero-padded VMEM scratch so conv2 sees its
    # halo; it never round-trips through HBM.
    ypad_ref[1:H + 1, 1:W + 1, :] = (
        y.reshape(H, W, Cout).astype(ypad_ref.dtype))

    # ---- conv2 (3x3, stride 1, pad 1) + BN2 ----
    yp = ypad_ref[...]
    acc2 = None
    for di in range(3):
        for dj in range(3):
            tap = yp[di:di + H, dj:dj + W, :].reshape(H * W, Cout)
            prod = jnp.dot(tap, w2_ref[di, dj],
                           preferred_element_type=jnp.float32)
            acc2 = prod if acc2 is None else acc2 + prod
    out = acc2 * s + b

    # ---- residual add (i_downsample is None -> identity) + ReLU ----
    identity = x[1:H + 1, 1:W + 1, :].reshape(H * W, Cin).astype(jnp.float32)
    o_ref[0] = jnp.maximum(out + identity, 0.0).astype(o_ref.dtype)


# ------------------------- wrapper -------------------------

def _fold_bn(gamma, beta, mean, var, eps=EPS):
    scale = gamma / jnp.sqrt(var + eps)
    bias = beta - scale * mean
    return scale.astype(jnp.float32), bias.astype(jnp.float32)


def block_forward(params, x_nchw, i_downsample=None):
    """Forward pass of `Block` on an NCHW input; returns NCHW float32."""
    if i_downsample is not None:
        raise NotImplementedError  # TODO(synk): 1x1-conv+BN downsample path
    if params['stride'] != 1:
        raise NotImplementedError  # TODO(synk): strided-conv path

    x = jnp.transpose(x_nchw, (0, 2, 3, 1))               # NHWC
    B, H, W, Cin = x.shape
    Cout = params['w1'].shape[-1]
    assert Cin == Cout, "identity residual requires in_channels == out_channels"

    # bf16 inputs for the MXU; the cast fuses with the transpose + halo pad.
    xp = jnp.pad(x, ((0, 0), (1, 1), (1, 1), (0, 0))).astype(jnp.bfloat16)
    w1 = params['w1'].astype(jnp.bfloat16)                # (3,3,Cin,Cout)
    w2 = params['w2'].astype(jnp.bfloat16)                # (3,3,Cout,Cout)
    scale, bias = _fold_bn(params['bn2_gamma'], params['bn2_beta'],
                           params['bn2_mean'], params['bn2_var'])
    s2 = scale.reshape(1, Cout)
    b2 = bias.reshape(1, Cout)

    Hp, Wp = H + 2, W + 2
    # VMEM budget estimate: double-buffered in/out blocks + weights + scratch.
    est = (2 * (Hp * Wp * Cin * 2 + H * W * Cout * 4)
           + 2 * (9 * Cin * Cout * 2 + 9 * Cout * Cout * 2 + 4 * Cout * 4)
           + Hp * Wp * Cout * 2 + 2 * H * W * Cout * 4)
    # Cap at 40 MiB so the request also fits v7x (64 MiB/TC) with headroom;
    # on v5e/v6e (128 MiB) this still lifts the default scoped limit enough.
    vmem_limit = int(min(40 * 2**20, max(4 * est, 16 * 2**20)))

    kernel = functools.partial(_block_kernel, H=H, W=W, Cin=Cin, Cout=Cout)
    out = pl.pallas_call(
        kernel,
        out_shape=jax.ShapeDtypeStruct((B, H * W, Cout), jnp.float32),
        grid=(B,),
        in_specs=[
            pl.BlockSpec((1, Hp, Wp, Cin), lambda bi: (bi, 0, 0, 0)),
            pl.BlockSpec((3, 3, Cin, Cout), lambda bi: (0, 0, 0, 0)),
            pl.BlockSpec((3, 3, Cout, Cout), lambda bi: (0, 0, 0, 0)),
            pl.BlockSpec((1, Cout), lambda bi: (0, 0)),
            pl.BlockSpec((1, Cout), lambda bi: (0, 0)),
        ],
        out_specs=pl.BlockSpec((1, H * W, Cout), lambda bi: (bi, 0, 0)),
        scratch_shapes=[pltpu.VMEM((Hp, Wp, Cout), jnp.bfloat16)],
        compiler_params=pltpu.CompilerParams(
            dimension_semantics=("parallel",),
            vmem_limit_bytes=vmem_limit),
    )(xp, w1, w2, s2, b2)

    out = out.reshape(B, H, W, Cout)
    return jnp.transpose(out, (0, 3, 1, 2))                # back to NCHW


# ------------------------- parameters & reference -------------------------

def init_block_params(key, in_channels, out_channels, stride=1):
    k1, k2, kg, kb, km, kv = jax.random.split(key, 6)
    fan1 = float(in_channels * 9)
    fan2 = float(out_channels * 9)
    w1 = jax.random.normal(k1, (3, 3, in_channels, out_channels),
                           jnp.float32) / jnp.sqrt(fan1)
    w2 = jax.random.normal(k2, (3, 3, out_channels, out_channels),
                           jnp.float32) / jnp.sqrt(fan2)
    # batch_norm1 exists in the module but is never used by forward()
    # (the reference applies batch_norm2 after both convs), so only bn2
    # parameters are created here.
    gamma = 1.0 + 0.1 * jax.random.normal(kg, (out_channels,), jnp.float32)
    beta = 0.1 * jax.random.normal(kb, (out_channels,), jnp.float32)
    mean = 0.1 * jax.random.normal(km, (out_channels,), jnp.float32)
    var = 1.0 + 0.1 * jnp.abs(jax.random.normal(kv, (out_channels,), jnp.float32))
    return dict(w1=w1, w2=w2, bn2_gamma=gamma, bn2_beta=beta,
                bn2_mean=mean, bn2_var=var, stride=stride)


def reference_block(params, x_nchw):
    """Plain-JAX reference mirroring the kernel's bf16-in / f32-accumulate math."""
    x = jnp.transpose(x_nchw, (0, 2, 3, 1)).astype(jnp.bfloat16).astype(jnp.float32)
    w1 = params['w1'].astype(jnp.bfloat16).astype(jnp.float32)
    w2 = params['w2'].astype(jnp.bfloat16).astype(jnp.float32)
    scale, bias = _fold_bn(params['bn2_gamma'], params['bn2_beta'],
                           params['bn2_mean'], params['bn2_var'])

    def conv3x3(v, w):
        return jax.lax.conv_general_dilated(
            v, w, window_strides=(1, 1), padding=((1, 1), (1, 1)),
            dimension_numbers=('NHWC', 'HWIO', 'NHWC'))

    y = jnp.maximum(conv3x3(x, w1) * scale + bias, 0.0)
    y = y.astype(jnp.bfloat16).astype(jnp.float32)
    z = conv3x3(y, w2) * scale + bias
    out = jnp.maximum(z + x, 0.0)
    return jnp.transpose(out, (0, 3, 1, 2))


# ------------------------- demo -------------------------

if __name__ == "__main__":
    key = jax.random.PRNGKey(0)
    pkey, xkey = jax.random.split(key)

    B, C, S = 2, 4, 16                         # batch=2, channels=4, spatial=16
    params = init_block_params(pkey, in_channels=C, out_channels=C, stride=1)
    x = jax.random.normal(xkey, (B, C, S, S), jnp.float32)

    fwd = jax.jit(lambda inp: block_forward(params, inp))
    out = fwd(x)
    jax.block_until_ready(out)

    assert out.shape == (B, C, S, S)
    assert bool(jnp.all(jnp.isfinite(out)))

    ref = reference_block(params, x)
    max_err = float(jnp.max(jnp.abs(out - ref)))
    assert max_err < 2e-2, f"mismatch vs reference: max|err|={max_err}"

    print("KERNEL_OK")
</pallas_src>

<mosaic_0001>
module attributes {stable_mosaic.version = 11 : i64} {
  func.func @_block_kernel(%arg0: i32, %arg1: memref<1x18x18x4xbf16, #tpu.memory_space<vmem>>, %arg2: memref<3x3x4x4xbf16, #tpu.memory_space<vmem>>, %arg3: memref<3x3x4x4xbf16, #tpu.memory_space<vmem>>, %arg4: memref<1x4xf32, #tpu.memory_space<vmem>>, %arg5: memref<1x4xf32, #tpu.memory_space<vmem>>, %arg6: memref<1x256x4xf32, #tpu.memory_space<vmem>>, %arg7: memref<18x18x4xbf16, #tpu.memory_space<vmem>>) attributes {dimension_semantics = [#tpu.dimension_semantics<parallel>], iteration_bounds = array<i64: 2>, scalar_prefetch = 0 : i64, scratch_operands = 1 : i64, tpu.core_type = #tpu.core_type<tc>, window_params = [{transform_indices = @transform_0, window_bounds = array<i64: 1, 18, 18, 4>}, {pipeline_mode = #tpu.pipeline_mode<synchronous>, transform_indices = @transform_1, window_bounds = array<i64: 3, 3, 4, 4>}, {pipeline_mode = #tpu.pipeline_mode<synchronous>, transform_indices = @transform_2, window_bounds = array<i64: 3, 3, 4, 4>}, {pipeline_mode = #tpu.pipeline_mode<synchronous>, transform_indices = @transform_3, window_bounds = array<i64: 1, 4>}, {pipeline_mode = #tpu.pipeline_mode<synchronous>, transform_indices = @transform_4, window_bounds = array<i64: 1, 4>}, {transform_indices = @transform_5, window_bounds = array<i64: 1, 256, 4>}]} {
    %c0_i32 = arith.constant 0 : i32
    %0 = arith.cmpi eq, %arg0, %c0_i32 : i32
    %1 = arith.extui %0 : i1 to i32
    %c0_i32_0 = arith.constant 0 : i32
    %2 = arith.cmpi ne, %1, %c0_i32_0 : i32
    scf.if %2 {
      %cst_106 = arith.constant 0.000000e+00 : bf16
      %136 = vector.broadcast %cst_106 : bf16 to vector<18x18x4xbf16>
      %c0_107 = arith.constant 0 : index
      %c0_108 = arith.constant 0 : index
      %c0_109 = arith.constant 0 : index
      %137 = vector.load %arg7[%c0_107, %c0_108, %c0_109] : memref<18x18x4xbf16, #tpu.memory_space<vmem>>, vector<18x18x4xbf16>
      tpu.vector_store %arg7[%c0_107, %c0_108, %c0_109], %136 {strides = array<i32>} : memref<18x18x4xbf16, #tpu.memory_space<vmem>>, vector<18x18x4xbf16>,
    } else {
    }
    %c0 = arith.constant 0 : index
    %c0_1 = arith.constant 0 : index
    %c0_2 = arith.constant 0 : index
    %c0_3 = arith.constant 0 : index
    %3 = vector.load %arg1[%c0, %c0_1, %c0_2, %c0_3] : memref<1x18x18x4xbf16, #tpu.memory_space<vmem>>, vector<1x18x18x4xbf16>
    %4 = vector.shape_cast %3 : vector<1x18x18x4xbf16> to vector<18x18x4xbf16>
    %c0_4 = arith.constant 0 : index
    %c0_5 = arith.constant 0 : index
    %5 = vector.load %arg4[%c0_4, %c0_5] : memref<1x4xf32, #tpu.memory_space<vmem>>, vector<1x4xf32>
    %c0_6 = arith.constant 0 : index
    %c0_7 = arith.constant 0 : index
    %6 = vector.load %arg5[%c0_6, %c0_7] : memref<1x4xf32, #tpu.memory_space<vmem>>, vector<1x4xf32>
    %7 = vector.extract_strided_slice %4 {offsets = [0, 0, 0], sizes = [16, 16, 4], strides = [1, 1, 1]} : vector<18x18x4xbf16> to vector<16x16x4xbf16>
    %8 = vector.shape_cast %7 : vector<16x16x4xbf16> to vector<256x4xbf16>
    %c0_8 = arith.constant 0 : index
    %c0_9 = arith.constant 0 : index
    %c0_10 = arith.constant 0 : index
    %c0_11 = arith.constant 0 : index
    %9 = vector.load %arg2[%c0_8, %c0_9, %c0_10, %c0_11] : memref<3x3x4x4xbf16, #tpu.memory_space<vmem>>, vector<1x1x4x4xbf16>
    %10 = vector.shape_cast %9 : vector<1x1x4x4xbf16> to vector<4x4xbf16>
    %cst = arith.constant dense<0.000000e+00> : vector<256x4xf32>
    %11 = tpu.matmul %8, %10, %cst {dimension_numbers = #tpu.dot_dimension_numbers<[1], [0], [0], [1], [0, 0, 1, 1], [], []>} : vector<256x4xbf16>, vector<4x4xbf16>, vector<256x4xf32> -> vector<256x4xf32>
    %12 = vector.extract_strided_slice %4 {offsets = [0, 1, 0], sizes = [16, 16, 4], strides = [1, 1, 1]} : vector<18x18x4xbf16> to vector<16x16x4xbf16>
    %13 = vector.shape_cast %12 : vector<16x16x4xbf16> to vector<256x4xbf16>
    %c0_12 = arith.constant 0 : index
    %c1 = arith.constant 1 : index
    %c0_13 = arith.constant 0 : index
    %c0_14 = arith.constant 0 : index
    %14 = vector.load %arg2[%c0_12, %c1, %c0_13, %c0_14] : memref<3x3x4x4xbf16, #tpu.memory_space<vmem>>, vector<1x1x4x4xbf16>
    %15 = vector.shape_cast %14 : vector<1x1x4x4xbf16> to vector<4x4xbf16>
    %cst_15 = arith.constant dense<0.000000e+00> : vector<256x4xf32>
    %16 = tpu.matmul %13, %15, %cst_15 {dimension_numbers = #tpu.dot_dimension_numbers<[1], [0], [0], [1], [0, 0, 1, 1], [], []>} : vector<256x4xbf16>, vector<4x4xbf16>, vector<256x4xf32> -> vector<256x4xf32>
    %17 = arith.addf %11, %16 : vector<256x4xf32>
    %18 = vector.extract_strided_slice %4 {offsets = [0, 2, 0], sizes = [16, 16, 4], strides = [1, 1, 1]} : vector<18x18x4xbf16> to vector<16x16x4xbf16>
    %19 = vector.shape_cast %18 : vector<16x16x4xbf16> to vector<256x4xbf16>
    %c0_16 = arith.constant 0 : index
    %c2 = arith.constant 2 : index
    %c0_17 = arith.constant 0 : index
    %c0_18 = arith.constant 0 : index
    %20 = vector.load %arg2[%c0_16, %c2, %c0_17, %c0_18] : memref<3x3x4x4xbf16, #tpu.memory_space<vmem>>, vector<1x1x4x4xbf16>
    %21 = vector.shape_cast %20 : vector<1x1x4x4xbf16> to vector<4x4xbf16>
    %cst_19 = arith.constant dense<0.000000e+00> : vector<256x4xf32>
    %22 = tpu.matmul %19, %21, %cst_19 {dimension_numbers = #tpu.dot_dimension_numbers<[1], [0], [0], [1], [0, 0, 1, 1], [], []>} : vector<256x4xbf16>, vector<4x4xbf16>, vector<256x4xf32> -> vector<256x4xf32>
    %23 = arith.addf %17, %22 : vector<256x4xf32>
    %24 = vector.extract_strided_slice %4 {offsets = [1, 0, 0], sizes = [16, 16, 4], strides = [1, 1, 1]} : vector<18x18x4xbf16> to vector<16x16x4xbf16>
    %25 = vector.shape_cast %24 : vector<16x16x4xbf16> to vector<256x4xbf16>
    %c1_20 = arith.constant 1 : index
    %c0_21 = arith.constant 0 : index
    %c0_22 = arith.constant 0 : index
    %c0_23 = arith.constant 0 : index
    %26 = vector.load %arg2[%c1_20, %c0_21, %c0_22, %c0_23] : memref<3x3x4x4xbf16, #tpu.memory_space<vmem>>, vector<1x1x4x4xbf16>
    %27 = vector.shape_cast %26 : vector<1x1x4x4xbf16> to vector<4x4xbf16>
    %cst_24 = arith.constant dense<0.000000e+00> : vector<256x4xf32>
    %28 = tpu.matmul %25, %27, %cst_24 {dimension_numbers = #tpu.dot_dimension_numbers<[1], [0], [0], [1], [0, 0, 1, 1], [], []>} : vector<256x4xbf16>, vector<4x4xbf16>, vector<256x4xf32> -> vector<256x4xf32>
    %29 = arith.addf %23, %28 : vector<256x4xf32>
    %30 = vector.extract_strided_slice %4 {offsets = [1, 1, 0], sizes = [16, 16, 4], strides = [1, 1, 1]} : vector<18x18x4xbf16> to vector<16x16x4xbf16>
    %31 = vector.shape_cast %30 : vector<16x16x4xbf16> to vector<256x4xbf16>
    %c1_25 = arith.constant 1 : index
    %c1_26 = arith.constant 1 : index
    %c0_27 = arith.constant 0 : index
    %c0_28 = arith.constant 0 : index
    %32 = vector.load %arg2[%c1_25, %c1_26, %c0_27, %c0_28] : memref<3x3x4x4xbf16, #tpu.memory_space<vmem>>, vector<1x1x4x4xbf16>
    %33 = vector.shape_cast %32 : vector<1x1x4x4xbf16> to vector<4x4xbf16>
    %cst_29 = arith.constant dense<0.000000e+00> : vector<256x4xf32>
    %34 = tpu.matmul %31, %33, %cst_29 {dimension_numbers = #tpu.dot_dimension_numbers<[1], [0], [0], [1], [0, 0, 1, 1], [], []>} : vector<256x4xbf16>, vector<4x4xbf16>, vector<256x4xf32> -> vector<256x4xf32>
    %35 = arith.addf %29, %34 : vector<256x4xf32>
    %36 = vector.extract_strided_slice %4 {offsets = [1, 2, 0], sizes = [16, 16, 4], strides = [1, 1, 1]} : vector<18x18x4xbf16> to vector<16x16x4xbf16>
    %37 = vector.shape_cast %36 : vector<16x16x4xbf16> to vector<256x4xbf16>
    %c1_30 = arith.constant 1 : index
    %c2_31 = arith.constant 2 : index
    %c0_32 = arith.constant 0 : index
    %c0_33 = arith.constant 0 : index
    %38 = vector.load %arg2[%c1_30, %c2_31, %c0_32, %c0_33] : memref<3x3x4x4xbf16, #tpu.memory_space<vmem>>, vector<1x1x4x4xbf16>
    %39 = vector.shape_cast %38 : vector<1x1x4x4xbf16> to vector<4x4xbf16>
    %cst_34 = arith.constant dense<0.000000e+00> : vector<256x4xf32>
    %40 = tpu.matmul %37, %39, %cst_34 {dimension_numbers = #tpu.dot_dimension_numbers<[1], [0], [0], [1], [0, 0, 1, 1], [], []>} : vector<256x4xbf16>, vector<4x4xbf16>, vector<256x4xf32> -> vector<256x4xf32>
    %41 = arith.addf %35, %40 : vector<256x4xf32>
    %42 = vector.extract_strided_slice %4 {offsets = [2, 0, 0], sizes = [16, 16, 4], strides = [1, 1, 1]} : vector<18x18x4xbf16> to vector<16x16x4xbf16>
    %43 = vector.shape_cast %42 : vector<16x16x4xbf16> to vector<256x4xbf16>
    %c2_35 = arith.constant 2 : index
    %c0_36 = arith.constant 0 : index
    %c0_37 = arith.constant 0 : index
    %c0_38 = arith.constant 0 : index
    %44 = vector.load %arg2[%c2_35, %c0_36, %c0_37, %c0_38] : memref<3x3x4x4xbf16, #tpu.memory_space<vmem>>, vector<1x1x4x4xbf16>
    %45 = vector.shape_cast %44 : vector<1x1x4x4xbf16> to vector<4x4xbf16>
    %cst_39 = arith.constant dense<0.000000e+00> : vector<256x4xf32>
    %46 = tpu.matmul %43, %45, %cst_39 {dimension_numbers = #tpu.dot_dimension_numbers<[1], [0], [0], [1], [0, 0, 1, 1], [], []>} : vector<256x4xbf16>, vector<4x4xbf16>, vector<256x4xf32> -> vector<256x4xf32>
    %47 = arith.addf %41, %46 : vector<256x4xf32>
    %48 = vector.extract_strided_slice %4 {offsets = [2, 1, 0], sizes = [16, 16, 4], strides = [1, 1, 1]} : vector<18x18x4xbf16> to vector<16x16x4xbf16>
    %49 = vector.shape_cast %48 : vector<16x16x4xbf16> to vector<256x4xbf16>
    %c2_40 = arith.constant 2 : index
    %c1_41 = arith.constant 1 : index
    %c0_42 = arith.constant 0 : index
    %c0_43 = arith.constant 0 : index
    %50 = vector.load %arg2[%c2_40, %c1_41, %c0_42, %c0_43] : memref<3x3x4x4xbf16, #tpu.memory_space<vmem>>, vector<1x1x4x4xbf16>
    %51 = vector.shape_cast %50 : vector<1x1x4x4xbf16> to vector<4x4xbf16>
    %cst_44 = arith.constant dense<0.000000e+00> : vector<256x4xf32>
    %52 = tpu.matmul %49, %51, %cst_44 {dimension_numbers = #tpu.dot_dimension_numbers<[1], [0], [0], [1], [0, 0, 1, 1], [], []>} : vector<256x4xbf16>, vector<4x4xbf16>, vector<256x4xf32> -> vector<256x4xf32>
    %53 = arith.addf %47, %52 : vector<256x4xf32>
    %54 = vector.extract_strided_slice %4 {offsets = [2, 2, 0], sizes = [16, 16, 4], strides = [1, 1, 1]} : vector<18x18x4xbf16> to vector<16x16x4xbf16>
    %55 = vector.shape_cast %54 : vector<16x16x4xbf16> to vector<256x4xbf16>
    %c2_45 = arith.constant 2 : index
    %c2_46 = arith.constant 2 : index
    %c0_47 = arith.constant 0 : index
    %c0_48 = arith.constant 0 : index
    %56 = vector.load %arg2[%c2_45, %c2_46, %c0_47, %c0_48] : memref<3x3x4x4xbf16, #tpu.memory_space<vmem>>, vector<1x1x4x4xbf16>
    %57 = vector.shape_cast %56 : vector<1x1x4x4xbf16> to vector<4x4xbf16>
    %cst_49 = arith.constant dense<0.000000e+00> : vector<256x4xf32>
    %58 = tpu.matmul %55, %57, %cst_49 {dimension_numbers = #tpu.dot_dimension_numbers<[1], [0], [0], [1], [0, 0, 1, 1], [], []>} : vector<256x4xbf16>, vector<4x4xbf16>, vector<256x4xf32> -> vector<256x4xf32>
    %59 = arith.addf %53, %58 : vector<256x4xf32>
    %60 = vector.broadcast %5 : vector<1x4xf32> to vector<256x4xf32>
    %61 = arith.mulf %59, %60 : vector<256x4xf32>
    %62 = vector.broadcast %6 : vector<1x4xf32> to vector<256x4xf32>
    %63 = arith.addf %61, %62 : vector<256x4xf32>
    %cst_50 = arith.constant 0.000000e+00 : f32
    %64 = vector.broadcast %cst_50 : f32 to vector<256x4xf32>
    %65 = arith.maximumf %63, %64 : vector<256x4xf32>
    %66 = vector.shape_cast %65 : vector<256x4xf32> to vector<16x16x4xf32>
    %67 = arith.truncf %66 : vector<16x16x4xf32> to vector<16x16x4xbf16>
    %c1_51 = arith.constant 1 : index
    %c1_52 = arith.constant 1 : index
    %c0_53 = arith.constant 0 : index
    %68 = vector.load %arg7[%c1_51, %c1_52, %c0_53] : memref<18x18x4xbf16, #tpu.memory_space<vmem>>, vector<16x16x4xbf16>
    tpu.vector_store %arg7[%c1_51, %c1_52, %c0_53], %67 {strides = array<i32>} : memref<18x18x4xbf16, #tpu.memory_space<vmem>>, vector<16x16x4xbf16>,
    %c0_54 = arith.constant 0 : index
    %c0_55 = arith.constant 0 : index
    %c0_56 = arith.constant 0 : index
    %69 = vector.load %arg7[%c0_54, %c0_55, %c0_56] : memref<18x18x4xbf16, #tpu.memory_space<vmem>>, vector<18x18x4xbf16>
    %70 = vector.extract_strided_slice %69 {offsets = [0, 0, 0], sizes = [16, 16, 4], strides = [1, 1, 1]} : vector<18x18x4xbf16> to vector<16x16x4xbf16>
    %71 = vector.shape_cast %70 : vector<16x16x4xbf16> to vector<256x4xbf16>
    %c0_57 = arith.constant 0 : index
    %c0_58 = arith.constant 0 : index
    %c0_59 = arith.constant 0 : index
    %c0_60 = arith.constant 0 : index
    %72 = vector.load %arg3[%c0_57, %c0_58, %c0_59, %c0_60] : memref<3x3x4x4xbf16, #tpu.memory_space<vmem>>, vector<1x1x4x4xbf16>
    %73 = vector.shape_cast %72 : vector<1x1x4x4xbf16> to vector<4x4xbf16>
    %cst_61 = arith.constant dense<0.000000e+00> : vector<256x4xf32>
    %74 = tpu.matmul %71, %73, %cst_61 {dimension_numbers = #tpu.dot_dimension_numbers<[1], [0], [0], [1], [0, 0, 1, 1], [], []>} : vector<256x4xbf16>, vector<4x4xbf16>, vector<256x4xf32> -> vector<256x4xf32>
    %75 = vector.extract_strided_slice %69 {offsets = [0, 1, 0], sizes = [16, 16, 4], strides = [1, 1, 1]} : vector<18x18x4xbf16> to vector<16x16x4xbf16>
    %76 = vector.shape_cast %75 : vector<16x16x4xbf16> to vector<256x4xbf16>
    %c0_62 = arith.constant 0 : index
    %c1_63 = arith.constant 1 : index
    %c0_64 = arith.constant 0 : index
    %c0_65 = arith.constant 0 : index
    %77 = vector.load %arg3[%c0_62, %c1_63, %c0_64, %c0_65] : memref<3x3x4x4xbf16, #tpu.memory_space<vmem>>, vector<1x1x4x4xbf16>
    %78 = vector.shape_cast %77 : vector<1x1x4x4xbf16> to vector<4x4xbf16>
    %cst_66 = arith.constant dense<0.000000e+00> : vector<256x4xf32>
    %79 = tpu.matmul %76, %78, %cst_66 {dimension_numbers = #tpu.dot_dimension_numbers<[1], [0], [0], [1], [0, 0, 1, 1], [], []>} : vector<256x4xbf16>, vector<4x4xbf16>, vector<256x4xf32> -> vector<256x4xf32>
    %80 = arith.addf %74, %79 : vector<256x4xf32>
    %81 = vector.extract_strided_slice %69 {offsets = [0, 2, 0], sizes = [16, 16, 4], strides = [1, 1, 1]} : vector<18x18x4xbf16> to vector<16x16x4xbf16>
    %82 = vector.shape_cast %81 : vector<16x16x4xbf16> to vector<256x4xbf16>
    %c0_67 = arith.constant 0 : index
    %c2_68 = arith.constant 2 : index
    %c0_69 = arith.constant 0 : index
    %c0_70 = arith.constant 0 : index
    %83 = vector.load %arg3[%c0_67, %c2_68, %c0_69, %c0_70] : memref<3x3x4x4xbf16, #tpu.memory_space<vmem>>, vector<1x1x4x4xbf16>
    %84 = vector.shape_cast %83 : vector<1x1x4x4xbf16> to vector<4x4xbf16>
    %cst_71 = arith.constant dense<0.000000e+00> : vector<256x4xf32>
    %85 = tpu.matmul %82, %84, %cst_71 {dimension_numbers = #tpu.dot_dimension_numbers<[1], [0], [0], [1], [0, 0, 1, 1], [], []>} : vector<256x4xbf16>, vector<4x4xbf16>, vector<256x4xf32> -> vector<256x4xf32>
    %86 = arith.addf %80, %85 : vector<256x4xf32>
    %87 = vector.extract_strided_slice %69 {offsets = [1, 0, 0], sizes = [16, 16, 4], strides = [1, 1, 1]} : vector<18x18x4xbf16> to vector<16x16x4xbf16>
    %88 = vector.shape_cast %87 : vector<16x16x4xbf16> to vector<256x4xbf16>
    %c1_72 = arith.constant 1 : index
    %c0_73 = arith.constant 0 : index
    %c0_74 = arith.constant 0 : index
    %c0_75 = arith.constant 0 : index
    %89 = vector.load %arg3[%c1_72, %c0_73, %c0_74, %c0_75] : memref<3x3x4x4xbf16, #tpu.memory_space<vmem>>, vector<1x1x4x4xbf16>
    %90 = vector.shape_cast %89 : vector<1x1x4x4xbf16> to vector<4x4xbf16>
    %cst_76 = arith.constant dense<0.000000e+00> : vector<256x4xf32>
    %91 = tpu.matmul %88, %90, %cst_76 {dimension_numbers = #tpu.dot_dimension_numbers<[1], [0], [0], [1], [0, 0, 1, 1], [], []>} : vector<256x4xbf16>, vector<4x4xbf16>, vector<256x4xf32> -> vector<256x4xf32>
    %92 = arith.addf %86, %91 : vector<256x4xf32>
    %93 = vector.extract_strided_slice %69 {offsets = [1, 1, 0], sizes = [16, 16, 4], strides = [1, 1, 1]} : vector<18x18x4xbf16> to vector<16x16x4xbf16>
    %94 = vector.shape_cast %93 : vector<16x16x4xbf16> to vector<256x4xbf16>
    %c1_77 = arith.constant 1 : index
    %c1_78 = arith.constant 1 : index
    %c0_79 = arith.constant 0 : index
    %c0_80 = arith.constant 0 : index
    %95 = vector.load %arg3[%c1_77, %c1_78, %c0_79, %c0_80] : memref<3x3x4x4xbf16, #tpu.memory_space<vmem>>, vector<1x1x4x4xbf16>
    %96 = vector.shape_cast %95 : vector<1x1x4x4xbf16> to vector<4x4xbf16>
    %cst_81 = arith.constant dense<0.000000e+00> : vector<256x4xf32>
    %97 = tpu.matmul %94, %96, %cst_81 {dimension_numbers = #tpu.dot_dimension_numbers<[1], [0], [0], [1], [0, 0, 1, 1], [], []>} : vector<256x4xbf16>, vector<4x4xbf16>, vector<256x4xf32> -> vector<256x4xf32>
    %98 = arith.addf %92, %97 : vector<256x4xf32>
    %99 = vector.extract_strided_slice %69 {offsets = [1, 2, 0], sizes = [16, 16, 4], strides = [1, 1, 1]} : vector<18x18x4xbf16> to vector<16x16x4xbf16>
    %100 = vector.shape_cast %99 : vector<16x16x4xbf16> to vector<256x4xbf16>
    %c1_82 = arith.constant 1 : index
    %c2_83 = arith.constant 2 : index
    %c0_84 = arith.constant 0 : index
    %c0_85 = arith.constant 0 : index
    %101 = vector.load %arg3[%c1_82, %c2_83, %c0_84, %c0_85] : memref<3x3x4x4xbf16, #tpu.memory_space<vmem>>, vector<1x1x4x4xbf16>
    %102 = vector.shape_cast %101 : vector<1x1x4x4xbf16> to vector<4x4xbf16>
    %cst_86 = arith.constant dense<0.000000e+00> : vector<256x4xf32>
    %103 = tpu.matmul %100, %102, %cst_86 {dimension_numbers = #tpu.dot_dimension_numbers<[1], [0], [0], [1], [0, 0, 1, 1], [], []>} : vector<256x4xbf16>, vector<4x4xbf16>, vector<256x4xf32> -> vector<256x4xf32>
    %104 = arith.addf %98, %103 : vector<256x4xf32>
    %105 = vector.extract_strided_slice %69 {offsets = [2, 0, 0], sizes = [16, 16, 4], strides = [1, 1, 1]} : vector<18x18x4xbf16> to vector<16x16x4xbf16>
    %106 = vector.shape_cast %105 : vector<16x16x4xbf16> to vector<256x4xbf16>
    %c2_87 = arith.constant 2 : index
    %c0_88 = arith.constant 0 : index
    %c0_89 = arith.constant 0 : index
    %c0_90 = arith.constant 0 : index
    %107 = vector.load %arg3[%c2_87, %c0_88, %c0_89, %c0_90] : memref<3x3x4x4xbf16, #tpu.memory_space<vmem>>, vector<1x1x4x4xbf16>
    %108 = vector.shape_cast %107 : vector<1x1x4x4xbf16> to vector<4x4xbf16>
    %cst_91 = arith.constant dense<0.000000e+00> : vector<256x4xf32>
    %109 = tpu.matmul %106, %108, %cst_91 {dimension_numbers = #tpu.dot_dimension_numbers<[1], [0], [0], [1], [0, 0, 1, 1], [], []>} : vector<256x4xbf16>, vector<4x4xbf16>, vector<256x4xf32> -> vector<256x4xf32>
    %110 = arith.addf %104, %109 : vector<256x4xf32>
    %111 = vector.extract_strided_slice %69 {offsets = [2, 1, 0], sizes = [16, 16, 4], strides = [1, 1, 1]} : vector<18x18x4xbf16> to vector<16x16x4xbf16>
    %112 = vector.shape_cast %111 : vector<16x16x4xbf16> to vector<256x4xbf16>
    %c2_92 = arith.constant 2 : index
    %c1_93 = arith.constant 1 : index
    %c0_94 = arith.constant 0 : index
    %c0_95 = arith.constant 0 : index
    %113 = vector.load %arg3[%c2_92, %c1_93, %c0_94, %c0_95] : memref<3x3x4x4xbf16, #tpu.memory_space<vmem>>, vector<1x1x4x4xbf16>
    %114 = vector.shape_cast %113 : vector<1x1x4x4xbf16> to vector<4x4xbf16>
    %cst_96 = arith.constant dense<0.000000e+00> : vector<256x4xf32>
    %115 = tpu.matmul %112, %114, %cst_96 {dimension_numbers = #tpu.dot_dimension_numbers<[1], [0], [0], [1], [0, 0, 1, 1], [], []>} : vector<256x4xbf16>, vector<4x4xbf16>, vector<256x4xf32> -> vector<256x4xf32>
    %116 = arith.addf %110, %115 : vector<256x4xf32>
    %117 = vector.extract_strided_slice %69 {offsets = [2, 2, 0], sizes = [16, 16, 4], strides = [1, 1, 1]} : vector<18x18x4xbf16> to vector<16x16x4xbf16>
    %118 = vector.shape_cast %117 : vector<16x16x4xbf16> to vector<256x4xbf16>
    %c2_97 = arith.constant 2 : index
    %c2_98 = arith.constant 2 : index
    %c0_99 = arith.constant 0 : index
    %c0_100 = arith.constant 0 : index
    %119 = vector.load %arg3[%c2_97, %c2_98, %c0_99, %c0_100] : memref<3x3x4x4xbf16, #tpu.memory_space<vmem>>, vector<1x1x4x4xbf16>
    %120 = vector.shape_cast %119 : vector<1x1x4x4xbf16> to vector<4x4xbf16>
    %cst_101 = arith.constant dense<0.000000e+00> : vector<256x4xf32>
    %121 = tpu.matmul %118, %120, %cst_101 {dimension_numbers = #tpu.dot_dimension_numbers<[1], [0], [0], [1], [0, 0, 1, 1], [], []>} : vector<256x4xbf16>, vector<4x4xbf16>, vector<256x4xf32> -> vector<256x4xf32>
    %122 = arith.addf %116, %121 : vector<256x4xf32>
    %123 = vector.broadcast %5 : vector<1x4xf32> to vector<256x4xf32>
    %124 = arith.mulf %122, %123 : vector<256x4xf32>
    %125 = vector.broadcast %6 : vector<1x4xf32> to vector<256x4xf32>
    %126 = arith.addf %124, %125 : vector<256x4xf32>
    %127 = vector.extract_strided_slice %4 {offsets = [1, 1, 0], sizes = [16, 16, 4], strides = [1, 1, 1]} : vector<18x18x4xbf16> to vector<16x16x4xbf16>
    %128 = vector.shape_cast %127 : vector<16x16x4xbf16> to vector<256x4xbf16>
    %129 = arith.extf %128 : vector<256x4xbf16> to vector<256x4xf32>
    %130 = arith.addf %126, %129 : vector<256x4xf32>
    %cst_102 = arith.constant 0.000000e+00 : f32
    %131 = vector.broadcast %cst_102 : f32 to vector<256x4xf32>
    %132 = arith.maximumf %130, %131 : vector<256x4xf32>
    %c0_103 = arith.constant 0 : index
    %c0_104 = arith.constant 0 : index
    %c0_105 = arith.constant 0 : index
    %133 = vector.load %arg6[%c0_103, %c0_104, %c0_105] : memref<1x256x4xf32, #tpu.memory_space<vmem>>, vector<1x256x4xf32>
    %134 = vector.shape_cast %133 : vector<1x256x4xf32> to vector<256x4xf32>
    %135 = vector.shape_cast %132 : vector<256x4xf32> to vector<1x256x4xf32>
    tpu.vector_store %arg6[%c0_103, %c0_104, %c0_105], %135 {strides = array<i32>} : memref<1x256x4xf32, #tpu.memory_space<vmem>>, vector<1x256x4xf32>,
    return
  }
  func.func @transform_0(%arg0: i32) -> (i32, i32, i32, i32) {
    %c0_i32 = arith.constant 0 : i32
    %c0_i32_0 = arith.constant 0 : i32
    %c0_i32_1 = arith.constant 0 : i32
    %c0_i32_2 = arith.constant 0 : i32
    return %arg0, %c0_i32, %c0_i32_0, %c0_i32_1 : i32, i32, i32, i32
  }
  func.func @transform_1(%arg0: i32) -> (i32, i32, i32, i32) {
    %c0_i32 = arith.constant 0 : i32
    %c0_i32_0 = arith.constant 0 : i32
    %c0_i32_1 = arith.constant 0 : i32
    %c0_i32_2 = arith.constant 0 : i32
    %c0_i32_3 = arith.constant 0 : i32
    return %c0_i32, %c0_i32_0, %c0_i32_1, %c0_i32_2 : i32, i32, i32, i32
  }
  func.func @transform_2(%arg0: i32) -> (i32, i32, i32, i32) {
    %c0_i32 = arith.constant 0 : i32
    %c0_i32_0 = arith.constant 0 : i32
    %c0_i32_1 = arith.constant 0 : i32
    %c0_i32_2 = arith.constant 0 : i32
    %c0_i32_3 = arith.constant 0 : i32
    return %c0_i32, %c0_i32_0, %c0_i32_1, %c0_i32_2 : i32, i32, i32, i32
  }
  func.func @transform_3(%arg0: i32) -> (i32, i32) {
    %c0_i32 = arith.constant 0 : i32
    %c0_i32_0 = arith.constant 0 : i32
    %c0_i32_1 = arith.constant 0 : i32
    return %c0_i32, %c0_i32_0 : i32, i32
  }
  func.func @transform_4(%arg0: i32) -> (i32, i32) {
    %c0_i32 = arith.constant 0 : i32
    %c0_i32_0 = arith.constant 0 : i32
    %c0_i32_1 = arith.constant 0 : i32
    return %c0_i32, %c0_i32_0 : i32, i32
  }
  func.func @transform_5(%arg0: i32) -> (i32, i32, i32) {
    %c0_i32 = arith.constant 0 : i32
    %c0_i32_0 = arith.constant 0 : i32
    %c0_i32_1 = arith.constant 0 : i32
    return %arg0, %c0_i32, %c0_i32_0 : i32, i32, i32
  }
}

</mosaic_0001>

<bundles_post_ra>
// kernel: _lambda_.1
= control target key start
LH: loop header
LB: loop body
LE: loop exit
PB: predicated region body
PF: predicated region fallthrough
CT: control target
= control target key end

     0   :  { %s8704_s18 = smov 0   ;;  %s11038_s0 = inlined_call_operand.vmem [shape: bf16[2,18,18,4], index: 0, kind: input, shape index: {}]   ;;  %s11039_s1 = inlined_call_operand.vmem [shape: bf16[3,3,4,4], index: 1, kind: input, shape index: {}]   ;;  %s11040_s2 = inlined_call_operand.vmem [shape: bf16[3,3,4,4], index: 2, kind: input, shape index: {}]   ;;  %s11041_s3 = inlined_call_operand.vmem [shape: f32[1,4], index: 3, kind: input, shape index: {}]   ;;  %s11042_s4 = inlined_call_operand.vmem [shape: f32[1,4], index: 4, kind: input, shape index: {}]   ;;  %s11043_s5 = inlined_call_operand.vmem [shape: f32[2,256,4], index: 5, kind: output, shape index: {}]  }
   0x1 LB: > { %s6635_s19 = sadd.s32 4294967295, %s8671_s18   ;;  %p6639_p0 = scmp.ge.s32.totalorder %s8671_s18, 1  ;;  %s8671_s18 = sphi %s8704_s18, %s15_s18  }
   0x2   : > { %p187_p1 = scmp.lt.s32.totalorder %s8671_s18, 3 }
   0x4   : > { %p188_p2 = pnand %p6639_p0, %p187_p1 }
   0x6   : > { %191 = sbr.rel (%p188_p2) target bundleno = 1684 (0x694), region = 40 }
   0xd   : > { %p215_p3 = scmp.lt.s32.totalorder %s6635_s19, 1  ;;  %p6643_p4 = scmp.ne.s32.totalorder %s6635_s19, 0 }
   0xe   : > { %vm230_vm0 = vcmask (!%p6643_p4), 27648   ;;  %vm233_vm1 = vcmask (!%p6643_p4), 24576   ;;  %v8673_v0 = vmov (!%p6643_p4), 0  }
   0xf   : > { %s216_s20 = scalar_select %p215_p3, %s6635_s19, 1 }
  0x10   : > { %229 = sbr.rel (%p6643_p4) target bundleno = 43 (0x2b), region = 44  ;;  %231 = vst.msk [vmem:[#allocation2] sm:$0xf] (!%p6643_p4), %vm230_vm0, %v8673_v0  ;;  %232 = vst.msk [vmem:[#allocation2 + $0x4] sm:$0xf] (!%p6643_p4), %vm230_vm0, %v8673_v0 }
  0x11   : > { %s8609_s21 = smul.u32 216, %s216_s20  ;;  %s7128_s22 = sshll.u32 %s216_s20, 8  ;;  %235 = vst.msk [vmem:[#allocation2 + $0xc] sm:$0xf] (!%p6643_p4), %vm230_vm0, %v8673_v0  ;;  %236 = vst.msk [vmem:[#allocation2 + $0x10] sm:$0xf] (!%p6643_p4), %vm230_vm0, %v8673_v0 }
  0x12   : > { %s8715_s25 = scalar_lea.vmem %s11043_s5, %s7128_s22  ;;  %238 = vst.msk [vmem:[#allocation2 + $0x18] sm:$0xf] (!%p6643_p4), %vm230_vm0, %v8673_v0  ;;  %239 = vst.msk [vmem:[#allocation2 + $0x1c] sm:$0xf] (!%p6643_p4), %vm230_vm0, %v8673_v0 }
  0x13   : > { %s8720_s28 = scalar_lea.vmem %s11038_s0, %s8609_s21  ;;  %241 = vst.msk [vmem:[#allocation2 + $0x24] sm:$0xf] (!%p6643_p4), %vm230_vm0, %v8673_v0  ;;  %242 = vst.msk [vmem:[#allocation2 + $0x28] sm:$0xf] (!%p6643_p4), %vm230_vm0, %v8673_v0 }
  0x14   : > { %244 = vst.msk [vmem:[#allocation2 + $0x30] sm:$0xf] (!%p6643_p4), %vm230_vm0, %v8673_v0  ;;  %245 = vst.msk [vmem:[#allocation2 + $0x34] sm:$0xf] (!%p6643_p4), %vm230_vm0, %v8673_v0 }
  0x15   : > { %247 = vst.msk [vmem:[#allocation2 + $0x3c] sm:$0xf] (!%p6643_p4), %vm230_vm0, %v8673_v0  ;;  %248 = vst.msk [vmem:[#allocation2 + $0x40] sm:$0xf] (!%p6643_p4), %vm230_vm0, %v8673_v0 }
  0x16   : > { %250 = vst.msk [vmem:[#allocation2 + $0x48] sm:$0xf] (!%p6643_p4), %vm230_vm0, %v8673_v0  ;;  %251 = vst.msk [vmem:[#allocation2 + $0x4c] sm:$0xf] (!%p6643_p4), %vm230_vm0, %v8673_v0 }
  0x17   : > { %253 = vst.msk [vmem:[#allocation2 + $0x54] sm:$0xf] %vm230_vm0, %v8673_v0  ;;  %254 = vst.msk [vmem:[#allocation2 + $0x58] sm:$0xf] %vm230_vm0, %v8673_v0 }
  0x18   : > { %256 = vst.msk [vmem:[#allocation2 + $0x60] sm:$0xf] %vm230_vm0, %v8673_v0  ;;  %257 = vst.msk [vmem:[#allocation2 + $0x64] sm:$0xf] %vm230_vm0, %v8673_v0 }
  0x19   : > { %259 = vst.msk [vmem:[#allocation2 + $0x6c] sm:$0xf] %vm230_vm0, %v8673_v0  ;;  %260 = vst.msk [vmem:[#allocation2 + $0x70] sm:$0xf] %vm230_vm0, %v8673_v0 }
  0x1a   : > { %262 = vst.msk [vmem:[#allocation2 + $0x78] sm:$0xf] %vm230_vm0, %v8673_v0  ;;  %263 = vst.msk [vmem:[#allocation2 + $0x7c] sm:$0xf] %vm230_vm0, %v8673_v0 }
  0x1b   : > { %265 = vst.msk [vmem:[#allocation2 + $0x84] sm:$0xf] %vm230_vm0, %v8673_v0  ;;  %266 = vst.msk [vmem:[#allocation2 + $0x88] sm:$0xf] %vm230_vm0, %v8673_v0 }
  0x1c   : > { %268 = vst.msk [vmem:[#allocation2 + $0x90] sm:$0xf] %vm230_vm0, %v8673_v0  ;;  %269 = vst.msk [vmem:[#allocation2 + $0x94] sm:$0xf] %vm230_vm0, %v8673_v0 }
  0x1d   : > { %271 = vst.msk [vmem:[#allocation2 + $0x9c] sm:$0xf] %vm230_vm0, %v8673_v0  ;;  %272 = vst.msk [vmem:[#allocation2 + $0xa0] sm:$0xf] %vm230_vm0, %v8673_v0 }
  0x1e   : > { %274 = vst.msk [vmem:[#allocation2 + $0xa8] sm:$0xf] %vm230_vm0, %v8673_v0  ;;  %275 = vst.msk [vmem:[#allocation2 + $0xac] sm:$0xf] %vm230_vm0, %v8673_v0 }
  0x1f   : > { %277 = vst.msk [vmem:[#allocation2 + $0xb4] sm:$0xf] %vm230_vm0, %v8673_v0  ;;  %278 = vst.msk [vmem:[#allocation2 + $0xb8] sm:$0xf] %vm230_vm0, %v8673_v0 }
  0x20   : > { %280 = vst.msk [vmem:[#allocation2 + $0xc0] sm:$0xf] %vm230_vm0, %v8673_v0  ;;  %281 = vst.msk [vmem:[#allocation2 + $0xc4] sm:$0xf] %vm230_vm0, %v8673_v0 }
  0x21   : > { %283 = vst.msk [vmem:[#allocation2 + $0xcc] sm:$0xf] %vm230_vm0, %v8673_v0  ;;  %284 = vst.msk [vmem:[#allocation2 + $0xd0] sm:$0xf] %vm230_vm0, %v8673_v0 }
  0x22   : > { %234 = vst.msk [vmem:[#allocation2 + $0x8] sm:$0x1] %vm233_vm1, %v8673_v0  ;;  %237 = vst.msk [vmem:[#allocation2 + $0x14] sm:$0x1] %vm233_vm1, %v8673_v0 }
  0x23   : > { %240 = vst.msk [vmem:[#allocation2 + $0x20] sm:$0x1] %vm233_vm1, %v8673_v0  ;;  %243 = vst.msk [vmem:[#allocation2 + $0x2c] sm:$0x1] %vm233_vm1, %v8673_v0 }
  0x24   : > { %246 = vst.msk [vmem:[#allocation2 + $0x38] sm:$0x1] %vm233_vm1, %v8673_v0  ;;  %249 = vst.msk [vmem:[#allocation2 + $0x44] sm:$0x1] %vm233_vm1, %v8673_v0 }
  0x25   : > { %252 = vst.msk [vmem:[#allocation2 + $0x50] sm:$0x1] %vm233_vm1, %v8673_v0  ;;  %255 = vst.msk [vmem:[#allocation2 + $0x5c] sm:$0x1] %vm233_vm1, %v8673_v0 }
  0x26   : > { %258 = vst.msk [vmem:[#allocation2 + $0x68] sm:$0x1] %vm233_vm1, %v8673_v0  ;;  %261 = vst.msk [vmem:[#allocation2 + $0x74] sm:$0x1] %vm233_vm1, %v8673_v0 }
  0x27   : > { %264 = vst.msk [vmem:[#allocation2 + $0x80] sm:$0x1] %vm233_vm1, %v8673_v0  ;;  %267 = vst.msk [vmem:[#allocation2 + $0x8c] sm:$0x1] %vm233_vm1, %v8673_v0 }
  0x28   : > { %270 = vst.msk [vmem:[#allocation2 + $0x98] sm:$0x1] %vm233_vm1, %v8673_v0  ;;  %273 = vst.msk [vmem:[#allocation2 + $0xa4] sm:$0x1] %vm233_vm1, %v8673_v0 }
  0x29   : > { %276 = vst.msk [vmem:[#allocation2 + $0xb0] sm:$0x1] %vm233_vm1, %v8673_v0  ;;  %279 = vst.msk [vmem:[#allocation2 + $0xbc] sm:$0x1] %vm233_vm1, %v8673_v0 }
  0x2a   : > { %282 = vst.msk [vmem:[#allocation2 + $0xc8] sm:$0x1] %vm233_vm1, %v8673_v0  ;;  %285 = vst.msk [vmem:[#allocation2 + $0xd4] sm:$0x1] %vm233_vm1, %v8673_v0 }
  0x2b PF: > { %v6644_v1 = vld [vmem:[%s11039_s1 + $0x2] sm:$0x3]  ;;  %vm829_vm2 = vcmask 1041408   ;;  %v8785_v4 = vld [vmem:[%s8720_s28 + $0x4] sm:$0xf]  ;;  %v11147_v25 = vmov 0 }
  0x2c   : > { %v8780_v2 = vld [vmem:[%s8720_s28] sm:$0xf]  ;;  %8591 = vmatprep.subr.msk.bf16.mxu0 %vm829_vm2, %v6644_v1  ;;  %v831_v3 = vsel %vm829_vm2, %v6644_v1, 0  ;;  %v8788_v5 = vld [vmem:[%s8720_s28 + $0x8] sm:$0x1]  ;;  %v356_v8 = vshll.u32 %v8785_v4, 16 }
  0x2d   : > { %11146 = vst [vmem:[#allocation3_spill] sm:$0xff] %v8788_v5  ;;  %v347_v6 = vshrl.u32 %v8780_v2, 16  ;;  %7468 = vmatpush3.bf16.msra.mxu0 %v831_v3  ;;  %vm343_vm3 = vsmask.f32 3328  ;;  %vm344_vm4 = vsmask.f32 7440 }
  0x2e   : > { %v350_v7 = vshll.u32 %v8780_v2, 16  ;;  %v360_v10 = vshrl.u32 %v8785_v4, 16  ;;  %v366_v11 = vshll.u32 %v8788_v5, 16  ;;  %v342_v12 = vld [vmem:[%s11039_s1] sm:$0x3]  ;;  %v358_v14 = vrot.slane %v356_v8, 5  ;;  %vm8815_vm5 = vmor %vm343_vm3, %vm344_vm4 }
  0x2f   : > { %v349_v9 = vrot.slane %v347_v6, 4  ;;  %8592 = vmatprep.subr.msk.bf16.mxu0 %vm829_vm2, %v342_v12  ;;  %v8800_v15 = vld [vmem:[%s8720_s28 + $0xc] sm:$0xf]  ;;  %v8803_v16 = vld [vmem:[%s8720_s28 + $0x10] sm:$0xf]  ;;  %v11148_v25 = vsel %vm8815_vm5, 4294967295, %v11147_v25 }
  0x30   : > { %v352_v13 = vrot.slane %v350_v7, 5  ;;  %v362_v17 = vrot.slane %v360_v10, 4  ;;  %v8806_v18 = vld [vmem:[%s8720_s28 + $0x14] sm:$0x1]  ;;  %v371_v19 = vshrl.u32 %v8800_v15, 16  ;;  %v374_v20 = vshll.u32 %v8800_v15, 16 }
  0x31   : > { %v380_v22 = vshll.u32 %v8803_v16, 16  ;;  %v384_v23 = vshrl.u32 %v8803_v16, 16  ;;  %v390_v24 = vshll.u32 %v8806_v18, 16  ;;  %11149 = vst [vmem:[#allocation4_spill] sm:$0xff] %v11148_v25  ;;  %v368_v27 = vrot.slane %v366_v11, 5 }
  0x32   : > { %v353_v21 = vor.u32 %v352_v13, %v349_v9  ;;  %v363_v26 = vor.u32 %v362_v17, %v358_v14  ;;  %v373_v28 = vrot.slane %v371_v19, 4  ;;  %v376_v29 = vrot.slane %v374_v20, 5  ;;  %v8820_v30 = vld [vmem:[%s8720_s28 + $0x18] sm:$0xf]  ;;  %v8823_v34 = vld [vmem:[%s8720_s28 + $0x1c] sm:$0xf] }
  0x33   : > { %vm780_vm6 = vcmask 31744   ;;  %v382_v32 = vrot.slane %v380_v22, 5  ;;  %v386_v33 = vrot.slane %v384_v23, 4  ;;  %v392_v37 = vrot.slane %v390_v24, 5  ;;  %v8829_v41 = vld [vmem:[%s8720_s28 + $0x20] sm:$0x1] }
  0x34   : > { %v354_v31 = vrot.slane %v353_v21, 4  ;;  %v364_v35 = vrot.slane %v363_v26, 4  ;;  %v377_v36 = vor.u32 %v376_v29, %v373_v28  ;;  %v1123_v38 = vsel %vm829_vm2, %v342_v12, 0  ;;  %11150 = vst [vmem:[#allocation5_spill] sm:$0xff] %v8829_v41  ;;  %v8838_v48 = vld [vmem:[%s8720_s28 + $0x24] sm:$0xf] }
  0x35   : > { %v387_v40 = vor.u32 %v386_v33, %v382_v32  ;;  %v395_v42 = vshrl.u32 %v8820_v30, 16  ;;  %v398_v43 = vshll.u32 %v8820_v30, 16  ;;  %v404_v46 = vshll.u32 %v8823_v34, 16  ;;  %v8841_v53 = vld [vmem:[%s8720_s28 + $0x28] sm:$0xf] }
  0x36   : > { %v359_v39 = vsel %vm8815_vm5, %v354_v31, %v358_v14  ;;  %v369_v44 = vsel %vm8815_vm5, %v364_v35, %v368_v27  ;;  %v378_v45 = vrot.slane %v377_v36, 4  ;;  %v408_v47 = vshrl.u32 %v8823_v34, 16  ;;  %v8854_v60 = vld [vmem:[%s8720_s28 + $0x2c] sm:$0x1]  ;;  %v8859_v63 = vld [vmem:[%s8720_s28 + $0x30] sm:$0xf] }
  0x37   : > { %v6645_v49 = vcombine.low %v359_v39, %v369_v44  ;;  %v388_v50 = vrot.slane %v387_v40, 4  ;;  %v397_v51 = vrot.slane %v395_v42, 4  ;;  %v400_v52 = vrot.slane %v398_v43, 5  ;;  %11153 = vst [vmem:[#allocation8_spill] sm:$0xff] %v8854_v60  ;;  %v8868_v11 = vld [vmem:[%s8720_s28 + $0x34] sm:$0xf] }
  0x38   : > { %v8845_v54 = vsel %vm8815_vm5, %v378_v45, %v382_v32  ;;  %v406_v55 = vrot.slane %v404_v46, 5  ;;  %v410_v56 = vrot.slane %v408_v47, 4  ;;  %v414_v57 = vshll.u32 %v8829_v41, 16  ;;  %v8879_v22 = vld [vmem:[%s8720_s28 + $0x38] sm:$0x1] }
  0x39   : > { %11151 = vst [vmem:[#allocation6_spill] sm:$0xff] %v8845_v54  ;;  %7469 = vmatprep.mubr.msk.bf16.mxu0 %vm780_vm6, %v6645_v49  ;;  %v8851_v58 = vsel %vm8815_vm5, %v388_v50, %v392_v37  ;;  %v401_v59 = vor.u32 %v400_v52, %v397_v51  ;;  %v419_v61 = vshrl.u32 %v8838_v48, 16  ;;  %v422_v62 = vshll.u32 %v8838_v48, 16  ;;  %v8883_v24 = vld [vmem:[%s8720_s28 + $0x3c] sm:$0xf] }
  0x3a   : > { %11152 = vst [vmem:[#allocation7_spill] sm:$0xff] %v8851_v58  ;;  %v8863_v0 = vcombine.low %v8845_v54, %v8851_v58  ;;  %v411_v1 = vor.u32 %v410_v56, %v406_v55  ;;  %v416_v3 = vrot.slane %v414_v57, 5  ;;  %v428_v6 = vshll.u32 %v8841_v53, 16  ;;  %v8895_v36 = vld [vmem:[%s8720_s28 + $0x40] sm:$0xf] }
  0x3b   : > { %v402_v7 = vrot.slane %v401_v59, 4  ;;  %v421_v8 = vrot.slane %v419_v61, 4  ;;  %v424_v9 = vrot.slane %v422_v62, 5  ;;  %v432_v10 = vshrl.u32 %v8841_v53, 16  ;;  %v8907_v45 = vld [vmem:[%s8720_s28 + $0x44] sm:$0x1] }
  0x3c   : > { %11154 = vst [vmem:[#allocation9_spill] sm:$0xff] %v8863_v0  ;;  %7470 = vmatmul.mubr.msk.bf16.vlgmr.msra.gmra.mrb[0].mxu0 %vm780_vm6, %v8863_v0  ;;  %v412_v12 = vrot.slane %v411_v1, 4  ;;  %v430_v13 = vrot.slane %v428_v6, 5  ;;  %v438_v14 = vshll.u32 %v8854_v60, 16  ;;  %v443_v17 = vshrl.u32 %v8859_v63, 16 }
  0x3d   : > { %7502 = vmatpush3.bf16.msra.mxu0 %v1123_v38  ;;  %v8876_v19 = vsel %vm8815_vm5, %v402_v7, %v406_v55  ;;  %v425_v20 = vor.u32 %v424_v9, %v421_v8  ;;  %v434_v21 = vrot.slane %v432_v10, 4  ;;  %v446_v23 = vshll.u32 %v8859_v63, 16  ;;  %v8912_v52 = vld [vmem:[%s8720_s28 + $0x48] sm:$0xf]  ;;  %v8920_v61 = vld [vmem:[%s8720_s28 + $0x4c] sm:$0xf] }
  0x3e   : > { %11155 = vst [vmem:[#allocation10_spill] sm:$0xff] %v8876_v19  ;;  %v8887_v26 = vsel %vm8815_vm5, %v412_v12, %v416_v3  ;;  %v440_v27 = vrot.slane %v438_v14, 5  ;;  %v445_v28 = vrot.slane %v443_v17, 4  ;;  %v452_v29 = vshll.u32 %v8868_v11, 16  ;;  %v8932_v10 = vld [vmem:[%s8720_s28 + $0x50] sm:$0x1] }
  0x3f   : > { %11156 = vst [vmem:[#allocation11_spill] sm:$0xff] %v8887_v26  ;;  %v8892_v31 = vcombine.low %v8876_v19, %v8887_v26  ;;  %v426_v32 = vrot.slane %v425_v20, 4  ;;  %v435_v33 = vor.u32 %v434_v21, %v430_v13  ;;  %v448_v35 = vrot.slane %v446_v23, 5  ;;  %v9151_v0 = vld [vmem:[%s8720_s28 + $0xac] sm:$0xf] }
  0x40   : > { %v454_v37 = vrot.slane %v452_v29, 5  ;;  %v456_v38 = vshrl.u32 %v8868_v11, 16  ;;  %v462_v39 = vshll.u32 %v8879_v22, 16  ;;  %v467_v40 = vshrl.u32 %v8883_v24, 16  ;;  %v8941_v29 = vld [vmem:[%s8720_s28 + $0x54] sm:$0xf] }
  0x41   : > { %11157 = vst [vmem:[#allocation12_spill] sm:$0xff] %v8892_v31  ;;  %7473 = vmatprep.mubr.msk.bf16.mxu0 %vm780_vm6, %v8892_v31  ;;  %v8904_v42 = vsel %vm8815_vm5, %v426_v32, %v430_v13  ;;  %v436_v43 = vrot.slane %v435_v33, 4  ;;  %v449_v44 = vor.u32 %v448_v35, %v445_v28  ;;  %v470_v46 = vshll.u32 %v8883_v24, 16  ;;  %v9143_v31 = vld [vmem:[%s8720_s28 + $0xa8] sm:$0xf] }
  0x42   : > { %11158 = vst [vmem:[#allocation13_spill] sm:$0xff] %v8904_v42  ;;  %v458_v47 = vrot.slane %v456_v38, 4  ;;  %v464_v49 = vrot.slane %v462_v39, 5  ;;  %v469_v50 = vrot.slane %v467_v40, 4  ;;  %v476_v51 = vshll.u32 %v8895_v36, 16 }
  0x43   : > { %v8916_v55 = vsel %vm8815_vm5, %v436_v43, %v440_v27  ;;  %v450_v56 = vrot.slane %v449_v44, 4  ;;  %v472_v57 = vrot.slane %v470_v46, 5  ;;  %v480_v59 = vshrl.u32 %v8895_v36, 16  ;;  %v8949_v38 = vld [vmem:[%s8720_s28 + $0x58] sm:$0xf] }
  0x44   : > { %11159 = vst [vmem:[#allocation14_spill] sm:$0xff] %v8916_v55  ;;  %v8924_v62 = vcombine.low %v8904_v42, %v8916_v55  ;;  %v459_v1 = vor.u32 %v458_v47, %v454_v37  ;;  %v478_v3 = vrot.slane %v476_v51, 5  ;;  %v486_v6 = vshll.u32 %v8907_v45, 16  ;;  %v9042_v55 = vld [vmem:[%s8720_s28 + $0x7c] sm:$0xf] }
  0x45   : > { %v8929_v7 = vsel %vm8815_vm5, %v450_v56, %v454_v37  ;;  %v473_v8 = vor.u32 %v472_v57, %v469_v50  ;;  %v482_v9 = vrot.slane %v480_v59, 4  ;;  %v491_v12 = vshrl.u32 %v8912_v52, 16 }
  0x46   : > { %11160 = vst [vmem:[#allocation15_spill] sm:$0xff] %v8924_v62  ;;  %11161 = vst [vmem:[#allocation16_spill] sm:$0xff] %v8929_v7  ;;  %7474 = vmatmul.mubr.msk.bf16.gmra.mrb[4].mxu0 %vm780_vm6, %v8924_v62  ;;  %v460_v13 = vrot.slane %v459_v1, 4  ;;  %v488_v14 = vrot.slane %v486_v6, 5  ;;  %v494_v17 = vshll.u32 %v8912_v52, 16  ;;  %v500_v20 = vshll.u32 %v8920_v61, 16 }
  0x47   : > { %v474_v21 = vrot.slane %v473_v8, 4  ;;  %v483_v23 = vor.u32 %v482_v9, %v478_v3  ;;  %v493_v27 = vrot.slane %v491_v12, 4  ;;  %v504_v28 = vshrl.u32 %v8920_v61, 16 }
  0x48   : > { %v8945_v32 = vsel %vm8815_vm5, %v460_v13, %v464_v49  ;;  %v496_v33 = vrot.slane %v494_v17, 5  ;;  %v502_v35 = vrot.slane %v500_v20, 5  ;;  %v510_v37 = vshll.u32 %v8932_v10, 16  ;;  %v8960_v49 = vld [vmem:[%s8720_s28 + $0x5c] sm:$0x1] }
  0x49   : > { %11162 = vst [vmem:[#allocation17_spill] sm:$0xff] %v8945_v32  ;;  %v8953_v39 = vcombine.low %v8929_v7, %v8945_v32  ;;  %v8957_v40 = vsel %vm8815_vm5, %v474_v21, %v478_v3  ;;  %v484_v43 = vrot.slane %v483_v23, 4  ;;  %v506_v44 = vrot.slane %v504_v28, 4  ;;  %v8973_v3 = vld [vmem:[%s8720_s28 + $0x60] sm:$0xf] }
  0x4a   : > { %11164 = vst [vmem:[#allocation19_spill] sm:$0xff] %v8957_v40  ;;  %v497_v46 = vor.u32 %v496_v33, %v493_v27  ;;  %v512_v47 = vrot.slane %v510_v37, 5  ;;  %v515_v50 = vshrl.u32 %v8941_v29, 16  ;;  %v518_v51 = vshll.u32 %v8941_v29, 16  ;;  %v8980_v13 = vld [vmem:[%s8720_s28 + $0x64] sm:$0xf] }
  0x4b   : > { %11163 = vst [vmem:[#allocation18_spill] sm:$0xff] %v8953_v39  ;;  %7477 = vmatprep.mubr.msk.bf16.mxu0 %vm780_vm6, %v8953_v39  ;;  %v8968_v56 = vsel %vm8815_vm5, %v484_v43, %v488_v14  ;;  %v507_v57 = vor.u32 %v506_v44, %v502_v35  ;;  %v524_v59 = vshll.u32 %v8949_v38, 16  ;;  %v528_v1 = vshrl.u32 %v8949_v38, 16  ;;  %v8990_v28 = vld [vmem:[%s8720_s28 + $0x68] sm:$0x1] }
  0x4c   : > { %11165 = vst [vmem:[#allocation20_spill] sm:$0xff] %v8968_v56  ;;  %v8977_v6 = vcombine.low %v8957_v40, %v8968_v56  ;;  %v498_v8 = vrot.slane %v497_v46, 4  ;;  %v517_v9 = vrot.slane %v515_v50, 4  ;;  %v520_v12 = vrot.slane %v518_v51, 5  ;;  %v9000_v51 = vld [vmem:[%s8720_s28 + $0x6c] sm:$0xf] }
  0x4d   : > { %v508_v14 = vrot.slane %v507_v57, 4  ;;  %v526_v17 = vrot.slane %v524_v59, 5  ;;  %v530_v20 = vrot.slane %v528_v1, 4  ;;  %v534_v21 = vshll.u32 %v8960_v49, 16 }
  0x4e   : > { %11166 = vst [vmem:[#allocation21_spill] sm:$0xff] %v8977_v6  ;;  %7478 = vmatmul.mubr.msk.bf16.gmra.mrb[8].mxu0 %vm780_vm6, %v8977_v6  ;;  %v8987_v23 = vsel %vm8815_vm5, %v498_v8, %v502_v35  ;;  %v521_v27 = vor.u32 %v520_v12, %v517_v9  ;;  %v539_v33 = vshrl.u32 %v8973_v3, 16  ;;  %v542_v37 = vshll.u32 %v8973_v3, 16  ;;  %v9005_v35 = vld [vmem:[%s11039_s1 + $0x4] sm:$0x3] }
  0x4f   : > { %11167 = vst [vmem:[#allocation22_spill] sm:$0xff] %v8987_v23  ;;  %v8996_v43 = vsel %vm8815_vm5, %v508_v14, %v512_v47  ;;  %v531_v44 = vor.u32 %v530_v20, %v526_v17  ;;  %v536_v46 = vrot.slane %v534_v21, 5  ;;  %v548_v50 = vshll.u32 %v8980_v13, 16  ;;  %v9012_v8 = vld [vmem:[%s8720_s28 + $0x70] sm:$0xf]  ;;  %8593 = vmatprep.subr.msk.bf16.mxu0 %vm829_vm2, %v9005_v35 }
  0x50   : > { %11168 = vst [vmem:[#allocation23_spill] sm:$0xff] %v8996_v43  ;;  %v9009_v57 = vcombine.low %v8987_v23, %v8996_v43  ;;  %v522_v59 = vrot.slane %v521_v27, 4  ;;  %v541_v1 = vrot.slane %v539_v33, 4  ;;  %v544_v47 = vrot.slane %v542_v37, 5  ;;  %v9025_v33 = vld [vmem:[%s8720_s28 + $0x74] sm:$0x1] }
  0x51   : > { %v532_v9 = vrot.slane %v531_v44, 4  ;;  %v550_v12 = vrot.slane %v548_v50, 5  ;;  %v552_v14 = vshrl.u32 %v8980_v13, 16  ;;  %v558_v20 = vshll.u32 %v8990_v28, 16  ;;  %v9035_v23 = vld [vmem:[%s8720_s28 + $0x78] sm:$0xf] }
  0x52   : > { %11169 = vst [vmem:[#allocation24_spill] sm:$0xff] %v9009_v57  ;;  %7481 = vmatprep.mubr.msk.bf16.mxu0 %vm780_vm6, %v9009_v57  ;;  %v9022_v21 = vsel %vm8815_vm5, %v522_v59, %v526_v17  ;;  %v545_v27 = vor.u32 %v544_v47, %v541_v1  ;;  %v563_v37 = vshrl.u32 %v9000_v51, 16  ;;  %v566_v44 = vshll.u32 %v9000_v51, 16 }
  0x53   : > { %11170 = vst [vmem:[#allocation25_spill] sm:$0xff] %v9022_v21  ;;  %v9031_v50 = vsel %vm8815_vm5, %v532_v9, %v536_v46  ;;  %v554_v56 = vrot.slane %v552_v14, 4  ;;  %v560_v43 = vrot.slane %v558_v20, 5  ;;  %v572_v40 = vshll.u32 %v9012_v8, 16 }
  0x54   : > { %11171 = vst [vmem:[#allocation26_spill] sm:$0xff] %v9031_v50  ;;  %v9039_v17 = vcombine.low %v9022_v21, %v9031_v50  ;;  %v546_v59 = vrot.slane %v545_v27, 4  ;;  %v565_v1 = vrot.slane %v563_v37, 4  ;;  %v568_v47 = vrot.slane %v566_v44, 5  ;;  %v9053_v27 = vld [vmem:[%s8720_s28 + $0x80] sm:$0x1] }
  0x55   : > { %v555_v32 = vor.u32 %v554_v56, %v550_v12  ;;  %v574_v42 = vrot.slane %v572_v40, 5  ;;  %v576_v46 = vshrl.u32 %v9012_v8, 16  ;;  %v582_v9 = vshll.u32 %v9025_v33, 16 }
  0x56   : > { %11172 = vst [vmem:[#allocation27_spill] sm:$0xff] %v9039_v17  ;;  %7482 = vmatmul.mubr.msk.bf16.gmra.mrb[12].mxu0 %vm780_vm6, %v9039_v17  ;;  %v9050_v14 = vsel %vm8815_vm5, %v546_v59, %v550_v12  ;;  %v569_v20 = vor.u32 %v568_v47, %v565_v1  ;;  %v587_v37 = vshrl.u32 %v9035_v23, 16  ;;  %v590_v40 = vshll.u32 %v9035_v23, 16  ;;  %v9060_v59 = vld [vmem:[%s8720_s28 + $0x84] sm:$0xf] }
  0x57   : > { %11173 = vst [vmem:[#allocation28_spill] sm:$0xff] %v9050_v14  ;;  %v556_v56 = vrot.slane %v555_v32, 4  ;;  %v578_v44 = vrot.slane %v576_v46, 4  ;;  %v584_v50 = vrot.slane %v582_v9, 5  ;;  %v596_v21 = vshll.u32 %v9042_v55, 16 }
  0x58   : > { %v570_v7 = vrot.slane %v569_v20, 4  ;;  %v589_v58 = vrot.slane %v587_v37, 4  ;;  %v592_v26 = vrot.slane %v590_v40, 5  ;;  %v600_v12 = vshrl.u32 %v9042_v55, 16  ;;  %v9068_v46 = vld [vmem:[%s8720_s28 + $0x88] sm:$0xf] }
  0x59   : > { %v9064_v1 = vsel %vm8815_vm5, %v556_v56, %v560_v43  ;;  %v579_v47 = vor.u32 %v578_v44, %v574_v42  ;;  %v598_v54 = vrot.slane %v596_v21, 5  ;;  %v606_v32 = vshll.u32 %v9053_v27, 16  ;;  %v9079_v43 = vld [vmem:[%s8720_s28 + $0x8c] sm:$0x1]  ;;  %v9096_v17 = vld [vmem:[%s8720_s28 + $0x94] sm:$0xf] }
  0x5a   : > { %11174 = vst [vmem:[#allocation29_spill] sm:$0xff] %v9064_v1  ;;  %v9072_v9 = vcombine.low %v9050_v14, %v9064_v1  ;;  %v9076_v20 = vsel %vm8815_vm5, %v570_v7, %v574_v42  ;;  %v593_v37 = vor.u32 %v592_v26, %v589_v58  ;;  %v602_v40 = vrot.slane %v600_v12, 4  ;;  %11177 = vst [vmem:[#allocation32_spill] sm:$0xff] %v9079_v43  ;;  %v9088_v26 = vld [vmem:[%s8720_s28 + $0x90] sm:$0xf] }
  0x5b   : > { %11176 = vst [vmem:[#allocation31_spill] sm:$0xff] %v9076_v20  ;;  %v580_v56 = vrot.slane %v579_v47, 4  ;;  %v608_v21 = vrot.slane %v606_v32, 5  ;;  %v611_v44 = vshrl.u32 %v9060_v59, 16  ;;  %v614_v19 = vshll.u32 %v9060_v59, 16 }
  0x5c   : > { %11175 = vst [vmem:[#allocation30_spill] sm:$0xff] %v9072_v9  ;;  %7485 = vmatprep.mubr.msk.bf16.mxu0 %vm780_vm6, %v9072_v9  ;;  %v594_v1 = vrot.slane %v593_v37, 4  ;;  %v603_v14 = vor.u32 %v602_v40, %v598_v54  ;;  %v620_v42 = vshll.u32 %v9068_v46, 16  ;;  %v624_v58 = vshrl.u32 %v9068_v46, 16 }
  0x5d   : > { %v9092_v7 = vsel %vm8815_vm5, %v580_v56, %v584_v50  ;;  %v613_v12 = vrot.slane %v611_v44, 4  ;;  %v616_v47 = vrot.slane %v614_v19, 5  ;;  %v630_v32 = vshll.u32 %v9079_v43, 16  ;;  %v9107_v19 = vld [vmem:[%s8720_s28 + $0x98] sm:$0x1] }
  0x5e   : > { %11178 = vst [vmem:[#allocation33_spill] sm:$0xff] %v9092_v7  ;;  %v9100_v37 = vcombine.low %v9076_v20, %v9092_v7  ;;  %v9104_v40 = vsel %vm8815_vm5, %v594_v1, %v598_v54  ;;  %v604_v9 = vrot.slane %v603_v14, 4  ;;  %v622_v57 = vrot.slane %v620_v42, 5  ;;  %11181 = vst [vmem:[#allocation36_spill] sm:$0xff] %v9107_v19  ;;  %v9120_v42 = vld [vmem:[%s8720_s28 + $0x9c] sm:$0xf] }
  0x5f   : > { %11180 = vst [vmem:[#allocation35_spill] sm:$0xff] %v9104_v40  ;;  %v617_v50 = vor.u32 %v616_v47, %v613_v12  ;;  %v626_v56 = vrot.slane %v624_v58, 4  ;;  %v632_v44 = vrot.slane %v630_v32, 5  ;;  %v635_v6 = vshrl.u32 %v9088_v26, 16  ;;  %v9127_v20 = vld [vmem:[%s8720_s28 + $0xa0] sm:$0xf] }
  0x60   : > { %11179 = vst [vmem:[#allocation34_spill] sm:$0xff] %v9100_v37  ;;  %7486 = vmatmul.mubr.msk.bf16.gmra.mrb[16].mxu0 %vm780_vm6, %v9100_v37  ;;  %v9114_v7 = vsel %vm8815_vm5, %v604_v9, %v608_v21  ;;  %v638_v54 = vshll.u32 %v9088_v26, 16  ;;  %v644_v14 = vshll.u32 %v9096_v17, 16  ;;  %v648_v1 = vshrl.u32 %v9096_v17, 16 }
  0x61   : > { %11182 = vst [vmem:[#allocation37_spill] sm:$0xff] %v9114_v7  ;;  %v9124_v58 = vcombine.low %v9104_v40, %v9114_v7  ;;  %v618_v12 = vrot.slane %v617_v50, 4  ;;  %v627_v47 = vor.u32 %v626_v56, %v622_v57  ;;  %v637_v32 = vrot.slane %v635_v6, 4 }
  0x62   : > { %v640_v9 = vrot.slane %v638_v54, 5  ;;  %v646_v21 = vrot.slane %v644_v14, 5  ;;  %v650_v37 = vrot.slane %v648_v1, 4  ;;  %v654_v39 = vshll.u32 %v9107_v19, 16  ;;  %v9139_v14 = vld [vmem:[%s8720_s28 + $0xa4] sm:$0x1] }
  0x63   : > { %11183 = vst [vmem:[#allocation38_spill] sm:$0xff] %v9124_v58  ;;  %7489 = vmatprep.mubr.msk.bf16.mxu0 %vm780_vm6, %v9124_v58  ;;  %v9134_v7 = vsel %vm8815_vm5, %v618_v12, %v622_v57  ;;  %v628_v50 = vrot.slane %v627_v47, 4  ;;  %v659_v56 = vshrl.u32 %v9120_v42, 16  ;;  %v662_v6 = vshll.u32 %v9120_v42, 16  ;;  %11185 = vst [vmem:[#allocation40_spill] sm:$0xff] %v9139_v14 }
  0x64   : > { %11184 = vst [vmem:[#allocation39_spill] sm:$0xff] %v9134_v7  ;;  %v641_v40 = vor.u32 %v640_v9, %v637_v32  ;;  %v651_v62 = vor.u32 %v650_v37, %v646_v21  ;;  %v656_v54 = vrot.slane %v654_v39, 5  ;;  %v668_v1 = vshll.u32 %v9127_v20, 16 }
  0x65   : > { %v9147_v58 = vsel %vm8815_vm5, %v628_v50, %v632_v44  ;;  %v661_v57 = vrot.slane %v659_v56, 4  ;;  %v664_v12 = vrot.slane %v662_v6, 5  ;;  %v672_v47 = vshrl.u32 %v9127_v20, 16 }
  0x66   : > { %11186 = vst [vmem:[#allocation41_spill] sm:$0xff] %v9147_v58  ;;  %v9155_v39 = vcombine.low %v9134_v7, %v9147_v58  ;;  %v642_v37 = vrot.slane %v641_v40, 4  ;;  %v652_v32 = vrot.slane %v651_v62, 4  ;;  %v670_v9 = vrot.slane %v668_v1, 5  ;;  %v9170_v62 = vld [vmem:[%s8720_s28 + $0xb0] sm:$0x1] }
  0x67   : > { %v665_v60 = vor.u32 %v664_v12, %v661_v57  ;;  %v674_v41 = vrot.slane %v672_v47, 4  ;;  %v678_v44 = vshll.u32 %v9139_v14, 16  ;;  %v683_v50 = vshrl.u32 %v9143_v31, 16  ;;  %11190 = vst [vmem:[#allocation45_spill] sm:$0xff] %v9170_v62  ;;  %v9175_v57 = vld [vmem:[%s8720_s28 + $0xb4] sm:$0xf] }
  0x68   : > { %11187 = vst [vmem:[#allocation42_spill] sm:$0xff] %v9155_v39  ;;  %7490 = vmatmul.mubr.msk.bf16.gmra.mrb[20].mxu0 %vm780_vm6, %v9155_v39  ;;  %v9163_v56 = vsel %vm8815_vm5, %v642_v37, %v646_v21  ;;  %v9167_v6 = vsel %vm8815_vm5, %v652_v32, %v656_v54  ;;  %v686_v40 = vshll.u32 %v9143_v31, 16  ;;  %v692_v1 = vshll.u32 %v9151_v0, 16  ;;  %v9182_v58 = vld [vmem:[%s8720_s28 + $0xb8] sm:$0xf] }
  0x69   : > { %11188 = vst [vmem:[#allocation43_spill] sm:$0xff] %v9163_v56  ;;  %11189 = vst [vmem:[#allocation44_spill] sm:$0xff] %v9167_v6  ;;  %v9179_v12 = vcombine.low %v9163_v56, %v9167_v6  ;;  %v666_v47 = vrot.slane %v665_v60, 4  ;;  %v675_v21 = vor.u32 %v674_v41, %v670_v9  ;;  %v680_v37 = vrot.slane %v678_v44, 5  ;;  %v9194_v14 = vld [vmem:[%s8720_s28 + $0xbc] sm:$0x1] }
  0x6a   : > { %v685_v54 = vrot.slane %v683_v50, 4  ;;  %v688_v32 = vrot.slane %v686_v40, 5  ;;  %v694_v7 = vrot.slane %v692_v1, 5  ;;  %v696_v39 = vshrl.u32 %v9151_v0, 16 }
  0x6b   : > { %11191 = vst [vmem:[#allocation46_spill] sm:$0xff] %v9179_v12  ;;  %7493 = vmatprep.mubr.msk.bf16.mxu0 %vm780_vm6, %v9179_v12  ;;  %v9189_v5 = vsel %vm8815_vm5, %v666_v47, %v670_v9  ;;  %v676_v6 = vrot.slane %v675_v21, 4  ;;  %v702_v56 = vshll.u32 %v9170_v62, 16  ;;  %v707_v41 = vshrl.u32 %v9175_v57, 16 }
  0x6c   : > { %11192 = vst [vmem:[#allocation47_spill] sm:$0xff] %v9189_v5  ;;  %v689_v60 = vor.u32 %v688_v32, %v685_v54  ;;  %v698_v44 = vrot.slane %v696_v39, 4  ;;  %v710_v50 = vshll.u32 %v9175_v57, 16  ;;  %v716_v40 = vshll.u32 %v9182_v58, 16 }
  0x6d   : > { %v9200_v1 = vsel %vm8815_vm5, %v676_v6, %v680_v37  ;;  %v704_v12 = vrot.slane %v702_v56, 5  ;;  %v709_v9 = vrot.slane %v707_v41, 4  ;;  %v720_v47 = vshrl.u32 %v9182_v58, 16 }
  0x6e   : > { %11193 = vst [vmem:[#allocation48_spill] sm:$0xff] %v9200_v1  ;;  %v9205_v21 = vcombine.low %v9189_v5, %v9200_v1  ;;  %v690_v54 = vrot.slane %v689_v60, 4  ;;  %v699_v39 = vor.u32 %v698_v44, %v694_v7  ;;  %v712_v32 = vrot.slane %v710_v50, 5 }
  0x6f   : > { %v718_v62 = vrot.slane %v716_v40, 5  ;;  %v722_v19 = vrot.slane %v720_v47, 4  ;;  %v726_v43 = vshll.u32 %v9194_v14, 16  ;;  %v6677_v41 = vcombine.low %v8780_v2, %v8785_v4 }
  0x70   : > { %11194 = vst [vmem:[#allocation49_spill] sm:$0xff] %v9205_v21  ;;  %7494 = vmatmul.mubr.msk.bf16.gmra.mrb[24].mxu0 %vm780_vm6, %v9205_v21  ;;  %v9212_v56 = vsel %vm8815_vm5, %v690_v54, %v694_v7  ;;  %v700_v6 = vrot.slane %v699_v39, 4  ;;  %v713_v37 = vor.u32 %v712_v32, %v709_v9  ;;  %v1314_v60 = vrot.slane %v8803_v16, 5 }
  0x71   : > { %11195 = vst [vmem:[#allocation50_spill] sm:$0xff] %v9212_v56  ;;  %v1317_v44 = vrot.slane %v8806_v18, 5  ;;  %v723_v50 = vor.u32 %v722_v19, %v718_v62  ;;  %v728_v40 = vrot.slane %v726_v43, 5  ;;  %v9224_v7 = vcombine.low %v8859_v63, %v8868_v11 }
  0x72   : > { %v9220_v47 = vsel %vm8815_vm5, %v700_v6, %v704_v12  ;;  %v714_v1 = vrot.slane %v713_v37, 4  ;;  %v9228_v9 = vcombine.low %v8883_v24, %v8895_v36  ;;  %v9236_v43 = vcombine.low %v8912_v52, %v8920_v61 }
  0x73   : > { %11196 = vst [vmem:[#allocation51_spill] sm:$0xff] %v9220_v47  ;;  %v9232_v54 = vcombine.low %v9212_v56, %v9220_v47  ;;  %v724_v18 = vrot.slane %v723_v50, 4  ;;  %v9240_v19 = vcombine.low %v8941_v29, %v8949_v38  ;;  %v9248_v39 = vcombine.low %v8973_v3, %v8980_v13 }
  0x74   : > { %v9244_v12 = vsel %vm8815_vm5, %v714_v1, %v718_v62  ;;  %v9252_v32 = vcombine.low %v9000_v51, %v9012_v8  ;;  %v9256_v6 = vcombine.low %v9035_v23, %v9042_v55  ;;  %v9266_v62 = vcombine.low %v9060_v59, %v9068_v46 }
  0x75   : > { %11197 = vst [vmem:[#allocation52_spill] sm:$0xff] %v9232_v54  ;;  %11198 = vst [vmem:[#allocation53_spill] sm:$0xff] %v9244_v12  ;;  %7497 = vmatprep.mubr.msk.bf16.mxu0 %vm780_vm6, %v9232_v54  ;;  %v9262_v37 = vsel %vm8815_vm5, %v724_v18, %v728_v40  ;;  %v9270_v1 = vcombine.low %v9088_v26, %v9096_v17  ;;  %v9274_v50 = vcombine.low %v9120_v42, %v9127_v20  ;;  %vm1302_vm7 = vcmask 1042432  }
  0x76   : > { %11199 = vst [vmem:[#allocation54_spill] sm:$0xff] %v9262_v37  ;;  %v9278_v47 = vcombine.low %v9244_v12, %v9262_v37  ;;  %v9282_v40 = vcombine.low %v9143_v31, %v9151_v0  ;;  %v9286_v18 = vcombine.low %v9175_v57, %v9182_v58  ;;  %vm1303_vm8 = vcmask 1046532  }
  0x77   : > { %v6710_v5 = vrot.slane %v8800_v15, 9  ;;  %vm9291_vm9 = vmor %vm1302_vm7, %vm1303_vm8  ;;  %v1316_v37 = vrot.slane %v1314_v60, 4  ;;  %v9304_v21 = vcombine.low %v8800_v15, %v8803_v16  ;;  %v6714_v15 = vrot.slane %v8883_v24, 9 }
  0x78   : > { %11200 = vst [vmem:[#allocation55_spill] sm:$0xff] %v9278_v47  ;;  %11201 = vst [vmem:[#allocation56_spill] sm:$0xff] %v9282_v40  ;;  %7498 = vmatmul.mubr.msk.bf16.gmra.mrb[28].mxu0 %vm780_vm6, %v9278_v47  ;;  %v6713_v47 = vrot.slane %v8859_v63, 9  ;;  %v1516_v40 = vsel %vm829_vm2, %v9005_v35, 0  ;;  %v1342_v16 = vrot.slane %v8895_v36, 5  ;;  %v6715_v35 = vrot.slane %v8912_v52, 9 }
  0x79   : > { %11202 = vst [vmem:[#allocation57_spill] sm:$0xff] %v9286_v18  ;;  %7503 = vmatprep.mubr.msk.bf16.mxu0 %vm780_vm6, %v6677_v41  ;;  %v1315_v12 = vsel %vm9291_vm9, %v6710_v5, %v1314_v60  ;;  %v1318_v25 = vsel %vm9291_vm9, %v1316_v37, %v1317_v44  ;;  %v1335_v18 = vrot.slane %v8868_v11, 5  ;;  %v9312_v41 = vcombine.low %v8820_v30, %v8823_v34  ;;  %v9322_v63 = vld [vmem:[%s11039_s1 + $0x6] sm:$0x3] }
  0x7a   : > { %v9300_v54 = vcombine.low %v1315_v12, %v1318_v25  ;;  %v1338_v5 = vrot.slane %v8879_v22, 5  ;;  %v1345_v11 = vrot.slane %v8907_v45, 5  ;;  %v1349_v44 = vrot.slane %v8920_v61, 5 }
  0x7b   : > { %v1336_v25 = vsel %vm9291_vm9, %v6713_v47, %v1335_v18  ;;  %v1337_v60 = vrot.slane %v1335_v18, 4  ;;  %v9331_v22 = vcombine.low %v8838_v48, %v8841_v53  ;;  %v1343_v36 = vsel %vm9291_vm9, %v6714_v15, %v1342_v16 }
  0x7c   : > { %v1344_v47 = vrot.slane %v1342_v16, 4  ;;  %v1350_v52 = vsel %vm9291_vm9, %v6715_v35, %v1349_v44  ;;  %v1351_v61 = vrot.slane %v1349_v44, 4  ;;  %v1352_v12 = vrot.slane %v8932_v10, 5 }
  0x7d   : > { %v1339_v24 = vsel %vm9291_vm9, %v1337_v60, %v1338_v5  ;;  %v6716_v18 = vrot.slane %v8941_v29, 9  ;;  %v1359_v5 = vrot.slane %v8960_v49, 5  ;;  %v6717_v15 = vrot.slane %v8973_v3, 9 }
  0x7e   : > { %v9339_v45 = vcombine.low %v1336_v25, %v1339_v24  ;;  %v1346_v37 = vsel %vm9291_vm9, %v1344_v47, %v1345_v11  ;;  %v1353_v60 = vsel %vm9291_vm9, %v1351_v61, %v1352_v12  ;;  %v1363_v10 = vrot.slane %v8980_v13, 5 }
  0x7f   : > { %v9351_v25 = vcombine.low %v1343_v36, %v1346_v37  ;;  %v9357_v16 = vcombine.low %v1350_v52, %v1353_v60  ;;  %v1366_v29 = vrot.slane %v8990_v28, 5  ;;  %v6718_v44 = vrot.slane %v9000_v51, 9 }
  0x80   : > { %7504 = vmatmul.mubr.msk.bf16.vlgmr.msra.gmra.mrb[0].mxu0 %vm780_vm6, %v9304_v21  ;;  %v1365_v49 = vrot.slane %v1363_v10, 4  ;;  %v1370_v24 = vrot.slane %v9012_v8, 5  ;;  %v1373_v13 = vrot.slane %v9025_v33, 5  ;;  %v6719_v36 = vrot.slane %v9035_v23, 9 }
  0x81   : > { %7536 = vmatpush3.bf16.msra.mxu0 %v1516_v40  ;;  %7507 = vmatprep.mubr.msk.bf16.mxu0 %vm780_vm6, %v9312_v41  ;;  %v1356_v40 = vrot.slane %v8949_v38, 5  ;;  %v1364_v38 = vsel %vm9291_vm9, %v6717_v15, %v1363_v10  ;;  %v1377_v47 = vrot.slane %v9042_v55, 5  ;;  %v1380_v55 = vrot.slane %v9053_v27, 5 }
  0x82   : > { %8594 = vmatprep.subr.msk.bf16.mxu0 %vm829_vm2, %v9322_v63  ;;  %v1367_v28 = vsel %vm9291_vm9, %v1365_v49, %v1366_v29  ;;  %v1371_v61 = vsel %vm9291_vm9, %v6718_v44, %v1370_v24  ;;  %v1372_v51 = vrot.slane %v1370_v24, 4  ;;  %v6720_v37 = vrot.slane %v9060_v59, 9  ;;  %v11206_v59 = vld [vmem:[#allocation36_spill] sm:$0xff] }
  0x83   : > { %v1357_v11 = vsel %vm9291_vm9, %v6716_v18, %v1356_v40  ;;  %v1358_v35 = vrot.slane %v1356_v40, 4  ;;  %v9379_v8 = vcombine.low %v1364_v38, %v1367_v28  ;;  %v1378_v33 = vsel %vm9291_vm9, %v6719_v36, %v1377_v47  ;;  %v11205_v40 = vld [vmem:[#allocation32_spill] sm:$0xff] }
  0x84   : > { %v1379_v23 = vrot.slane %v1377_v47, 4  ;;  %v1374_v12 = vsel %vm9291_vm9, %v1372_v51, %v1373_v13  ;;  %v1384_v18 = vrot.slane %v9068_v46, 5  ;;  %v6721_v10 = vrot.slane %v9088_v26, 9 }
  0x85   : > { %v1360_v3 = vsel %vm9291_vm9, %v1358_v35, %v1359_v5  ;;  %v1387_v5 = vrot.slane %v11205_v40, 5  ;;  %v9391_v60 = vcombine.low %v1371_v61, %v1374_v12  ;;  %v1391_v27 = vrot.slane %v9096_v17, 5  ;;  %v11207_v17 = vld [vmem:[#allocation40_spill] sm:$0xff] }
  0x86   : > { %v9371_v52 = vcombine.low %v1357_v11, %v1360_v3  ;;  %v1381_v15 = vsel %vm9291_vm9, %v1379_v23, %v1380_v55  ;;  %v1385_v35 = vsel %vm9291_vm9, %v6720_v37, %v1384_v18  ;;  %v1386_v29 = vrot.slane %v1384_v18, 4  ;;  %v11208_v23 = vld [vmem:[#allocation45_spill] sm:$0xff] }
  0x87   : > { %v9397_v11 = vcombine.low %v1378_v33, %v1381_v15  ;;  %v1394_v38 = vrot.slane %v11206_v59, 5  ;;  %v1392_v46 = vsel %vm9291_vm9, %v6721_v10, %v1391_v27  ;;  %v1393_v49 = vrot.slane %v1391_v27, 4  ;;  %v11209_v27 = vld [vmem:[#allocation3_spill] sm:$0xff] }
  0x88   : > { %7508 = vmatmul.mubr.msk.bf16.gmra.mrb[4].mxu0 %vm780_vm6, %v9331_v22  ;;  %v6722_v44 = vrot.slane %v9120_v42, 9  ;;  %v1398_v24 = vrot.slane %v9127_v20, 5  ;;  %v1388_v26 = vsel %vm9291_vm9, %v1386_v29, %v1387_v5  ;;  %v1401_v3 = vrot.slane %v11207_v17, 5 }
  0x89   : > { %7511 = vmatprep.mubr.msk.bf16.mxu0 %vm780_vm6, %v9224_v7  ;;  %v6723_v13 = vrot.slane %v9143_v31, 9  ;;  %v1405_v36 = vrot.slane %v9151_v0, 5  ;;  %v9411_v47 = vcombine.low %v1385_v35, %v1388_v26  ;;  %v1395_v28 = vsel %vm9291_vm9, %v1393_v49, %v1394_v38  ;;  %v11210_v38 = vld [vmem:[#allocation56_spill] sm:$0xff] }
  0x8a   : > { %v1399_v61 = vsel %vm9291_vm9, %v6722_v44, %v1398_v24  ;;  %v1400_v42 = vrot.slane %v1398_v24, 4  ;;  %v9417_v51 = vcombine.low %v1392_v46, %v1395_v28  ;;  %v1408_v55 = vrot.slane %v11208_v23, 5 }
  0x8b   : > { %v1406_v20 = vsel %vm9291_vm9, %v6723_v13, %v1405_v36  ;;  %v1407_v33 = vrot.slane %v1405_v36, 4  ;;  %v6724_v31 = vrot.slane %v9175_v57, 9  ;;  %v1412_v12 = vrot.slane %v9182_v58, 5 }
  0x8c   : > { %v1402_v0 = vsel %vm9291_vm9, %v1400_v42, %v1401_v3  ;;  %v1415_v37 = vrot.slane %v9194_v14, 5  ;;  %v1307_v14 = vrot.slane %v8785_v4, 5  ;;  %v1310_v35 = vrot.slane %v11209_v27, 5  ;;  %v11212_v3 = vld [vmem:[#allocation57_spill] sm:$0xff]  ;;  %v11213_v42 = vld [vmem:[#allocation8_spill] sm:$0xff] }
  0x8d   : > { %v9431_v18 = vcombine.low %v1399_v61, %v1402_v0  ;;  %v1409_v40 = vsel %vm9291_vm9, %v1407_v33, %v1408_v55  ;;  %v1413_v15 = vsel %vm9291_vm9, %v6724_v31, %v1412_v12  ;;  %v1414_v10 = vrot.slane %v1412_v12, 4  ;;  %v6795_v0 = vld [vmem:[%s11039_s1 + $0xa] sm:$0x3]  ;;  %v9562_v31 = vld [vmem:[%s8720_s28 + $0xc4] sm:$0xf] }
  0x8e   : > { %v9435_v5 = vcombine.low %v1406_v20, %v1409_v40  ;;  %v6709_v29 = vrot.slane %v8780_v2, 9  ;;  %v1309_v59 = vrot.slane %v1307_v14, 4  ;;  %v1321_v44 = vrot.slane %v8823_v34, 5  ;;  %v11211_v2 = vld [vmem:[#allocation5_spill] sm:$0xff] }
  0x8f   : > { %v1416_v57 = vsel %vm9291_vm9, %v1414_v10, %v1415_v37  ;;  %v6711_v24 = vrot.slane %v8820_v30, 9  ;;  %v1324_v17 = vrot.slane %v11211_v2, 5  ;;  %v1328_v13 = vrot.slane %v8841_v53, 5  ;;  %v6776_v53 = vld [vmem:[%s11039_s1 + $0x8] sm:$0x3]  ;;  %v11215_v10 = vld [vmem:[#allocation12_spill] sm:$0xff] }
  0x90   : > { %7512 = vmatmul.mubr.msk.bf16.gmra.mrb[8].mxu0 %vm780_vm6, %v9228_v9  ;;  %v9441_v58 = vcombine.low %v1413_v15, %v1416_v57  ;;  %v1308_v46 = vsel %vm9291_vm9, %v6709_v29, %v1307_v14  ;;  %v1311_v49 = vsel %vm9291_vm9, %v1309_v59, %v1310_v35  ;;  %v1323_v26 = vrot.slane %v1321_v44, 4  ;;  %v11214_v37 = vld [vmem:[#allocation9_spill] sm:$0xff]  ;;  %v11216_v57 = vld [vmem:[#allocation15_spill] sm:$0xff]  ;;  %v11217_v14 = vld [vmem:[#allocation18_spill] sm:$0xff] }
  0x91   : > { %7515 = vmatprep.mubr.msk.bf16.mxu0 %vm780_vm6, %v9236_v43  ;;  %v6726_v4 = vcombine.low %v1308_v46, %v1311_v49  ;;  %v1322_v36 = vsel %vm9291_vm9, %v6711_v24, %v1321_v44  ;;  %v6712_v30 = vrot.slane %v8838_v48, 9  ;;  %v1330_v61 = vrot.slane %v1328_v13, 4  ;;  %v6813_v15 = vld [vmem:[%s11039_s1 + $0xc] sm:$0x3]  ;;  %v11219_v35 = vld [vmem:[#allocation24_spill] sm:$0xff]  ;;  %v11220_v29 = vld [vmem:[#allocation27_spill] sm:$0xff] }
  0x92   : > { %v1325_v28 = vsel %vm9291_vm9, %v1323_v26, %v1324_v17  ;;  %v1331_v20 = vrot.slane %v11213_v42, 5  ;;  %v1722_v33 = vsel %vm829_vm2, %v9322_v63, 0  ;;  %v1982_v55 = vsel %vm829_vm2, %v6776_v53, 0  ;;  %v11218_v27 = vld [vmem:[#allocation21_spill] sm:$0xff]  ;;  %v11221_v59 = vld [vmem:[#allocation30_spill] sm:$0xff] }
  0x93   : > { %v9477_v34 = vcombine.low %v1322_v36, %v1325_v28  ;;  %v1329_v48 = vsel %vm9291_vm9, %v6712_v30, %v1328_v13  ;;  %v2194_v40 = vsel %vm829_vm2, %v6795_v0, 0  ;;  %v11222_v46 = vld [vmem:[#allocation34_spill] sm:$0xff]  ;;  %v1931_v24 = vshrl.u32 %v9562_v31, 16  ;;  %v336_v30 = vld [vmem:[%s8720_s28 + $0xc8] sm:$0x1] }
  0x94   : > { %v1332_v23 = vsel %vm9291_vm9, %v1330_v61, %v1331_v20  ;;  %v11223_v49 = vld [vmem:[#allocation38_spill] sm:$0xff]  ;;  %v1927_v2 = vshll.u32 %v9562_v31, 16  ;;  %v11226_v42 = vld [vmem:[#allocation49_spill] sm:$0xff]  ;;  %vm3563_vm10 = vcmask 27648   ;;  %vm3564_vm11 = vsmask.f32 7938 }
  0x95   : > { %v9495_v63 = vcombine.low %v1329_v48, %v1332_v23  ;;  %v11224_v26 = vld [vmem:[#allocation42_spill] sm:$0xff]  ;;  %v1933_v28 = vrot.slane %v1931_v24, 4  ;;  %vm3239_vm12 = vsmask.f32 256  ;;  %vm3240_vm13 = vsmask.f32 4368  ;;  %vm9819_vm15 = vmand %vm3563_vm10, %vm3564_vm11 }
  0x96   : > { %v1929_v36 = vrot.slane %v1927_v2, 5  ;;  %v11225_v61 = vld [vmem:[#allocation46_spill] sm:$0xff]  ;;  %v2400_v2 = vsel %vm829_vm2, %v6813_v15, 0  ;;  %vm3571_vm14 = vcmask 24576   ;;  %vm9826_vm0 = vmor %vm3239_vm12, %vm3240_vm13 }
  0x97   : > { %vm9832_vm1 = vmand %vm3571_vm14, %vm3239_vm12 }
  0x98   : > { %7516 = vmatmul.mubr.msk.bf16.gmra.mrb[12].mxu0 %vm780_vm6, %v9240_v19 }
  0x99   : > { %7519 = vmatprep.mubr.msk.bf16.mxu0 %vm780_vm6, %v9248_v39 }
  0xa0   : > { %7520 = vmatmul.mubr.msk.bf16.gmra.mrb[16].mxu0 %vm780_vm6, %v9252_v32 }
  0xa1   : > { %7523 = vmatprep.mubr.msk.bf16.mxu0 %vm780_vm6, %v9256_v6 }
  0xa8   : > { %7524 = vmatmul.mubr.msk.bf16.gmra.mrb[20].mxu0 %vm780_vm6, %v9266_v62 }
  0xa9   : > { %7527 = vmatprep.mubr.msk.bf16.mxu0 %vm780_vm6, %v9270_v1 }
  0xb0   : > { %7528 = vmatmul.mubr.msk.bf16.gmra.mrb[24].mxu0 %vm780_vm6, %v9274_v50 }
  0xb1   : > { %7531 = vmatprep.mubr.msk.bf16.mxu0 %vm780_vm6, %v11210_v38 }
  0xb8   : > { %7532 = vmatmul.mubr.msk.bf16.gmra.mrb[28].mxu0 %vm780_vm6, %v11212_v3 }
  0xb9   : > { %7537 = vmatprep.mubr.msk.bf16.mxu0 %vm780_vm6, %v6726_v4 }
  0xc0   : > { %7538 = vmatmul.mubr.msk.bf16.vlgmr.msra.gmra.mrb[0].mxu0 %vm780_vm6, %v9300_v54 }
  0xc1   : > { %7570 = vmatpush3.bf16.msra.mxu0 %v1722_v33  ;;  %7541 = vmatprep.mubr.msk.bf16.mxu0 %vm780_vm6, %v9477_v34  ;;  %v1934_v33 = vor.u32 %v1933_v28, %v1929_v36 }
  0xc2   : > { %8595 = vmatprep.subr.msk.bf16.mxu0 %vm829_vm2, %v6776_v53  ;;  %v1937_v53 = vshll.u32 %v336_v30, 16 }
  0xc3   : > { %v1935_v23 = vrot.slane %v1934_v33, 4 }
  0xc8   : > { %7542 = vmatmul.mubr.msk.bf16.gmra.mrb[4].mxu0 %vm780_vm6, %v9495_v63 }
  0xc9   : > { %7545 = vmatprep.mubr.msk.bf16.mxu0 %vm780_vm6, %v9339_v45 }
  0xd0   : > { %7546 = vmatmul.mubr.msk.bf16.gmra.mrb[8].mxu0 %vm780_vm6, %v9351_v25 }
  0xd1   : > { %7549 = vmatprep.mubr.msk.bf16.mxu0 %vm780_vm6, %v9357_v16 }
  0xd8   : > { %7550 = vmatmul.mubr.msk.bf16.gmra.mrb[12].mxu0 %vm780_vm6, %v9371_v52 }
  0xd9   : > { %7553 = vmatprep.mubr.msk.bf16.mxu0 %vm780_vm6, %v9379_v8 }
  0xe0   : > { %7554 = vmatmul.mubr.msk.bf16.gmra.mrb[16].mxu0 %vm780_vm6, %v9391_v60 }
  0xe1   : > { %7557 = vmatprep.mubr.msk.bf16.mxu0 %vm780_vm6, %v9397_v11 }
  0xe8   : > { %7558 = vmatmul.mubr.msk.bf16.gmra.mrb[20].mxu0 %vm780_vm6, %v9411_v47 }
  0xe9   : > { %7561 = vmatprep.mubr.msk.bf16.mxu0 %vm780_vm6, %v9417_v51 }
  0xf0   : > { %7562 = vmatmul.mubr.msk.bf16.gmra.mrb[24].mxu0 %vm780_vm6, %v9431_v18 }
  0xf1   : > { %7565 = vmatprep.mubr.msk.bf16.mxu0 %vm780_vm6, %v9435_v5 }
  0xf8   : > { %7566 = vmatmul.mubr.msk.bf16.gmra.mrb[28].mxu0 %vm780_vm6, %v9441_v58 }
  0xf9   : > { %7571 = vmatprep.mubr.msk.bf16.mxu0 %vm780_vm6, %v9304_v21  ;;  %v9559_v21 = vld [vmem:[%s8720_s28 + $0xc0] sm:$0xf] }
  0xfa   : > { %v9566_v12 = vcombine.low %v9559_v21, %v9562_v31  ;;  %v1918_v44 = vshrl.u32 %v9559_v21, 16  ;;  %v1921_v4 = vshll.u32 %v9559_v21, 16 }
  0xfc   : > { %v1920_v17 = vrot.slane %v1918_v44, 4  ;;  %v1923_v13 = vrot.slane %v1921_v4, 5 }
  0xfe   : > { %v1924_v20 = vor.u32 %v1923_v13, %v1920_v17  ;;  %v6831_v17 = vld [vmem:[%s11039_s1 + $0xe] sm:$0x3] }
 0x100   : > { %7572 = vmatmul.mubr.msk.bf16.vlgmr.msra.gmra.mrb[0].mxu0 %vm780_vm6, %v9312_v41  ;;  %v1925_v48 = vrot.slane %v1924_v20, 4 }
 0x101   : > { %7604 = vmatpush3.bf16.msra.mxu0 %v1982_v55  ;;  %7575 = vmatprep.mubr.msk.bf16.mxu0 %vm780_vm6, %v9331_v22  ;;  %v1939_v55 = vrot.slane %v1937_v53, 5 }
 0x102   : > { %8596 = vmatprep.subr.msk.bf16.mxu0 %vm829_vm2, %v6795_v0  ;;  %v11227_v0 = vld [vmem:[#allocation52_spill] sm:$0xff]  ;;  %v9612_v44 = vsel %vm8815_vm5, %v1925_v48, %v1929_v36  ;;  %v2183_v36 = vrot.slane %v336_v30, 5  ;;  %v3683_v30 = vld [vmem:[#allocation2 + $0x8] sm:$0x1] }
 0x103   : > { %11230 = vst [vmem:[#allocation32_spill] sm:$0xff] %v9612_v44  ;;  %v9616_v4 = vsel %vm8815_vm5, %v1935_v23, %v1939_v55  ;;  %v3756_v48 = vshll.u32 %v3683_v30, 16 }
 0x104   : > { %11231 = vst [vmem:[#allocation36_spill] sm:$0xff] %v9616_v4  ;;  %v9620_v24 = vcombine.low %v9612_v44, %v9616_v4 }
 0x108   : > { %7576 = vmatmul.mubr.msk.bf16.gmra.mrb[4].mxu0 %vm780_vm6, %v9224_v7 }
 0x109   : > { %7579 = vmatprep.mubr.msk.bf16.mxu0 %vm780_vm6, %v9228_v9 }
 0x110   : > { %7580 = vmatmul.mubr.msk.bf16.gmra.mrb[8].mxu0 %vm780_vm6, %v9236_v43 }
 0x111   : > { %7583 = vmatprep.mubr.msk.bf16.mxu0 %vm780_vm6, %v9240_v19 }
 0x118   : > { %7584 = vmatmul.mubr.msk.bf16.gmra.mrb[12].mxu0 %vm780_vm6, %v9248_v39 }
 0x119   : > { %7587 = vmatprep.mubr.msk.bf16.mxu0 %vm780_vm6, %v9252_v32 }
 0x120   : > { %7588 = vmatmul.mubr.msk.bf16.gmra.mrb[16].mxu0 %vm780_vm6, %v9256_v6 }
 0x121   : > { %7591 = vmatprep.mubr.msk.bf16.mxu0 %vm780_vm6, %v9266_v62 }
 0x128   : > { %7592 = vmatmul.mubr.msk.bf16.gmra.mrb[20].mxu0 %vm780_vm6, %v9270_v1 }
 0x129   : > { %7595 = vmatprep.mubr.msk.bf16.mxu0 %vm780_vm6, %v9274_v50 }
 0x130   : > { %7596 = vmatmul.mubr.msk.bf16.gmra.mrb[24].mxu0 %vm780_vm6, %v11210_v38 }
 0x131   : > { %7599 = vmatprep.mubr.msk.bf16.mxu0 %vm780_vm6, %v11212_v3 }
 0x138   : > { %7600 = vmatmul.mubr.msk.bf16.gmra.mrb[28].mxu0 %vm780_vm6, %v9566_v12 }
 0x139   : > { %7605 = vmatprep.mubr.msk.bf16.mxu0 %vm780_vm6, %v11214_v37  ;;  %v11228_v37 = vld [vmem:[#allocation55_spill] sm:$0xff] }
 0x140   : > { %7606 = vmatmul.mubr.msk.bf16.vlgmr.msra.gmra.mrb[0].mxu0 %vm780_vm6, %v11215_v10 }
 0x141   : > { %7638 = vmatpush3.bf16.msra.mxu0 %v2194_v40  ;;  %7609 = vmatprep.mubr.msk.bf16.mxu0 %vm780_vm6, %v11216_v57 }
 0x142   : > { %8597 = vmatprep.subr.msk.bf16.mxu0 %vm829_vm2, %v6813_v15  ;;  %v6794_v15 = vrot.slane %v9559_v21, 9  ;;  %v2628_v21 = vsel %vm829_vm2, %v6831_v17, 0 }
 0x148   : > { %7610 = vmatmul.mubr.msk.bf16.gmra.mrb[4].mxu0 %vm780_vm6, %v11217_v14 }
 0x149   : > { %7613 = vmatprep.mubr.msk.bf16.mxu0 %vm780_vm6, %v11218_v27 }
 0x150   : > { %7614 = vmatmul.mubr.msk.bf16.gmra.mrb[8].mxu0 %vm780_vm6, %v11219_v35 }
 0x151   : > { %7617 = vmatprep.mubr.msk.bf16.mxu0 %vm780_vm6, %v11220_v29 }
 0x158   : > { %7618 = vmatmul.mubr.msk.bf16.gmra.mrb[12].mxu0 %vm780_vm6, %v11221_v59 }
 0x159   : > { %7621 = vmatprep.mubr.msk.bf16.mxu0 %vm780_vm6, %v11222_v46 }
 0x160   : > { %7622 = vmatmul.mubr.msk.bf16.gmra.mrb[16].mxu0 %vm780_vm6, %v11223_v49 }
 0x161   : > { %7625 = vmatprep.mubr.msk.bf16.mxu0 %vm780_vm6, %v11224_v26 }
 0x168   : > { %7626 = vmatmul.mubr.msk.bf16.gmra.mrb[20].mxu0 %vm780_vm6, %v11225_v61 }
 0x169   : > { %7629 = vmatprep.mubr.msk.bf16.mxu0 %vm780_vm6, %v11226_v42 }
 0x170   : > { %7630 = vmatmul.mubr.msk.bf16.gmra.mrb[24].mxu0 %vm780_vm6, %v11227_v0 }
 0x171   : > { %7633 = vmatprep.mubr.msk.bf16.mxu0 %vm780_vm6, %v11228_v37 }
 0x178   : > { %7634 = vmatmul.mubr.msk.bf16.gmra.mrb[28].mxu0 %vm780_vm6, %v9620_v24 }
 0x179   : > { %7639 = vmatprep.mubr.msk.bf16.mxu0 %vm780_vm6, %v9300_v54  ;;  %v2180_v54 = vrot.slane %v9562_v31, 5  ;;  %v6850_v31 = vld [vmem:[%s11039_s1 + $0x10] sm:$0x3] }
 0x17b   : > { %v2182_v13 = vrot.slane %v2180_v54, 4  ;;  %v2181_v28 = vsel %vm9291_vm9, %v6794_v15, %v2180_v54  ;;  %v9792_v54 = vld [vmem:[%s11040_s2] sm:$0x3] }
 0x17c   : > { %v9799_v15 = vld [vmem:[%s11041_s3] ss:$0 sm:$0xff] }
 0x17d   : > { %v2184_v20 = vsel %vm9291_vm9, %v2182_v13, %v2183_v36  ;;  %v9804_v13 = vld [vmem:[%s11042_s4] ss:$0 sm:$0xff] }
 0x17e   : > { %v9665_v33 = vcombine.low %v2181_v28, %v2184_v20 }
 0x180   : > { %7640 = vmatmul.mubr.msk.bf16.vlgmr.msra.gmra.mrb[0].mxu0 %vm780_vm6, %v9477_v34 }
 0x181   : > { %7672 = vmatpush3.bf16.msra.mxu0 %v2400_v2  ;;  %7643 = vmatprep.mubr.msk.bf16.mxu0 %vm780_vm6, %v9495_v63 }
 0x182   : > { %8598 = vmatprep.subr.msk.bf16.mxu0 %vm829_vm2, %v6831_v17 }
 0x188   : > { %7644 = vmatmul.mubr.msk.bf16.gmra.mrb[4].mxu0 %vm780_vm6, %v9339_v45 }
 0x189   : > { %7647 = vmatprep.mubr.msk.bf16.mxu0 %vm780_vm6, %v9351_v25 }
 0x190   : > { %7648 = vmatmul.mubr.msk.bf16.gmra.mrb[8].mxu0 %vm780_vm6, %v9357_v16 }
 0x191   : > { %7651 = vmatprep.mubr.msk.bf16.mxu0 %vm780_vm6, %v9371_v52 }
 0x198   : > { %7652 = vmatmul.mubr.msk.bf16.gmra.mrb[12].mxu0 %vm780_vm6, %v9379_v8 }
 0x199   : > { %7655 = vmatprep.mubr.msk.bf16.mxu0 %vm780_vm6, %v9391_v60 }
 0x1a0   : > { %7656 = vmatmul.mubr.msk.bf16.gmra.mrb[16].mxu0 %vm780_vm6, %v9397_v11 }
 0x1a1   : > { %7659 = vmatprep.mubr.msk.bf16.mxu0 %vm780_vm6, %v9411_v47 }
 0x1a8   : > { %7660 = vmatmul.mubr.msk.bf16.gmra.mrb[20].mxu0 %vm780_vm6, %v9417_v51 }
 0x1a9   : > { %7663 = vmatprep.mubr.msk.bf16.mxu0 %vm780_vm6, %v9431_v18 }
 0x1b0   : > { %7664 = vmatmul.mubr.msk.bf16.gmra.mrb[24].mxu0 %vm780_vm6, %v9435_v5 }
 0x1b1   : > { %7667 = vmatprep.mubr.msk.bf16.mxu0 %vm780_vm6, %v9441_v58 }
 0x1b8   : > { %7668 = vmatmul.mubr.msk.bf16.gmra.mrb[28].mxu0 %vm780_vm6, %v9665_v33 }
 0x1b9   : > { %7673 = vmatprep.mubr.msk.bf16.mxu0 %vm780_vm6, %v9312_v41 }
 0x1c0   : > { %7674 = vmatmul.mubr.msk.bf16.vlgmr.msra.gmra.mrb[0].mxu0 %vm780_vm6, %v9331_v22 }
 0x1c1   : > { %7706 = vmatpush3.bf16.msra.mxu0 %v2628_v21  ;;  %7677 = vmatprep.mubr.msk.bf16.mxu0 %vm780_vm6, %v9224_v7  ;;  %v337_v7 = vld [vmem:[%s8720_s28 + $0xcc] sm:$0xf] }
 0x1c2   : > { %8599 = vmatprep.subr.msk.bf16.mxu0 %vm829_vm2, %v6850_v31 }
 0x1c8   : > { %7678 = vmatmul.mubr.msk.bf16.gmra.mrb[4].mxu0 %vm780_vm6, %v9228_v9  ;;  %v338_v9 = vld [vmem:[%s8720_s28 + $0xd0] sm:$0xf] }
 0x1c9   : > { %7681 = vmatprep.mubr.msk.bf16.mxu0 %vm780_vm6, %v9236_v43  ;;  %v6814_v43 = vcombine.low %v337_v7, %v338_v9 }
 0x1d0   : > { %7682 = vmatmul.mubr.msk.bf16.gmra.mrb[8].mxu0 %vm780_vm6, %v9240_v19  ;;  %v2840_v19 = vsel %vm829_vm2, %v6850_v31, 0 }
 0x1d1   : > { %7685 = vmatprep.mubr.msk.bf16.mxu0 %vm780_vm6, %v9248_v39  ;;  %v2596_v39 = vshrl.u32 %v337_v7, 16 }
 0x1d8   : > { %7686 = vmatmul.mubr.msk.bf16.gmra.mrb[12].mxu0 %vm780_vm6, %v9252_v32  ;;  %v2599_v32 = vshll.u32 %v337_v7, 16 }
 0x1d9   : > { %7689 = vmatprep.mubr.msk.bf16.mxu0 %vm780_vm6, %v9256_v6  ;;  %v2609_v6 = vshrl.u32 %v338_v9, 16 }
 0x1db   : > { %v2611_v22 = vrot.slane %v2609_v6, 4 }
 0x1e0   : > { %7690 = vmatmul.mubr.msk.bf16.gmra.mrb[16].mxu0 %vm780_vm6, %v9266_v62  ;;  %v2605_v62 = vshll.u32 %v338_v9, 16 }
 0x1e1   : > { %7693 = vmatprep.mubr.msk.bf16.mxu0 %vm780_vm6, %v9270_v1  ;;  %v2598_v1 = vrot.slane %v2596_v39, 4 }
 0x1e2   : > { %v2607_v41 = vrot.slane %v2605_v62, 5 }
 0x1e8   : > { %7694 = vmatmul.mubr.msk.bf16.gmra.mrb[20].mxu0 %vm780_vm6, %v9274_v50  ;;  %v2601_v50 = vrot.slane %v2599_v32, 5 }
 0x1e9   : > { %7697 = vmatprep.mubr.msk.bf16.mxu0 %vm780_vm6, %v11210_v38  ;;  %v339_v38 = vld [vmem:[%s8720_s28 + $0xd4] sm:$0x1] }
 0x1f0   : > { %7698 = vmatmul.mubr.msk.bf16.gmra.mrb[24].mxu0 %vm780_vm6, %v11212_v3  ;;  %v2602_v3 = vor.u32 %v2601_v50, %v2598_v1 }
 0x1f1   : > { %7701 = vmatprep.mubr.msk.bf16.mxu0 %vm780_vm6, %v9566_v12  ;;  %v2612_v12 = vor.u32 %v2611_v22, %v2607_v41 }
 0x1f8   : > { %7702 = vmatmul.mubr.msk.bf16.gmra.mrb[28].mxu0 %vm780_vm6, %v6814_v43 }
 0x1f9   : > { %7707 = vmatprep.mubr.msk.bf16.mxu0 %vm780_vm6, %v11215_v10  ;;  %v2615_v10 = vshll.u32 %v339_v38, 16 }
 0x200   : > { %7708 = vmatmul.mubr.msk.bf16.vlgmr.msra.gmra.mrb[0].mxu0 %vm780_vm6, %v11216_v57  ;;  %v2603_v57 = vrot.slane %v2602_v3, 4 }
 0x201   : > { %7740 = vmatpush3.bf16.msra.mxu0 %v2840_v19  ;;  %7711 = vmatprep.mubr.msk.bf16.mxu0 %vm780_vm6, %v11217_v14  ;;  %v2613_v14 = vrot.slane %v2612_v12, 4 }
 0x208   : > { %7712 = vmatmul.mubr.msk.bf16.gmra.mrb[4].mxu0 %vm780_vm6, %v11218_v27  ;;  %v2617_v27 = vrot.slane %v2615_v10, 5 }
 0x209   : > { %7715 = vmatprep.mubr.msk.bf16.mxu0 %vm780_vm6, %v11219_v35  ;;  %v2608_v35 = vsel %vm8815_vm5, %v2603_v57, %v2607_v41 }
 0x210   : > { %7716 = vmatmul.mubr.msk.bf16.gmra.mrb[8].mxu0 %vm780_vm6, %v11220_v29  ;;  %v2618_v29 = vsel %vm8815_vm5, %v2613_v14, %v2617_v27 }
 0x211   : > { %7719 = vmatprep.mubr.msk.bf16.mxu0 %vm780_vm6, %v11221_v59  ;;  %v6832_v59 = vcombine.low %v2608_v35, %v2618_v29 }
 0x218   : > { %7720 = vmatmul.mubr.msk.bf16.gmra.mrb[12].mxu0 %vm780_vm6, %v11222_v46 }
 0x219   : > { %7723 = vmatprep.mubr.msk.bf16.mxu0 %vm780_vm6, %v11223_v49 }
 0x220   : > { %7724 = vmatmul.mubr.msk.bf16.gmra.mrb[16].mxu0 %vm780_vm6, %v11224_v26 }
 0x221   : > { %7727 = vmatprep.mubr.msk.bf16.mxu0 %vm780_vm6, %v11225_v61  ;;  %v6902_v61 = vld [vmem:[%s11040_s2 + $0x2] sm:$0x3] }
 0x222   : > { %8600 = vmatprep.subr.msk.bf16.mxu1 %vm829_vm2, %v6902_v61 }
 0x228   : > { %7728 = vmatmul.mubr.msk.bf16.gmra.mrb[20].mxu0 %vm780_vm6, %v11226_v42 }
 0x229   : > { %7731 = vmatprep.mubr.msk.bf16.mxu0 %vm780_vm6, %v11227_v0  ;;  %v3758_v0 = vrot.slane %v3756_v48, 5  ;;  %v3580_v48 = vld [vmem:[#allocation2 + $0x20] sm:$0x1] }
 0x230   : > { %7732 = vmatmul.mubr.msk.bf16.gmra.mrb[24].mxu0 %vm780_vm6, %v11228_v37  ;;  %v4219_v37 = vsel %vm829_vm2, %v6902_v61, 0 }
 0x231   : > { %7735 = vmatprep.mubr.msk.bf16.mxu0 %vm780_vm6, %v9620_v24  ;;  %7774 = vmatpush3.bf16.msra.mxu1 %v4219_v37 }
 0x232   : > { %8601 = vmatprep.subr.msk.bf16.mxu1 %vm829_vm2, %v9792_v54 }
 0x238   : > { %7736 = vmatmul.mubr.msk.bf16.gmra.mrb[28].mxu0 %vm780_vm6, %v6832_v59 }
 0x239   : > { %7741 = vmatprep.mubr.msk.bf16.mxu0 %vm780_vm6, %v9477_v34 }
 0x240   : > { %7742 = vmatmul.mubr.msk.bf16.vlgmr.msra.gmra.mrb[0].mxu0 %vm780_vm6, %v9495_v63 }
 0x241   : > { %7745 = vmatprep.mubr.msk.bf16.mxu0 %vm780_vm6, %v9339_v45  ;;  %v2826_v45 = vrot.slane %v338_v9, 5 }
 0x248   : > { %7746 = vmatmul.mubr.msk.bf16.gmra.mrb[4].mxu0 %vm780_vm6, %v9351_v25  ;;  %v6849_v25 = vrot.slane %v337_v7, 9 }
 0x249   : > { %7749 = vmatprep.mubr.msk.bf16.mxu0 %vm780_vm6, %v9357_v16  ;;  %v2828_v16 = vrot.slane %v2826_v45, 4 }
 0x250   : > { %7750 = vmatmul.mubr.msk.bf16.gmra.mrb[8].mxu0 %vm780_vm6, %v9371_v52  ;;  %v2829_v52 = vrot.slane %v339_v38, 5 }
 0x251   : > { %7753 = vmatprep.mubr.msk.bf16.mxu0 %vm780_vm6, %v9379_v8  ;;  %v2827_v8 = vsel %vm9291_vm9, %v6849_v25, %v2826_v45 }
 0x258   : > { %7754 = vmatmul.mubr.msk.bf16.gmra.mrb[12].mxu0 %vm780_vm6, %v9391_v60  ;;  %v2830_v60 = vsel %vm9291_vm9, %v2828_v16, %v2829_v52 }
 0x259   : > { %7757 = vmatprep.mubr.msk.bf16.mxu0 %vm780_vm6, %v9397_v11  ;;  %v6851_v11 = vcombine.low %v2827_v8, %v2830_v60 }
 0x260   : > { %7758 = vmatmul.mubr.msk.bf16.gmra.mrb[16].mxu0 %vm780_vm6, %v9411_v47  ;;  %v3681_v47 = vld [vmem:[#allocation2] sm:$0xf] }
 0x261   : > { %7761 = vmatprep.mubr.msk.bf16.mxu0 %vm780_vm6, %v9417_v51  ;;  %v3682_v51 = vld [vmem:[#allocation2 + $0x4] sm:$0xf] }
 0x262   : > { %v3746_v34 = vshll.u32 %v3682_v51, 16  ;;  %v3750_v63 = vshrl.u32 %v3682_v51, 16 }
 0x264   : > { %v3748_v49 = vrot.slane %v3746_v34, 5  ;;  %v3752_v26 = vrot.slane %v3750_v63, 4 }
 0x266   : > { %v3753_v53 = vor.u32 %v3752_v26, %v3748_v49 }
 0x268   : > { %7762 = vmatmul.mubr.msk.bf16.gmra.mrb[20].mxu0 %vm780_vm6, %v9431_v18  ;;  %v3737_v18 = vshrl.u32 %v3681_v47, 16  ;;  %v3754_v55 = vrot.slane %v3753_v53, 4 }
 0x269   : > { %7765 = vmatprep.mubr.msk.bf16.mxu0 %vm780_vm6, %v9435_v5  ;;  %v3740_v5 = vshll.u32 %v3681_v47, 16  ;;  %v3576_v47 = vld [vmem:[#allocation2 + $0x18] sm:$0xf] }
 0x26a   : > { %v3739_v46 = vrot.slane %v3737_v18, 4  ;;  %v3759_v2 = vsel %vm8815_vm5, %v3754_v55, %v3758_v0 }
 0x270   : > { %7766 = vmatmul.mubr.msk.bf16.gmra.mrb[24].mxu0 %vm780_vm6, %v9441_v58  ;;  %v3742_v58 = vrot.slane %v3740_v5, 5 }
 0x271   : > { %7769 = vmatprep.mubr.msk.bf16.mxu0 %vm780_vm6, %v9665_v33 }
 0x272   : > { %v3743_v42 = vor.u32 %v3742_v58, %v3739_v46  ;;  %v3566_v58 = vld [vmem:[#allocation2 + $0xc] sm:$0xf] }
 0x274   : > { %v3744_v23 = vrot.slane %v3743_v42, 4 }
 0x276   : > { %v3749_v24 = vsel %vm8815_vm5, %v3744_v23, %v3748_v49 }
 0x277   : > { %v6903_v17 = vcombine.low %v3749_v24, %v3759_v2  ;;  %v3573_v2 = vld [vmem:[#allocation2 + $0x14] sm:$0x1] }
 0x278   : > { %7770 = vmatmul.mubr.msk.bf16.gmra.mrb[28].mxu0 %vm780_vm6, %v6851_v11 }
 0x279   : > { %7775 = vmatprep.mubr.msk.bf16.mxu1 %vm780_vm6, %v6903_v17 }
 0x313   : > { %v7743_v36 = vpop.f32.mrb[0].mxu0 }
 0x314   : > { %v3043_v28 = vmul.f32 %v7743_v36, %v9799_v15  ;;  %v2876_v20 = vpop.f32.mrb[1].mxu0 }
 0x315   : > { %v3041_v33 = vmul.f32 %v9799_v15, %v2876_v20  ;;  %v7744_v21 = vpop.f32.mrb[2].mxu0 }
 0x316   : > { %v3081_v31 = vadd.f32 %v9804_v13, %v3043_v28  ;;  %v3044_v7 = vmul.f32 %v7744_v21, %v9799_v15  ;;  %v2879_v9 = vpop.f32.mrb[3].mxu0 }
 0x317   : > { %v3079_v43 = vadd.f32 %v9804_v13, %v3041_v33  ;;  %v3042_v19 = vmul.f32 %v9799_v15, %v2879_v9 }
 0x318   : > { %v3113_v39 = vmax.f32 %v3081_v31, 0.0  ;;  %v3082_v32 = vadd.f32 %v9804_v13, %v3044_v7 }
 0x319   : > { %v3111_v6 = vmax.f32 %v3079_v43, 0.0  ;;  %v3080_v62 = vadd.f32 %v9804_v13, %v3042_v19 }
 0x31a   : > { %v7131_v1 = vpack.c.bf16 %v3113_v39, %v3113_v39  ;;  %v3114_v50 = vmax.f32 %v3082_v32, 0.0 }
 0x31b   : > { %v7129_v41 = vpack.c.bf16 %v3111_v6, %v3111_v6  ;;  %v3112_v22 = vmax.f32 %v3080_v62, 0.0  ;;  %v7747_v38 = vpop.f32.mrb[4].mxu0 }
 0x31c   : > { %v3260_v3 = vshrl.u32 %v7131_v1, 16  ;;  %v3263_v12 = vshll.u32 %v7131_v1, 16  ;;  %v7132_v10 = vpack.c.bf16 %v3114_v50, %v3114_v50  ;;  %v3047_v57 = vmul.f32 %v7747_v38, %v9799_v15  ;;  %v2892_v14 = vpop.f32.mrb[5].mxu0 }
 0x31d   : > { %v3243_v27 = vshrl.u32 %v7129_v41, 16  ;;  %v3246_v35 = vshll.u32 %v7129_v41, 16  ;;  %v7130_v29 = vpack.c.bf16 %v3112_v22, %v3112_v22  ;;  %v3045_v59 = vmul.f32 %v9799_v15, %v2892_v14  ;;  %v7748_v45 = vpop.f32.mrb[6].mxu0 }
 0x31e   : > { %v3262_v25 = vrot.slane %v3260_v3, 7  ;;  %v3268_v16 = vshrl.u32 %v7132_v10, 16  ;;  %v3271_v52 = vshll.u32 %v7132_v10, 16  ;;  %v3085_v8 = vadd.f32 %v9804_v13, %v3047_v57  ;;  %v2895_v60 = vpop.f32.mrb[7].mxu0 }
 0x31f   : > { %v3245_v51 = vrot.slane %v3243_v27, 7  ;;  %v3251_v18 = vshrl.u32 %v7130_v29, 16  ;;  %v3254_v5 = vshll.u32 %v7130_v29, 16  ;;  %v3083_v34 = vadd.f32 %v9804_v13, %v3045_v59  ;;  %v3583_v59 = vld [vmem:[#allocation2 + $0x24] sm:$0xf] }
 0x320   : > { %v3265_v63 = vor.u32 %v3263_v12, %v3262_v25  ;;  %v3266_v46 = vrot.slane %v3262_v25, 4  ;;  %v3270_v26 = vrot.slane %v3268_v16, 7  ;;  %v3117_v30 = vmax.f32 %v3085_v8, 0.0  ;;  %v3590_v12 = vld [vmem:[#allocation2 + $0x30] sm:$0xf] }
 0x321   : > { %v3248_v61 = vor.u32 %v3246_v35, %v3245_v51  ;;  %v3249_v42 = vrot.slane %v3245_v51, 4  ;;  %v3253_v23 = vrot.slane %v3251_v18, 7  ;;  %v3115_v55 = vmax.f32 %v3083_v34, 0.0 }
 0x322   : > { %v3577_v0 = vsel %vm9819_vm15, %v3265_v63, %v3576_v47  ;;  %v3273_v37 = vor.u32 %v3271_v52, %v3270_v26  ;;  %v3275_v24 = vrot.slane %v3270_v26, 4  ;;  %v7135_v17 = vpack.c.bf16 %v3117_v30, %v3117_v30 }
 0x323   : > { %3578 = vst [vmem:[#allocation2 + $0x18] sm:$0xf] %v3577_v0  ;;  %v3567_v36 = vsel %vm9819_vm15, %v3248_v61, %v3566_v58  ;;  %v3256_v28 = vor.u32 %v3254_v5, %v3253_v23  ;;  %v3258_v20 = vrot.slane %v3253_v23, 4  ;;  %v7133_v33 = vpack.c.bf16 %v3115_v55, %v3115_v55  ;;  %v7751_v21 = vpop.f32.mrb[8].mxu0 }
 0x324   : > { %3568 = vst [vmem:[#allocation2 + $0xc] sm:$0xf] %v3567_v36  ;;  %v3274_v31 = vsel %vm9826_vm0, %v3266_v46, %v3273_v37  ;;  %v3581_v7 = vsel %vm9832_vm1, %v3275_v24, %v3580_v48  ;;  %v3294_v9 = vshrl.u32 %v7135_v17, 16  ;;  %v3297_v43 = vshll.u32 %v7135_v17, 16  ;;  %v2908_v19 = vpop.f32.mrb[9].mxu0 }
 0x325   : > { %3579 = vst.msk [vmem:[#allocation2 + $0x1c] sm:$0xf] %vm3563_vm10, %v3274_v31  ;;  %3582 = vst [vmem:[#allocation2 + $0x20] sm:$0x1] %v3581_v7  ;;  %v3257_v39 = vsel %vm9826_vm0, %v3249_v42, %v3256_v28  ;;  %v3574_v32 = vsel %vm9832_vm1, %v3258_v20, %v3573_v2  ;;  %v3277_v6 = vshrl.u32 %v7133_v33, 16  ;;  %v3280_v62 = vshll.u32 %v7133_v33, 16 }
 0x326   : > { %v7752_v1 = vpop.f32.mrb[10].mxu0  ;;  %3570 = vst.msk [vmem:[#allocation2 + $0x10] sm:$0xf] %vm3563_vm10, %v3257_v39  ;;  %3575 = vst [vmem:[#allocation2 + $0x14] sm:$0x1] %v3574_v32  ;;  %v9850_v50 = vrot.slane %v3294_v9, 7  ;;  %v3048_v41 = vmul.f32 %v7748_v45, %v9799_v15  ;;  %v3046_v22 = vmul.f32 %v9799_v15, %v2895_v60  ;;  %v3051_v38 = vmul.f32 %v7751_v21, %v9799_v15 }
 0x327   : > { %v2911_v3 = vpop.f32.mrb[11].mxu0  ;;  %v9855_v10 = vrot.slane %v3277_v6, 7  ;;  %v3049_v57 = vmul.f32 %v9799_v15, %v2908_v19  ;;  %v3052_v14 = vmul.f32 %v7752_v1, %v9799_v15  ;;  %v3594_v6 = vld [vmem:[#allocation2 + $0x38] sm:$0x1] }
 0x328   : > { %v3050_v27 = vmul.f32 %v9799_v15, %v2911_v3  ;;  %v3299_v35 = vor.u32 %v3297_v43, %v9850_v50  ;;  %v3300_v29 = vrot.slane %v9850_v50, 4  ;;  %v3086_v45 = vadd.f32 %v9804_v13, %v3048_v41 }
 0x329   : > { %v3084_v25 = vadd.f32 %v9804_v13, %v3046_v22  ;;  %v3282_v16 = vor.u32 %v3280_v62, %v9855_v10  ;;  %v3283_v52 = vrot.slane %v9855_v10, 4  ;;  %v3089_v8 = vadd.f32 %v9804_v13, %v3051_v38  ;;  %v3587_v62 = vld [vmem:[#allocation2 + $0x2c] sm:$0x1] }
 0x32a   : > { %v3087_v60 = vadd.f32 %v9804_v13, %v3049_v57  ;;  %v3591_v47 = vsel %vm9819_vm15, %v3299_v35, %v3590_v12  ;;  %v3118_v51 = vmax.f32 %v3086_v45, 0.0  ;;  %v3090_v5 = vadd.f32 %v9804_v13, %v3052_v14  ;;  %v3604_v57 = vld [vmem:[#allocation2 + $0x48] sm:$0xf]  ;;  %v3597_v14 = vld [vmem:[#allocation2 + $0x3c] sm:$0xf] }
 0x32b   : > { %v3116_v18 = vmax.f32 %v3084_v25, 0.0  ;;  %3592 = vst [vmem:[#allocation2 + $0x30] sm:$0xf] %v3591_v47  ;;  %v3584_v34 = vsel %vm9819_vm15, %v3282_v16, %v3583_v59  ;;  %v3121_v63 = vmax.f32 %v3089_v8, 0.0  ;;  %v3088_v58 = vadd.f32 %v9804_v13, %v3050_v27  ;;  %v7755_v26 = vpop.f32.mrb[12].mxu0 }
 0x32c   : > { %v3119_v46 = vmax.f32 %v3087_v60, 0.0  ;;  %3585 = vst [vmem:[#allocation2 + $0x24] sm:$0xf] %v3584_v34  ;;  %v7136_v30 = vpack.c.bf16 %v3118_v51, %v3118_v51  ;;  %v3122_v42 = vmax.f32 %v3090_v5, 0.0  ;;  %v3055_v48 = vmul.f32 %v7755_v26, %v9799_v15  ;;  %v2924_v23 = vpop.f32.mrb[13].mxu0 }
 0x32d   : > { %v7134_v61 = vpack.c.bf16 %v3116_v18, %v3116_v18  ;;  %v7139_v55 = vpack.c.bf16 %v3121_v63, %v3121_v63  ;;  %v3120_v37 = vmax.f32 %v3088_v58, 0.0  ;;  %v3053_v24 = vmul.f32 %v9799_v15, %v2924_v23  ;;  %v7756_v2 = vpop.f32.mrb[14].mxu0 }
 0x32e   : > { %v7137_v0 = vpack.c.bf16 %v3119_v46, %v3119_v46  ;;  %v3302_v17 = vshrl.u32 %v7136_v30, 16  ;;  %v3305_v36 = vshll.u32 %v7136_v30, 16  ;;  %v2927_v33 = vpop.f32.mrb[15].mxu0  ;;  %v7140_v39 = vpack.c.bf16 %v3122_v42, %v3122_v42 }
 0x32f   : > { %v3285_v28 = vshrl.u32 %v7134_v61, 16  ;;  %v3288_v20 = vshll.u32 %v7134_v61, 16  ;;  %v3328_v21 = vshrl.u32 %v7139_v55, 16  ;;  %v3331_v31 = vshll.u32 %v7139_v55, 16  ;;  %v3608_v55 = vld [vmem:[#allocation2 + $0x50] sm:$0x1] }
 0x330   : > { %v3311_v7 = vshrl.u32 %v7137_v0, 16  ;;  %v3314_v9 = vshll.u32 %v7137_v0, 16  ;;  %v3304_v43 = vrot.slane %v3302_v17, 7  ;;  %v7138_v32 = vpack.c.bf16 %v3120_v37, %v3120_v37 }
 0x331   : > { %v3287_v19 = vrot.slane %v3285_v28, 7  ;;  %v3330_v1 = vrot.slane %v3328_v21, 7  ;;  %v3093_v41 = vadd.f32 %v9804_v13, %v3055_v48  ;;  %v3091_v22 = vadd.f32 %v9804_v13, %v3053_v24 }
 0x332   : > { %v3313_v50 = vrot.slane %v3311_v7, 7  ;;  %v3307_v38 = vor.u32 %v3305_v36, %v3304_v43  ;;  %v3309_v3 = vrot.slane %v3304_v43, 4  ;;  %v3336_v5 = vshrl.u32 %v7140_v39, 16 }
 0x333   : > { %v3290_v12 = vor.u32 %v3288_v20, %v3287_v19  ;;  %v3292_v10 = vrot.slane %v3287_v19, 4  ;;  %v3333_v27 = vor.u32 %v3331_v31, %v3330_v1  ;;  %v3334_v35 = vrot.slane %v3330_v1, 4  ;;  %v7759_v25 = vpop.f32.mrb[16].mxu0  ;;  %v3601_v20 = vld [vmem:[#allocation2 + $0x44] sm:$0x1] }
 0x334   : > { %v3316_v59 = vor.u32 %v3314_v9, %v3313_v50  ;;  %v3317_v45 = vrot.slane %v3313_v50, 4  ;;  %v3308_v16 = vsel %vm9826_vm0, %v3300_v29, %v3307_v38  ;;  %v3595_v8 = vsel %vm9832_vm1, %v3309_v3, %v3594_v6  ;;  %v2940_v51 = vpop.f32.mrb[17].mxu0  ;;  %v3618_v38 = vld [vmem:[#allocation2 + $0x60] sm:$0xf] }
 0x335   : > { %v3291_v60 = vsel %vm9826_vm0, %v3283_v52, %v3290_v12  ;;  %v3588_v47 = vsel %vm9832_vm1, %v3292_v10, %v3587_v62  ;;  %3593 = vst.msk [vmem:[#allocation2 + $0x34] sm:$0xf] %vm3563_vm10, %v3308_v16  ;;  %3596 = vst [vmem:[#allocation2 + $0x38] sm:$0x1] %v3595_v8  ;;  %v3605_v18 = vsel %vm9819_vm15, %v3333_v27, %v3604_v57  ;;  %v3339_v34 = vshll.u32 %v7140_v39, 16  ;;  %v7760_v63 = vpop.f32.mrb[18].mxu0 }
 0x336   : > { %3586 = vst.msk [vmem:[#allocation2 + $0x28] sm:$0xf] %vm3563_vm10, %v3291_v60  ;;  %3589 = vst [vmem:[#allocation2 + $0x2c] sm:$0x1] %v3588_v47  ;;  %v3598_v29 = vsel %vm9819_vm15, %v3316_v59, %v3597_v14  ;;  %v3319_v52 = vshrl.u32 %v7138_v32, 16  ;;  %v3322_v46 = vshll.u32 %v7138_v32, 16  ;;  %v3056_v42 = vmul.f32 %v7756_v2, %v9799_v15 }
 0x337   : > { %3606 = vst [vmem:[#allocation2 + $0x48] sm:$0xf] %v3605_v18  ;;  %3599 = vst [vmem:[#allocation2 + $0x3c] sm:$0xf] %v3598_v29  ;;  %v3125_v58 = vmax.f32 %v3093_v41, 0.0  ;;  %v3123_v26 = vmax.f32 %v3091_v22, 0.0  ;;  %v3054_v48 = vmul.f32 %v9799_v15, %v2927_v33  ;;  %v3059_v23 = vmul.f32 %v7759_v25, %v9799_v15 }
 0x338   : > { %v9892_v30 = vpop.f32.mrb[19].mxu0  ;;  %v3338_v61 = vrot.slane %v3336_v5, 7  ;;  %v3321_v0 = vrot.slane %v3319_v52, 7  ;;  %v3057_v17 = vmul.f32 %v9799_v15, %v2940_v51  ;;  %v3094_v21 = vadd.f32 %v9804_v13, %v3056_v42  ;;  %v3611_v59 = vld [vmem:[#allocation2 + $0x54] sm:$0xf] }
 0x339   : > { %v7143_v37 = vpack.c.bf16 %v3125_v58, %v3125_v58  ;;  %v7141_v24 = vpack.c.bf16 %v3123_v26, %v3123_v26  ;;  %v3092_v31 = vadd.f32 %v9804_v13, %v3054_v48  ;;  %v3097_v10 = vadd.f32 %v9804_v13, %v3059_v23  ;;  %v3684_v52 = vld [vmem:[#allocation2 + $0xc] sm:$0xf]  ;;  %v3622_v42 = vld [vmem:[#allocation2 + $0x68] sm:$0x1] }
 0x33a   : > { %v3341_v36 = vor.u32 %v3339_v34, %v3338_v61  ;;  %v3343_v28 = vrot.slane %v3338_v61, 4  ;;  %v3324_v7 = vor.u32 %v3322_v46, %v3321_v0  ;;  %v3326_v9 = vrot.slane %v3321_v0, 4 }
 0x33b   : > { %v3362_v2 = vshrl.u32 %v7143_v37, 16  ;;  %v3365_v43 = vshll.u32 %v7143_v37, 16  ;;  %v3345_v39 = vshrl.u32 %v7141_v24, 16  ;;  %v3348_v32 = vshll.u32 %v7141_v24, 16  ;;  %v9904_v6 = vpop.f32.mrb[20].mxu0 }
 0x33c   : > { %v3342_v33 = vsel %vm9826_vm0, %v3334_v35, %v3341_v36  ;;  %v3609_v19 = vsel %vm9832_vm1, %v3343_v28, %v3608_v55  ;;  %v3325_v62 = vsel %vm9826_vm0, %v3317_v45, %v3324_v7  ;;  %v3602_v1 = vsel %vm9832_vm1, %v3326_v9, %v3601_v20  ;;  %v9911_v22 = vpop.f32.mrb[21].mxu0 }
 0x33d   : > { %3607 = vst.msk [vmem:[#allocation2 + $0x4c] sm:$0xf] %vm3563_vm10, %v3342_v33  ;;  %3610 = vst [vmem:[#allocation2 + $0x50] sm:$0x1] %v3609_v19  ;;  %v3364_v50 = vrot.slane %v3362_v2, 7  ;;  %v3126_v41 = vmax.f32 %v3094_v21, 0.0  ;;  %v3095_v57 = vadd.f32 %v9804_v13, %v3057_v17  ;;  %v3060_v25 = vmul.f32 %v7760_v63, %v9799_v15 }
 0x33e   : > { %3600 = vst.msk [vmem:[#allocation2 + $0x40] sm:$0xf] %vm3563_vm10, %v3325_v62  ;;  %3603 = vst [vmem:[#allocation2 + $0x44] sm:$0x1] %v3602_v1  ;;  %v3347_v3 = vrot.slane %v3345_v39, 7  ;;  %v3124_v12 = vmax.f32 %v3092_v31, 0.0  ;;  %v3058_v55 = vmul.f32 %v9799_v15, %v9892_v30 }
 0x33f   : > { %v9916_v14 = vpop.f32.mrb[22].mxu0  ;;  %v3367_v27 = vor.u32 %v3365_v43, %v3364_v50  ;;  %v3368_v35 = vrot.slane %v3364_v50, 4  ;;  %v7144_v45 = vpack.c.bf16 %v3126_v41, %v3126_v41  ;;  %v3129_v51 = vmax.f32 %v3097_v10, 0.0  ;;  %v3615_v21 = vld [vmem:[#allocation2 + $0x5c] sm:$0x1] }
 0x340   : > { %v9919_v16 = vpop.f32.mrb[23].mxu0  ;;  %v3350_v8 = vor.u32 %v3348_v32, %v3347_v3  ;;  %v3351_v60 = vrot.slane %v3347_v3, 4  ;;  %v7142_v47 = vpack.c.bf16 %v3124_v12, %v3124_v12  ;;  %v3127_v34 = vmax.f32 %v3095_v57, 0.0  ;;  %v3632_v62 = vld [vmem:[#allocation2 + $0x78] sm:$0xf] }
 0x341   : > { %v3619_v18 = vsel %vm9819_vm15, %v3367_v27, %v3618_v38  ;;  %v3370_v29 = vshrl.u32 %v7144_v45, 16  ;;  %v3373_v5 = vshll.u32 %v7144_v45, 16  ;;  %v7147_v63 = vpack.c.bf16 %v3129_v51, %v3129_v51  ;;  %v3685_v41 = vld [vmem:[#allocation2 + $0x10] sm:$0xf]  ;;  %v3625_v57 = vld [vmem:[#allocation2 + $0x6c] sm:$0xf] }
 0x342   : > { %3620 = vst [vmem:[#allocation2 + $0x60] sm:$0xf] %v3619_v18  ;;  %v3612_v46 = vsel %vm9819_vm15, %v3350_v8, %v3611_v59  ;;  %v3353_v58 = vshrl.u32 %v7142_v47, 16  ;;  %v3356_v26 = vshll.u32 %v7142_v47, 16  ;;  %v7145_v48 = vpack.c.bf16 %v3127_v34, %v3127_v34  ;;  %v3686_v45 = vld [vmem:[#allocation2 + $0x14] sm:$0x1] }
 0x343   : > { %3613 = vst [vmem:[#allocation2 + $0x54] sm:$0xf] %v3612_v46  ;;  %v3372_v61 = vrot.slane %v3370_v29, 7  ;;  %v3098_v23 = vadd.f32 %v9804_v13, %v3060_v25  ;;  %v3396_v37 = vshrl.u32 %v7147_v63, 16  ;;  %v3399_v24 = vshll.u32 %v7147_v63, 16  ;;  %v9928_v36 = vpop.f32.mrb[24].mxu0 }
 0x344   : > { %v3355_v0 = vrot.slane %v3353_v58, 7  ;;  %v3761_v17 = vshrl.u32 %v3684_v52, 16  ;;  %v3379_v31 = vshrl.u32 %v7145_v48, 16  ;;  %v3382_v7 = vshll.u32 %v7145_v48, 16  ;;  %v9930_v9 = vpop.f32.mrb[25].mxu0 }
 0x345   : > { %v3375_v28 = vor.u32 %v3373_v5, %v3372_v61  ;;  %v3377_v20 = vrot.slane %v3372_v61, 4  ;;  %v9932_v33 = vrot.slane %v3396_v37, 7  ;;  %v3130_v19 = vmax.f32 %v3098_v23, 0.0  ;;  %v9934_v39 = vpop.f32.mrb[26].mxu0  ;;  %v9962_v46 = vld [vmem:[#allocation2 + $0x18] sm:$0xf] }
 0x346   : > { %v3358_v2 = vor.u32 %v3356_v26, %v3355_v0  ;;  %v3360_v43 = vrot.slane %v3355_v0, 4  ;;  %v9940_v1 = vrot.slane %v3379_v31, 7  ;;  %v3096_v50 = vadd.f32 %v9804_v13, %v3058_v55  ;;  %v9943_v38 = vpop.f32.mrb[27].mxu0  ;;  %v9964_v58 = vld [vmem:[#allocation2 + $0x1c] sm:$0xf] }
 0x347   : > { %v3376_v30 = vsel %vm9826_vm0, %v3368_v35, %v3375_v28  ;;  %v3623_v32 = vsel %vm9832_vm1, %v3377_v20, %v3622_v42  ;;  %v3401_v10 = vor.u32 %v3399_v24, %v9932_v33  ;;  %v7148_v35 = vpack.c.bf16 %v3130_v19, %v3130_v19  ;;  %v3636_v37 = vld [vmem:[#allocation2 + $0x80] sm:$0x1]  ;;  %v3629_v19 = vld [vmem:[#allocation2 + $0x74] sm:$0x1] }
 0x348   : > { %3621 = vst.msk [vmem:[#allocation2 + $0x64] sm:$0xf] %vm3563_vm10, %v3376_v30  ;;  %3624 = vst [vmem:[#allocation2 + $0x68] sm:$0x1] %v3623_v32  ;;  %v3359_v3 = vsel %vm9826_vm0, %v3351_v60, %v3358_v2  ;;  %v3616_v12 = vsel %vm9832_vm1, %v3360_v43, %v3615_v21  ;;  %v3384_v27 = vor.u32 %v3382_v7, %v9940_v1  ;;  %v3128_v59 = vmax.f32 %v3096_v50, 0.0 }
 0x349   : > { %3614 = vst.msk [vmem:[#allocation2 + $0x58] sm:$0xf] %vm3563_vm10, %v3359_v3  ;;  %3617 = vst [vmem:[#allocation2 + $0x5c] sm:$0x1] %v3616_v12  ;;  %v9955_v25 = vsel %vm829_vm2, %v9792_v54, 0  ;;  %v3633_v8 = vsel %vm9819_vm15, %v3401_v10, %v3632_v62  ;;  %v3763_v60 = vrot.slane %v3761_v17, 4 }
 0x34a   : > { %v3764_v47 = vshll.u32 %v3684_v52, 16  ;;  %v3770_v51 = vshll.u32 %v3685_v41, 16  ;;  %v3402_v18 = vrot.slane %v9932_v33, 4  ;;  %3634 = vst [vmem:[#allocation2 + $0x78] sm:$0xf] %v3633_v8  ;;  %v3626_v29 = vsel %vm9819_vm15, %v3384_v27, %v3625_v57 }
 0x34b   : > { %v3404_v5 = vshrl.u32 %v7148_v35, 16  ;;  %v7146_v34 = vpack.c.bf16 %v3128_v59, %v3128_v59  ;;  %3627 = vst [vmem:[#allocation2 + $0x6c] sm:$0xf] %v3626_v29  ;;  %v3774_v63 = vshrl.u32 %v3685_v41, 16  ;;  %v3780_v61 = vshll.u32 %v3686_v45, 16  ;;  %v9966_v42 = vpop.f32.mrb[28].mxu0 }
 0x34c   : > { %v3766_v54 = vrot.slane %v3764_v47, 5  ;;  %v3772_v26 = vrot.slane %v3770_v51, 5  ;;  %v3385_v52 = vrot.slane %v9940_v1, 4  ;;  %v3407_v23 = vshll.u32 %v7148_v35, 16  ;;  %v9969_v0 = vpop.f32.mrb[29].mxu0 }
 0x34d   : > { %v3406_v48 = vrot.slane %v3404_v5, 7  ;;  %v3387_v55 = vshrl.u32 %v7146_v34, 16  ;;  %v3390_v24 = vshll.u32 %v7146_v34, 16  ;;  %v3776_v28 = vrot.slane %v3774_v63, 4  ;;  %v9971_v21 = vpop.f32.mrb[30].mxu0 }
 0x34e   : > { %v3767_v17 = vor.u32 %v3766_v54, %v3763_v60  ;;  %v3782_v20 = vrot.slane %v3780_v61, 5  ;;  %v3785_v43 = vshrl.u32 %v9962_v46, 16  ;;  %v9974_v33 = vpop.f32.mrb[31].mxu0  ;;  %v3788_v62 = vshll.u32 %v9962_v46, 16  ;;  %v3689_v10 = vld [vmem:[#allocation2 + $0x20] sm:$0x1] }
 0x34f   : > { %v3409_v31 = vor.u32 %v3407_v23, %v3406_v48  ;;  %v3411_v7 = vrot.slane %v3406_v48, 4  ;;  %v3389_v2 = vrot.slane %v3387_v55, 7  ;;  %v3777_v32 = vor.u32 %v3776_v28, %v3772_v26  ;;  %v9995_v34 = vld [vmem:[#allocation2 + $0x24] sm:$0xf] }
 0x350   : > { %v3768_v30 = vrot.slane %v3767_v17, 4  ;;  %v3794_v1 = vshll.u32 %v9964_v58, 16  ;;  %v3787_v35 = vrot.slane %v3785_v43, 4  ;;  %v3790_v59 = vrot.slane %v3788_v62, 5 }
 0x351   : > { %v3410_v50 = vsel %vm9826_vm0, %v3402_v18, %v3409_v31  ;;  %v3637_v41 = vsel %vm9832_vm1, %v3411_v7, %v3636_v37  ;;  %v3392_v3 = vor.u32 %v3390_v24, %v3389_v2  ;;  %v3394_v12 = vrot.slane %v3389_v2, 4  ;;  %v10015_v24 = vld [vmem:[#allocation2 + $0x28] sm:$0xf] }
 0x352   : > { %3635 = vst.msk [vmem:[#allocation2 + $0x7c] sm:$0xf] %vm3563_vm10, %v3410_v50  ;;  %3638 = vst [vmem:[#allocation2 + $0x80] sm:$0x1] %v3637_v41  ;;  %v3773_v57 = vsel %vm8815_vm5, %v3768_v30, %v3772_v26  ;;  %v3778_v27 = vrot.slane %v3777_v32, 4  ;;  %v3796_v60 = vrot.slane %v3794_v1, 5  ;;  %v3791_v18 = vor.u32 %v3790_v59, %v3787_v35 }
 0x353   : > { %v3393_v45 = vsel %vm9826_vm0, %v3385_v52, %v3392_v3  ;;  %v3630_v8 = vsel %vm9832_vm1, %v3394_v12, %v3629_v19  ;;  %v3798_v47 = vshrl.u32 %v9964_v58, 16  ;;  %v3804_v29 = vshll.u32 %v3689_v10, 16  ;;  %v3646_v35 = vld [vmem:[#allocation2 + $0x90] sm:$0xf] }
 0x354   : > { %3628 = vst.msk [vmem:[#allocation2 + $0x70] sm:$0xf] %vm3563_vm10, %v3393_v45  ;;  %3631 = vst [vmem:[#allocation2 + $0x74] sm:$0x1] %v3630_v8  ;;  %v3783_v51 = vsel %vm8815_vm5, %v3778_v27, %v3782_v20  ;;  %v3063_v5 = vmul.f32 %v9904_v6, %v9799_v15  ;;  %v3061_v63 = vmul.f32 %v9799_v15, %v9911_v22  ;;  %v3792_v52 = vrot.slane %v3791_v18, 4 }
 0x355   : > { %v9997_v54 = vcombine.low %v3773_v57, %v3783_v51  ;;  %v3800_v26 = vrot.slane %v3798_v47, 4  ;;  %v3064_v61 = vmul.f32 %v9916_v14, %v9799_v15  ;;  %v3806_v48 = vrot.slane %v3804_v29, 5  ;;  %v10009_v6 = vld [vmem:[%s11040_s2 + $0x4] sm:$0x3] }
 0x356   : > { %v3101_v23 = vadd.f32 %v9804_v13, %v3063_v5  ;;  %v3062_v55 = vmul.f32 %v9799_v15, %v9919_v16  ;;  %v3099_v22 = vadd.f32 %v9804_v13, %v3061_v63  ;;  %v3809_v17 = vshrl.u32 %v9995_v34, 16  ;;  %v3639_v51 = vld [vmem:[#allocation2 + $0x84] sm:$0xf] }
 0x357   : > { %11238 = vst [vmem:[#allocation40_spill] sm:$0xff] %v9997_v54  ;;  %7776 = vmatmul.mubr.msk.bf16.vlgmr.msra.gmra.mrb[0].mxu1 %vm780_vm6, %v9997_v54  ;;  %v3801_v37 = vor.u32 %v3800_v26, %v3796_v60  ;;  %v3102_v14 = vadd.f32 %v9804_v13, %v3064_v61  ;;  %v3797_v16 = vsel %vm8815_vm5, %v3792_v52, %v3796_v60  ;;  %v3812_v31 = vshll.u32 %v9995_v34, 16  ;;  %v3650_v61 = vld [vmem:[#allocation2 + $0x98] sm:$0x1] }
 0x358   : > { %7808 = vmatpush3.bf16.msra.mxu1 %v9955_v25  ;;  %v3133_v28 = vmax.f32 %v3101_v23, 0.0  ;;  %v3100_v20 = vadd.f32 %v9804_v13, %v3062_v55  ;;  %v3131_v2 = vmax.f32 %v3099_v22, 0.0  ;;  %v3811_v19 = vrot.slane %v3809_v17, 4  ;;  %v3643_v22 = vld [vmem:[#allocation2 + $0x8c] sm:$0x1] }
 0x359   : > { %v3802_v7 = vrot.slane %v3801_v37, 4  ;;  %v3134_v43 = vmax.f32 %v3102_v14, 0.0  ;;  %8602 = vmatprep.subr.msk.bf16.mxu1 %vm829_vm2, %v10009_v6  ;;  %v3814_v62 = vrot.slane %v3812_v31, 5  ;;  %v3818_v25 = vshll.u32 %v10015_v24, 16  ;;  %v3692_v31 = vld [vmem:[#allocation2 + $0x2c] sm:$0x1] }
 0x35a   : > { %v7151_v30 = vpack.c.bf16 %v3133_v28, %v3133_v28  ;;  %v3132_v32 = vmax.f32 %v3100_v20, 0.0  ;;  %v7149_v50 = vpack.c.bf16 %v3131_v2, %v3131_v2  ;;  %v3822_v3 = vshrl.u32 %v10015_v24, 16 }
 0x35b   : > { %v3807_v1 = vsel %vm8815_vm5, %v3802_v7, %v3806_v48  ;;  %v7152_v41 = vpack.c.bf16 %v3134_v43, %v3134_v43  ;;  %v3815_v5 = vor.u32 %v3814_v62, %v3811_v19  ;;  %v3820_v52 = vrot.slane %v3818_v25, 5  ;;  %v10033_v7 = vld [vmem:[#allocation2 + $0x30] sm:$0xf] }
 0x35c   : > { %v10029_v12 = vcombine.low %v3797_v16, %v3807_v1  ;;  %v3430_v10 = vshrl.u32 %v7151_v30, 16  ;;  %v3433_v57 = vshll.u32 %v7151_v30, 16  ;;  %v7150_v27 = vpack.c.bf16 %v3132_v32, %v3132_v32  ;;  %v10039_v32 = vld [vmem:[#allocation2 + $0x34] sm:$0xf] }
 0x35d   : > { %v3413_v59 = vshrl.u32 %v7149_v50, 16  ;;  %v3416_v45 = vshll.u32 %v7149_v50, 16  ;;  %v3438_v8 = vshrl.u32 %v7152_v41, 16  ;;  %v3441_v60 = vshll.u32 %v7152_v41, 16  ;;  %v10047_v41 = vld [vmem:[#allocation2 + $0x38] sm:$0x1] }
 0x35e   : > { %11239 = vst [vmem:[#allocation45_spill] sm:$0xff] %v10029_v12  ;;  %7779 = vmatprep.mubr.msk.bf16.mxu1 %vm780_vm6, %v10029_v12  ;;  %v3432_v47 = vrot.slane %v3430_v10, 7  ;;  %v3421_v18 = vshrl.u32 %v7150_v27, 16  ;;  %v3424_v29 = vshll.u32 %v7150_v27, 16  ;;  %v3824_v48 = vrot.slane %v3822_v3, 4 }
 0x35f   : > { %v3415_v26 = vrot.slane %v3413_v59, 7  ;;  %v3440_v63 = vrot.slane %v3438_v8, 7  ;;  %v3816_v14 = vrot.slane %v3815_v5, 4  ;;  %v3833_v27 = vshrl.u32 %v10033_v7, 16 }
 0x360   : > { %v3435_v23 = vor.u32 %v3433_v57, %v3432_v47  ;;  %v3436_v55 = vrot.slane %v3432_v47, 4  ;;  %v3423_v37 = vrot.slane %v3421_v18, 7  ;;  %v3825_v50 = vor.u32 %v3824_v48, %v3820_v52 }
 0x361   : > { %v3418_v17 = vor.u32 %v3416_v45, %v3415_v26  ;;  %v3419_v16 = vrot.slane %v3415_v26, 4  ;;  %v3443_v28 = vor.u32 %v3441_v60, %v3440_v63  ;;  %v3445_v20 = vrot.slane %v3440_v63, 4 }
 0x362   : > { %v3647_v2 = vsel %vm9819_vm15, %v3435_v23, %v3646_v35  ;;  %v3426_v43 = vor.u32 %v3424_v29, %v3423_v37  ;;  %v3428_v19 = vrot.slane %v3423_v37, 4  ;;  %v3821_v30 = vsel %vm8815_vm5, %v3816_v14, %v3820_v52 }
 0x363   : > { %3648 = vst [vmem:[#allocation2 + $0x90] sm:$0xf] %v3647_v2  ;;  %v3640_v62 = vsel %vm9819_vm15, %v3418_v17, %v3639_v51  ;;  %v3444_v25 = vsel %vm9826_vm0, %v3436_v55, %v3443_v28  ;;  %v3651_v1 = vsel %vm9832_vm1, %v3445_v20, %v3650_v61  ;;  %v3828_v57 = vshll.u32 %v3692_v31, 16  ;;  %v10064_v61 = vld [vmem:[#allocation2 + $0x3c] sm:$0xf] }
 0x364   : > { %3641 = vst [vmem:[#allocation2 + $0x84] sm:$0xf] %v3640_v62  ;;  %3649 = vst.msk [vmem:[#allocation2 + $0x94] sm:$0xf] %vm3563_vm10, %v3444_v25  ;;  %v3427_v3 = vsel %vm9826_vm0, %v3419_v16, %v3426_v43  ;;  %v3644_v10 = vsel %vm9832_vm1, %v3428_v19, %v3643_v22  ;;  %v3826_v35 = vrot.slane %v3825_v50, 4  ;;  %v3836_v59 = vshll.u32 %v10033_v7, 16 }
 0x365   : > { %3652 = vst [vmem:[#allocation2 + $0x98] sm:$0x1] %v3651_v1  ;;  %3642 = vst.msk [vmem:[#allocation2 + $0x88] sm:$0xf] %vm3563_vm10, %v3427_v3  ;;  %v3842_v45 = vshll.u32 %v10039_v32, 16  ;;  %v3846_v8 = vshrl.u32 %v10039_v32, 16  ;;  %v3067_v18 = vmul.f32 %v9928_v36, %v9799_v15  ;;  %v3065_v63 = vmul.f32 %v9799_v15, %v9930_v9 }
 0x366   : > { %3645 = vst [vmem:[#allocation2 + $0x8c] sm:$0x1] %v3644_v10  ;;  %v3830_v60 = vrot.slane %v3828_v57, 5  ;;  %v3835_v47 = vrot.slane %v3833_v27, 4  ;;  %v3852_v51 = vshll.u32 %v10047_v41, 16  ;;  %v3838_v29 = vrot.slane %v3836_v59, 5 }
 0x367   : > { %v3844_v5 = vrot.slane %v3842_v45, 5  ;;  %v3848_v26 = vrot.slane %v3846_v8, 4  ;;  %v3105_v23 = vadd.f32 %v9804_v13, %v3067_v18  ;;  %v3068_v55 = vmul.f32 %v9934_v39, %v9799_v15  ;;  %v10086_v1 = vld [vmem:[#allocation2 + $0x40] sm:$0xf] }
 0x368   : > { %v3831_v52 = vsel %vm8815_vm5, %v3826_v35, %v3830_v60  ;;  %v3854_v48 = vrot.slane %v3852_v51, 5  ;;  %v3839_v36 = vor.u32 %v3838_v29, %v3835_v47  ;;  %v3103_v14 = vadd.f32 %v9804_v13, %v3065_v63  ;;  %v3660_v35 = vld [vmem:[#allocation2 + $0xa8] sm:$0xf]  ;;  %v3653_v47 = vld [vmem:[#allocation2 + $0x9c] sm:$0xf] }
 0x369   : > { %v10071_v37 = vcombine.low %v3821_v30, %v3831_v52  ;;  %v3849_v22 = vor.u32 %v3848_v26, %v3844_v5  ;;  %v3137_v17 = vmax.f32 %v3105_v23, 0.0  ;;  %v3106_v9 = vadd.f32 %v9804_v13, %v3068_v55  ;;  %v3664_v26 = vld [vmem:[#allocation2 + $0xb0] sm:$0x1] }
 0x36a   : > { %v3066_v16 = vmul.f32 %v9799_v15, %v9943_v38  ;;  %v3857_v28 = vshrl.u32 %v10064_v61, 16  ;;  %v3840_v20 = vrot.slane %v3839_v36, 4  ;;  %v3135_v39 = vmax.f32 %v3103_v14, 0.0 }
 0x36b   : > { %11240 = vst [vmem:[#allocation3_spill] sm:$0xff] %v10071_v37  ;;  %7780 = vmatmul.mubr.msk.bf16.gmra.mrb[4].mxu1 %vm780_vm6, %v10071_v37  ;;  %v3850_v31 = vrot.slane %v3849_v22, 4  ;;  %v3860_v2 = vshll.u32 %v10064_v61, 16  ;;  %v7155_v43 = vpack.c.bf16 %v3137_v17, %v3137_v17  ;;  %v3138_v19 = vmax.f32 %v3106_v9, 0.0  ;;  %v10094_v22 = vld [vmem:[#allocation2 + $0x44] sm:$0x1] }
 0x36c   : > { %v3104_v30 = vadd.f32 %v9804_v13, %v3066_v16  ;;  %v3859_v62 = vrot.slane %v3857_v28, 4  ;;  %v3845_v25 = vsel %vm8815_vm5, %v3840_v20, %v3844_v5  ;;  %v7153_v38 = vpack.c.bf16 %v3135_v39, %v3135_v39  ;;  %11242 = vst [vmem:[#allocation5_spill] sm:$0xff] %v10094_v22  ;;  %v10096_v20 = vld [vmem:[#allocation2 + $0x48] sm:$0xf] }
 0x36d   : > { %v3855_v15 = vsel %vm8815_vm5, %v3850_v31, %v3854_v48  ;;  %v3862_v50 = vrot.slane %v3860_v2, 5  ;;  %v3464_v10 = vshrl.u32 %v7155_v43, 16  ;;  %v3467_v57 = vshll.u32 %v7155_v43, 16 }
 0x36e   : > { %v10088_v3 = vcombine.low %v3845_v25, %v3855_v15  ;;  %v7156_v27 = vpack.c.bf16 %v3138_v19, %v3138_v19  ;;  %v3447_v59 = vshrl.u32 %v7153_v38, 16  ;;  %v3450_v45 = vshll.u32 %v7153_v38, 16  ;;  %v10105_v15 = vld [vmem:[#allocation2 + $0x4c] sm:$0xf] }
 0x36f   : > { %v3136_v13 = vmax.f32 %v3104_v30, 0.0  ;;  %v3863_v8 = vor.u32 %v3862_v50, %v3859_v62  ;;  %v3466_v60 = vrot.slane %v3464_v10, 7  ;;  %v3866_v29 = vshll.u32 %v10086_v1, 16  ;;  %v3657_v10 = vld [vmem:[#allocation2 + $0xa4] sm:$0x1] }
 0x370   : > { %11241 = vst [vmem:[#allocation56_spill] sm:$0xff] %v10088_v3  ;;  %7783 = vmatprep.mubr.msk.bf16.mxu1 %vm780_vm6, %v10088_v3  ;;  %v3472_v51 = vshrl.u32 %v7156_v27, 16  ;;  %v3475_v18 = vshll.u32 %v7156_v27, 16  ;;  %v3449_v5 = vrot.slane %v3447_v59, 7  ;;  %v3870_v48 = vshrl.u32 %v10086_v1, 16 }
 0x371   : > { %v7154_v63 = vpack.c.bf16 %v3136_v13, %v3136_v13  ;;  %v3864_v52 = vrot.slane %v3863_v8, 4  ;;  %v3469_v23 = vor.u32 %v3467_v57, %v3466_v60  ;;  %v3470_v55 = vrot.slane %v3466_v60, 4  ;;  %v10111_v57 = vld [vmem:[#allocation2 + $0x50] sm:$0x1] }
 0x372   : > { %v3474_v36 = vrot.slane %v3472_v51, 7  ;;  %v3868_v14 = vrot.slane %v3866_v29, 5  ;;  %v3452_v17 = vor.u32 %v3450_v45, %v3449_v5  ;;  %v3453_v9 = vrot.slane %v3449_v5, 4  ;;  %11243 = vst [vmem:[#allocation57_spill] sm:$0xff] %v10111_v57 }
 0x373   : > { %v3455_v16 = vshrl.u32 %v7154_v63, 16  ;;  %v3458_v28 = vshll.u32 %v7154_v63, 16  ;;  %v3661_v31 = vsel %vm9819_vm15, %v3469_v23, %v3660_v35  ;;  %v3872_v62 = vrot.slane %v3870_v48, 4 }
 0x374   : > { %v3477_v39 = vor.u32 %v3475_v18, %v3474_v36  ;;  %v3479_v2 = vrot.slane %v3474_v36, 4  ;;  %v3869_v43 = vsel %vm8815_vm5, %v3864_v52, %v3868_v14  ;;  %3662 = vst [vmem:[#allocation2 + $0xa8] sm:$0xf] %v3661_v31  ;;  %v3654_v19 = vsel %vm9819_vm15, %v3452_v17, %v3653_v47 }
 0x375   : > { %v3457_v30 = vrot.slane %v3455_v16, 7  ;;  %v3876_v25 = vshll.u32 %v10094_v22, 16  ;;  %3655 = vst [vmem:[#allocation2 + $0x9c] sm:$0xf] %v3654_v19  ;;  %v3881_v27 = vshrl.u32 %v10096_v20, 16  ;;  %v3884_v35 = vshll.u32 %v10096_v20, 16 }
 0x376   : > { %v3478_v38 = vsel %vm9826_vm0, %v3470_v55, %v3477_v39  ;;  %v3665_v50 = vsel %vm9832_vm1, %v3479_v2, %v3664_v26  ;;  %v3873_v13 = vor.u32 %v3872_v62, %v3868_v14  ;;  %v3890_v51 = vshll.u32 %v10105_v15, 16  ;;  %v8648_v55 = vld [vmem:[%s11041_s3] ss:$0 sm:$0xff]  ;;  %v10128_v14 = vld [vmem:[#allocation2 + $0x54] sm:$0xf] }
 0x377   : > { %3663 = vst.msk [vmem:[#allocation2 + $0xac] sm:$0xf] %vm3563_vm10, %v3478_v38  ;;  %3666 = vst [vmem:[#allocation2 + $0xb0] sm:$0x1] %v3665_v50  ;;  %v3460_v59 = vor.u32 %v3458_v28, %v3457_v30  ;;  %v3462_v45 = vrot.slane %v3457_v30, 4  ;;  %v3878_v8 = vrot.slane %v3876_v25, 5  ;;  %v3071_v36 = vmul.f32 %v8648_v55, %v9966_v42 }
 0x378   : > { %v3883_v60 = vrot.slane %v3881_v27, 4  ;;  %v3886_v47 = vrot.slane %v3884_v35, 5  ;;  %v3894_v18 = vshrl.u32 %v10105_v15, 16  ;;  %v3874_v26 = vrot.slane %v3873_v13, 4  ;;  %v8649_v19 = vld [vmem:[%s11042_s4] ss:$0 sm:$0xff] }
 0x379   : > { %v3461_v29 = vsel %vm9826_vm0, %v3453_v9, %v3460_v59  ;;  %v3658_v5 = vsel %vm9832_vm1, %v3462_v45, %v3657_v10  ;;  %v3900_v63 = vshll.u32 %v10111_v57, 16  ;;  %v3892_v48 = vrot.slane %v3890_v51, 5  ;;  %v10140_v38 = vld [vmem:[#allocation2 + $0x58] sm:$0xf] }
 0x37a   : > { %3656 = vst.msk [vmem:[#allocation2 + $0xa0] sm:$0xf] %vm3563_vm10, %v3461_v29  ;;  %3659 = vst [vmem:[#allocation2 + $0xa4] sm:$0x1] %v3658_v5  ;;  %v3887_v52 = vor.u32 %v3886_v47, %v3883_v60  ;;  %v3896_v23 = vrot.slane %v3894_v18, 4  ;;  %v3879_v17 = vsel %vm8815_vm5, %v3874_v26, %v3878_v8  ;;  %v3069_v16 = vmul.f32 %v8648_v55, %v9969_v0 }
 0x37b   : > { %v3902_v9 = vrot.slane %v3900_v63, 5  ;;  %v3072_v28 = vmul.f32 %v8648_v55, %v9971_v21  ;;  %v10134_v31 = vcombine.low %v3869_v43, %v3879_v17  ;;  %v3109_v30 = vadd.f32 %v8649_v19, %v3071_v36  ;;  %v10153_v5 = vld [vmem:[#allocation2 + $0x60] sm:$0xf] }
 0x37c   : > { %v3888_v39 = vrot.slane %v3887_v52, 4  ;;  %v3897_v2 = vor.u32 %v3896_v23, %v3892_v48  ;;  %v3107_v42 = vadd.f32 %v8649_v19, %v3069_v16  ;;  %v3070_v25 = vmul.f32 %v8648_v55, %v9974_v33  ;;  %v10155_v52 = vld [vmem:[#allocation2 + $0x5c] sm:$0x1] }
 0x37d   : > { %11244 = vst [vmem:[#allocation8_spill] sm:$0xff] %v10134_v31  ;;  %v3110_v62 = vadd.f32 %v8649_v19, %v3072_v28  ;;  %v3905_v50 = vshrl.u32 %v10128_v14, 16  ;;  %7784 = vmatmul.mubr.msk.bf16.gmra.mrb[8].mxu1 %vm780_vm6, %v10134_v31  ;;  %v3141_v43 = vmax.f32 %v3109_v30, 0.0  ;;  %v3908_v10 = vshll.u32 %v10128_v14, 16  ;;  %v3674_v28 = vld [vmem:[#allocation2 + $0xc0] sm:$0xf] }
 0x37e   : > { %v3893_v0 = vsel %vm8815_vm5, %v3888_v39, %v3892_v48  ;;  %v3898_v21 = vrot.slane %v3897_v2, 4  ;;  %v3139_v27 = vmax.f32 %v3107_v42, 0.0  ;;  %v3108_v59 = vadd.f32 %v8649_v19, %v3070_v25  ;;  %v3667_v42 = vld [vmem:[#allocation2 + $0xb4] sm:$0xf] }
 0x37f   : > { %v3142_v35 = vmax.f32 %v3110_v62, 0.0  ;;  %v3907_v45 = vrot.slane %v3905_v50, 4  ;;  %v7159_v13 = vpack.c.bf16 %v3141_v43, %v3141_v43  ;;  %v3910_v8 = vrot.slane %v3908_v10, 5  ;;  %v3678_v43 = vld [vmem:[#allocation2 + $0xc8] sm:$0x1] }
 0x380   : > { %v3903_v33 = vsel %vm8815_vm5, %v3898_v21, %v3902_v9  ;;  %v3914_v60 = vshll.u32 %v10140_v38, 16  ;;  %v7157_v51 = vpack.c.bf16 %v3139_v27, %v3139_v27  ;;  %v3140_v29 = vmax.f32 %v3108_v59, 0.0 }
 0x381   : > { %v10151_v47 = vcombine.low %v3893_v0, %v3903_v33  ;;  %v7160_v18 = vpack.c.bf16 %v3142_v35, %v3142_v35  ;;  %v3498_v26 = vshrl.u32 %v7159_v13, 16  ;;  %v3501_v63 = vshll.u32 %v7159_v13, 16 }
 0x382   : > { %v3911_v48 = vor.u32 %v3910_v8, %v3907_v45  ;;  %v10157_v23 = vrot.slane %v3914_v60, 5  ;;  %v3481_v55 = vshrl.u32 %v7157_v51, 16  ;;  %v3484_v36 = vshll.u32 %v7157_v51, 16 }
 0x383   : > { %11245 = vst [vmem:[#allocation9_spill] sm:$0xff] %v10151_v47  ;;  %7787 = vmatprep.mubr.msk.bf16.mxu1 %vm780_vm6, %v10151_v47  ;;  %v3506_v17 = vshrl.u32 %v7160_v18, 16  ;;  %v3509_v9 = vshll.u32 %v7160_v18, 16  ;;  %v3500_v16 = vrot.slane %v3498_v26, 7  ;;  %v7158_v39 = vpack.c.bf16 %v3140_v29, %v3140_v29  ;;  %v10169_v18 = vld [vmem:[#allocation2 + $0x64] sm:$0xf] }
 0x384   : > { %v3912_v2 = vrot.slane %v3911_v48, 4  ;;  %v3918_v19 = vshrl.u32 %v10140_v38, 16  ;;  %v3483_v30 = vrot.slane %v3481_v55, 7  ;;  %v3924_v25 = vshll.u32 %v10155_v52, 16  ;;  %v10171_v29 = vld [vmem:[#allocation2 + $0x68] sm:$0x1] }
 0x385   : > { %v3508_v62 = vrot.slane %v3506_v17, 7  ;;  %v3929_v50 = vshrl.u32 %v10153_v5, 16  ;;  %v3503_v0 = vor.u32 %v3501_v63, %v3500_v16  ;;  %v3504_v21 = vrot.slane %v3500_v16, 4  ;;  %v3671_v55 = vld [vmem:[#allocation2 + $0xbc] sm:$0x1] }
 0x386   : > { %v3489_v10 = vshrl.u32 %v7158_v39, 16  ;;  %v3492_v27 = vshll.u32 %v7158_v39, 16  ;;  %v3486_v35 = vor.u32 %v3484_v36, %v3483_v30  ;;  %v3487_v59 = vrot.slane %v3483_v30, 4  ;;  %v10179_v17 = vld [vmem:[#allocation2 + $0x6c] sm:$0xf] }
 0x387   : > { %v3511_v45 = vor.u32 %v3509_v9, %v3508_v62  ;;  %v3513_v33 = vrot.slane %v3508_v62, 4  ;;  %v3675_v13 = vsel %vm9819_vm15, %v3503_v0, %v3674_v28  ;;  %v3917_v60 = vsel %vm8815_vm5, %v3912_v2, %v10157_v23 }
 0x388   : > { %v3491_v8 = vrot.slane %v3489_v10, 7  ;;  %v3920_v51 = vrot.slane %v3918_v19, 4  ;;  %3676 = vst [vmem:[#allocation2 + $0xc0] sm:$0xf] %v3675_v13  ;;  %v3668_v26 = vsel %vm9819_vm15, %v3486_v35, %v3667_v42  ;;  %v3926_v36 = vrot.slane %v3924_v25, 5 }
 0x389   : > { %v3512_v63 = vsel %vm9826_vm0, %v3504_v21, %v3511_v45  ;;  %v3679_v48 = vsel %vm9832_vm1, %v3513_v33, %v3678_v43  ;;  %3669 = vst [vmem:[#allocation2 + $0xb4] sm:$0xf] %v3668_v26  ;;  %v3931_v11 = vrot.slane %v3929_v50, 4  ;;  %v3932_v39 = vshll.u32 %v10153_v5, 16  ;;  %v10187_v42 = vld [vmem:[#allocation2 + $0x70] sm:$0xf] }
 0x38a   : > { %3677 = vst.msk [vmem:[#allocation2 + $0xc4] sm:$0xf] %vm3563_vm10, %v3512_v63  ;;  %3680 = vst [vmem:[#allocation2 + $0xc8] sm:$0x1] %v3679_v48  ;;  %v3494_v9 = vor.u32 %v3492_v27, %v3491_v8  ;;  %v3496_v16 = vrot.slane %v3491_v8, 4  ;;  %v3921_v28 = vor.u32 %v3920_v51, %v10157_v23  ;;  %v3938_v2 = vshll.u32 %v10169_v18, 16 }
 0x38b   : > { %v3942_v19 = vshrl.u32 %v10169_v18, 16  ;;  %v3948_v30 = vshll.u32 %v10171_v29, 16  ;;  %v3953_v23 = vshrl.u32 %v10179_v17, 16  ;;  %v10194_v50 = vld [vmem:[#allocation2 + $0x78] sm:$0xf]  ;;  %v3934_v21 = vrot.slane %v3932_v39, 5 }
 0x38c   : > { %v3495_v62 = vsel %vm9826_vm0, %v3487_v59, %v3494_v9  ;;  %v3672_v25 = vsel %vm9832_vm1, %v3496_v16, %v3671_v55  ;;  %v3922_v0 = vrot.slane %v3921_v28, 4  ;;  %v3940_v43 = vrot.slane %v3938_v2, 5  ;;  %v10197_v35 = vld [vmem:[#allocation2 + $0x74] sm:$0x1]  ;;  %v10206_v26 = vld [vmem:[#allocation2 + $0x7c] sm:$0xf] }
 0x38d   : > { %3670 = vst.msk [vmem:[#allocation2 + $0xb8] sm:$0xf] %vm3563_vm10, %v3495_v62  ;;  %3673 = vst [vmem:[#allocation2 + $0xbc] sm:$0x1] %v3672_v25  ;;  %v3944_v10 = vrot.slane %v3942_v19, 4  ;;  %v3950_v27 = vrot.slane %v3948_v30, 5  ;;  %v3935_v13 = vor.u32 %v3934_v21, %v3931_v11 }
 0x38e   : > { %v3927_v49 = vsel %vm8815_vm5, %v3922_v0, %v3926_v36  ;;  %v3955_v59 = vrot.slane %v3953_v23, 4  ;;  %v3956_v53 = vshll.u32 %v10179_v17, 16  ;;  %v3962_v45 = vshll.u32 %v10187_v42, 16  ;;  %v10216_v62 = vld [vmem:[#allocation2 + $0x84] sm:$0xf] }
 0x38f   : > { %v10203_v33 = vcombine.low %v3917_v60, %v3927_v49  ;;  %v3945_v8 = vor.u32 %v3944_v10, %v3940_v43  ;;  %v3966_v51 = vshrl.u32 %v10187_v42, 16  ;;  %v3972_v55 = vshll.u32 %v10197_v35, 16  ;;  %v10212_v60 = vld [vmem:[#allocation2 + $0x80] sm:$0x1]  ;;  %v10222_v10 = vld [vmem:[#allocation2 + $0x88] sm:$0xf] }
 0x390   : > { %v3958_v63 = vrot.slane %v3956_v53, 5  ;;  %v3964_v48 = vrot.slane %v3962_v45, 5  ;;  %v3977_v9 = vshrl.u32 %v10194_v50, 16  ;;  %v3936_v36 = vrot.slane %v3935_v13, 4 }
 0x391   : > { %11246 = vst [vmem:[#allocation12_spill] sm:$0xff] %v10203_v33  ;;  %7788 = vmatmul.mubr.msk.bf16.gmra.mrb[12].mxu1 %vm780_vm6, %v10203_v33  ;;  %v3946_v16 = vrot.slane %v3945_v8, 4  ;;  %v3968_v28 = vrot.slane %v3966_v51, 4  ;;  %v3980_v11 = vshll.u32 %v10194_v50, 16  ;;  %v3974_v2 = vrot.slane %v3972_v55, 5 }
 0x392   : > { %v3959_v39 = vor.u32 %v3958_v63, %v3955_v59  ;;  %v3979_v19 = vrot.slane %v3977_v9, 4  ;;  %v3986_v30 = vshll.u32 %v10206_v26, 16  ;;  %v3941_v25 = vsel %vm8815_vm5, %v3936_v36, %v3940_v43  ;;  %v10229_v43 = vld [vmem:[#allocation2 + $0x90] sm:$0xf]  ;;  %v10235_v9 = vld [vmem:[#allocation2 + $0x8c] sm:$0x1] }
 0x393   : > { %v3951_v0 = vsel %vm8815_vm5, %v3946_v16, %v3950_v27  ;;  %v3969_v23 = vor.u32 %v3968_v28, %v3964_v48  ;;  %v3982_v21 = vrot.slane %v3980_v11, 5  ;;  %v3990_v45 = vshrl.u32 %v10206_v26, 16  ;;  %v10268_v33 = vld [vmem:[#allocation2 + $0xa4] sm:$0x1] }
 0x394   : > { %v10224_v49 = vcombine.low %v3941_v25, %v3951_v0  ;;  %v3960_v53 = vrot.slane %v3959_v39, 4  ;;  %v3988_v59 = vrot.slane %v3986_v30, 5  ;;  %v3996_v51 = vshll.u32 %v10212_v60, 16  ;;  %v10241_v30 = vld [vmem:[#allocation2 + $0x94] sm:$0xf] }
 0x395   : > { %v3970_v13 = vrot.slane %v3969_v23, 4  ;;  %v3983_v8 = vor.u32 %v3982_v21, %v3979_v19  ;;  %v4001_v63 = vshrl.u32 %v10216_v62, 16  ;;  %v3992_v55 = vrot.slane %v3990_v45, 4 }
 0x396   : > { %11247 = vst [vmem:[#allocation15_spill] sm:$0xff] %v10224_v49  ;;  %7791 = vmatprep.mubr.msk.bf16.mxu1 %vm780_vm6, %v10224_v49  ;;  %v3965_v27 = vsel %vm8815_vm5, %v3960_v53, %v3964_v48  ;;  %v4004_v36 = vshll.u32 %v10216_v62, 16  ;;  %v4010_v16 = vshll.u32 %v10222_v10, 16  ;;  %v3998_v39 = vrot.slane %v3996_v51, 5 }
 0x397   : > { %v3975_v28 = vsel %vm8815_vm5, %v3970_v13, %v3974_v2  ;;  %v3984_v11 = vrot.slane %v3983_v8, 4  ;;  %v4003_v19 = vrot.slane %v4001_v63, 4  ;;  %v3993_v0 = vor.u32 %v3992_v55, %v3988_v59  ;;  %v10252_v8 = vld [vmem:[#allocation2 + $0x98] sm:$0x1] }
 0x398   : > { %v10243_v25 = vcombine.low %v3965_v27, %v3975_v28  ;;  %v4006_v23 = vrot.slane %v4004_v36, 5  ;;  %v4012_v48 = vrot.slane %v4010_v16, 5  ;;  %v4014_v53 = vshrl.u32 %v10222_v10, 16  ;;  %v10257_v16 = vld [vmem:[#allocation2 + $0x9c] sm:$0xf] }
 0x399   : > { %v3989_v21 = vsel %vm8815_vm5, %v3984_v11, %v3988_v59  ;;  %v4020_v45 = vshll.u32 %v10235_v9, 16  ;;  %v4025_v4 = vshrl.u32 %v10229_v43, 16  ;;  %v3994_v2 = vrot.slane %v3993_v0, 4 }
 0x39a   : > { %11248 = vst [vmem:[#allocation18_spill] sm:$0xff] %v10243_v25  ;;  %7792 = vmatmul.mubr.msk.bf16.gmra.mrb[16].mxu1 %vm780_vm6, %v10243_v25  ;;  %v4007_v13 = vor.u32 %v4006_v23, %v4003_v19  ;;  %v4028_v51 = vshll.u32 %v10229_v43, 16  ;;  %v4034_v63 = vshll.u32 %v10241_v30, 16  ;;  %v4016_v27 = vrot.slane %v4014_v53, 4  ;;  %v10261_v19 = vld [vmem:[#allocation2 + $0xa0] sm:$0xf] }
 0x39b   : > { %v4022_v55 = vrot.slane %v4020_v45, 5  ;;  %v4027_v59 = vrot.slane %v4025_v4, 4  ;;  %v4038_v36 = vshrl.u32 %v10241_v30, 16  ;;  %v3999_v28 = vsel %vm8815_vm5, %v3994_v2, %v3998_v39 }
 0x39c   : > { %v4008_v11 = vrot.slane %v4007_v13, 4  ;;  %v4030_v44 = vrot.slane %v4028_v51, 5  ;;  %v4036_v0 = vrot.slane %v4034_v63, 5  ;;  %v10263_v23 = vcombine.low %v3989_v21, %v3999_v28 }
 0x39d   : > { %v4017_v25 = vor.u32 %v4016_v27, %v4012_v48  ;;  %v4040_v49 = vrot.slane %v4038_v36, 4  ;;  %v4044_v53 = vshll.u32 %v10252_v8, 16  ;;  %v4049_v47 = vshrl.u32 %v10257_v16, 16 }
 0x39e   : > { %11249 = vst [vmem:[#allocation21_spill] sm:$0xff] %v10263_v23  ;;  %v4013_v4 = vsel %vm8815_vm5, %v4008_v11, %v4012_v48  ;;  %v4031_v45 = vor.u32 %v4030_v44, %v4027_v59  ;;  %v4052_v39 = vshll.u32 %v10257_v16, 16  ;;  %7795 = vmatprep.mubr.msk.bf16.mxu1 %vm780_vm6, %v10263_v23  ;;  %v4058_v51 = vshll.u32 %v10261_v19, 16  ;;  %v10276_v44 = vld [vmem:[#allocation2 + $0xa8] sm:$0xf] }
 0x39f   : > { %v4018_v2 = vrot.slane %v4017_v25, 4  ;;  %v4041_v21 = vor.u32 %v4040_v49, %v4036_v0  ;;  %v4046_v13 = vrot.slane %v4044_v53, 5  ;;  %v4051_v27 = vrot.slane %v4049_v47, 4  ;;  %v10281_v23 = vld [vmem:[#allocation2 + $0xac] sm:$0xf] }
 0x3a0   : > { %v4032_v63 = vrot.slane %v4031_v45, 4  ;;  %v4054_v36 = vrot.slane %v4052_v39, 5  ;;  %v4062_v48 = vshrl.u32 %v10261_v19, 16  ;;  %v4060_v11 = vrot.slane %v4058_v51, 5  ;;  %v10289_v39 = vld [vmem:[#allocation2 + $0xb0] sm:$0x1] }
 0x3a1   : > { %v4023_v59 = vsel %vm8815_vm5, %v4018_v2, %v4022_v55  ;;  %v4042_v28 = vrot.slane %v4041_v21, 4  ;;  %v4068_v31 = vshll.u32 %v10268_v33, 16  ;;  %v4073_v55 = vshrl.u32 %v10276_v44, 16  ;;  %v10293_v21 = vld [vmem:[#allocation2 + $0xb4] sm:$0xf] }
 0x3a2   : > { %v10283_v49 = vcombine.low %v4013_v4, %v4023_v59  ;;  %v4055_v25 = vor.u32 %v4054_v36, %v4051_v27  ;;  %v4064_v53 = vrot.slane %v4062_v48, 4  ;;  %v4037_v47 = vsel %vm8815_vm5, %v4032_v63, %v4036_v0  ;;  %v10301_v59 = vld [vmem:[#allocation2 + $0xb8] sm:$0xf] }
 0x3a3   : > { %v4047_v45 = vsel %vm8815_vm5, %v4042_v28, %v4046_v13  ;;  %v4076_v2 = vshll.u32 %v10276_v44, 16  ;;  %v4082_v0 = vshll.u32 %v10281_v23, 16  ;;  %v4070_v63 = vrot.slane %v4068_v31, 5 }
 0x3a4   : > { %11250 = vst [vmem:[#allocation24_spill] sm:$0xff] %v10283_v49  ;;  %7796 = vmatmul.mubr.msk.bf16.gmra.mrb[20].mxu1 %vm780_vm6, %v10283_v49  ;;  %v10297_v4 = vcombine.low %v4037_v47, %v4047_v45  ;;  %v4056_v51 = vrot.slane %v4055_v25, 4  ;;  %v4065_v27 = vor.u32 %v4064_v53, %v4060_v11  ;;  %v4075_v36 = vrot.slane %v4073_v55, 4  ;;  %v10309_v45 = vld [vmem:[#allocation2 + $0xbc] sm:$0x1] }
 0x3a5   : > { %v4078_v13 = vrot.slane %v4076_v2, 5  ;;  %v4086_v48 = vshrl.u32 %v10281_v23, 16  ;;  %v4084_v3 = vrot.slane %v4082_v0, 5  ;;  %v4092_v49 = vshll.u32 %v10289_v39, 16 }
 0x3a6   : > { %11251 = vst [vmem:[#allocation27_spill] sm:$0xff] %v10297_v4  ;;  %7799 = vmatprep.mubr.msk.bf16.mxu1 %vm780_vm6, %v10297_v4  ;;  %v4066_v28 = vrot.slane %v4065_v27, 4  ;;  %v4097_v47 = vshrl.u32 %v10293_v21, 16  ;;  %v4061_v25 = vsel %vm8815_vm5, %v4056_v51, %v4060_v11  ;;  %v4100_v55 = vshll.u32 %v10293_v21, 16 }
 0x3a7   : > { %v4079_v53 = vor.u32 %v4078_v13, %v4075_v36  ;;  %v4088_v31 = vrot.slane %v4086_v48, 4  ;;  %v4106_v27 = vshll.u32 %v10301_v59, 16  ;;  %v4110_v0 = vshrl.u32 %v10301_v59, 16 }
 0x3a8   : > { %v4071_v2 = vsel %vm8815_vm5, %v4066_v28, %v4070_v63  ;;  %v4099_v37 = vrot.slane %v4097_v47, 4  ;;  %v4102_v57 = vrot.slane %v4100_v55, 5  ;;  %v4116_v36 = vshll.u32 %v10309_v45, 16 }
 0x3a9   : > { %v10316_v4 = vcombine.low %v4061_v25, %v4071_v2  ;;  %v4080_v12 = vrot.slane %v4079_v53, 4  ;;  %v4089_v54 = vor.u32 %v4088_v31, %v4084_v3  ;;  %v4108_v11 = vrot.slane %v4106_v27, 5  ;;  %v10327_v2 = vld [vmem:[#allocation2] sm:$0xf] }
 0x3aa   : > { %v4112_v51 = vrot.slane %v4110_v0, 4  ;;  %v4094_v48 = vrot.slane %v4092_v49, 5  ;;  %v4103_v22 = vor.u32 %v4102_v57, %v4099_v37  ;;  %v4118_v55 = vrot.slane %v4116_v36, 5 }
 0x3ab   : > { %v4090_v13 = vrot.slane %v4089_v54, 4  ;;  %v4085_v28 = vsel %vm8815_vm5, %v4080_v12, %v4084_v3  ;;  %v10329_v54 = vld [vmem:[#allocation2 + $0x4] sm:$0xf]  ;;  %v10337_v12 = vcombine.low %v10128_v14, %v10140_v38  ;;  %v10341_v3 = vcombine.low %v10153_v5, %v10169_v18 }
 0x3ac   : > { %7800 = vmatmul.mubr.msk.bf16.gmra.mrb[24].mxu1 %vm780_vm6, %v10316_v4  ;;  %v4113_v63 = vor.u32 %v4112_v51, %v4108_v11  ;;  %v4104_v25 = vrot.slane %v4103_v22, 4  ;;  %v6935_v37 = vcombine.low %v10327_v2, %v10329_v54  ;;  %v10345_v22 = vcombine.low %v10179_v17, %v10187_v42 }
 0x3ad   : > { %v4095_v47 = vsel %vm8815_vm5, %v4090_v13, %v4094_v48  ;;  %v10353_v27 = vcombine.low %v10194_v50, %v10206_v26  ;;  %v10357_v0 = vcombine.low %v10216_v62, %v10222_v10  ;;  %v10367_v36 = vcombine.low %v10257_v16, %v10261_v19 }
 0x3ae   : > { %v10325_v53 = vcombine.low %v4085_v28, %v4095_v47  ;;  %v4114_v31 = vrot.slane %v4113_v63, 4  ;;  %v4109_v57 = vsel %vm8815_vm5, %v4104_v25, %v4108_v11  ;;  %v10361_v11 = vcombine.low %v10229_v43, %v10241_v30  ;;  %v10380_v63 = vld [vmem:[#allocation2 + $0xc] sm:$0xf]  ;;  %v10382_v28 = vld [vmem:[#allocation2 + $0x10] sm:$0xf] }
 0x3af   : > { %v10371_v13 = vcombine.low %v10276_v44, %v10281_v23  ;;  %v10375_v48 = vcombine.low %v10293_v21, %v10301_v59  ;;  %v10386_v47 = vcombine.low %v10380_v63, %v10382_v28  ;;  %v4901_v25 = vsel %vm829_vm2, %v10009_v6, 0 }
 0x3b0   : > { %11252 = vst [vmem:[#allocation30_spill] sm:$0xff] %v10325_v53  ;;  %7803 = vmatprep.mubr.msk.bf16.mxu1 %vm780_vm6, %v10325_v53  ;;  %v4119_v49 = vsel %vm8815_vm5, %v4114_v31, %v4118_v55  ;;  %v10392_v31 = vcombine.low %v9962_v46, %v9964_v58  ;;  %v10397_v55 = vld [vmem:[%s11040_s2 + $0x6] sm:$0x3]  ;;  %v6974_v6 = vrot.slane %v10128_v14, 9  ;;  %v4741_v46 = vrot.slane %v10140_v38, 5 }
 0x3b1   : > { %v10363_v51 = vcombine.low %v4109_v57, %v4119_v49  ;;  %v10411_v58 = vcombine.low %v10033_v7, %v10039_v32  ;;  %v10415_v57 = vcombine.low %v10064_v61, %v10086_v1  ;;  %v6975_v49 = vrot.slane %v10153_v5, 9 }
 0x3b2   : > { %v4743_v14 = vrot.slane %v4741_v46, 4  ;;  %v4744_v38 = vrot.slane %v10155_v52, 5  ;;  %v4751_v7 = vrot.slane %v10171_v29, 5  ;;  %v4755_v53 = vrot.slane %v10187_v42, 5 }
 0x3b3   : > { %11253 = vst [vmem:[#allocation34_spill] sm:$0xff] %v10363_v51 }
 0x3b4   : > { %7804 = vmatmul.mubr.msk.bf16.gmra.mrb[28].mxu1 %vm780_vm6, %v10363_v51  ;;  %v6976_v51 = vrot.slane %v10179_v17, 9  ;;  %v4745_v5 = vsel %vm9291_vm9, %v4743_v14, %v4744_v38  ;;  %v4757_v17 = vrot.slane %v4755_v53, 4  ;;  %v4776_v38 = vrot.slane %v10241_v30, 5 }
 0x3b5   : > { %7809 = vmatprep.mubr.msk.bf16.mxu1 %vm780_vm6, %v6935_v37  ;;  %v10405_v37 = vcombine.low %v9995_v34, %v10015_v24  ;;  %v4748_v34 = vrot.slane %v10169_v18, 5  ;;  %v4742_v24 = vsel %vm9291_vm9, %v6974_v6, %v4741_v46  ;;  %v4758_v18 = vrot.slane %v10197_v35, 5 }
 0x3b6   : > { %v6977_v6 = vrot.slane %v10194_v50, 9  ;;  %v4762_v46 = vrot.slane %v10206_v26, 5  ;;  %v10434_v52 = vcombine.low %v4742_v24, %v4745_v5  ;;  %v4765_v35 = vrot.slane %v10212_v60, 5 }
 0x3b7   : > { %v4750_v40 = vrot.slane %v4748_v34, 4  ;;  %v4759_v50 = vsel %vm9291_vm9, %v4757_v17, %v4758_v18  ;;  %v4769_v26 = vrot.slane %v10222_v10, 5  ;;  %v6979_v24 = vrot.slane %v10229_v43, 9 }
 0x3b8   : > { %v4763_v42 = vsel %vm9291_vm9, %v6977_v6, %v4762_v46  ;;  %v4764_v14 = vrot.slane %v4762_v46, 4  ;;  %v4778_v5 = vrot.slane %v4776_v38, 4  ;;  %v6980_v18 = vrot.slane %v10257_v16, 9 }
 0x3b9   : > { %v4752_v29 = vsel %vm9291_vm9, %v4750_v40, %v4751_v7  ;;  %v6978_v40 = vrot.slane %v10216_v62, 9  ;;  %v4771_v10 = vrot.slane %v4769_v26, 4  ;;  %v4783_v6 = vrot.slane %v10261_v19, 5 }
 0x3ba   : > { %v4766_v60 = vsel %vm9291_vm9, %v4764_v14, %v4765_v35  ;;  %v4786_v30 = vrot.slane %v10268_v33, 5  ;;  %v6981_v46 = vrot.slane %v10276_v44, 9  ;;  %v4793_v33 = vrot.slane %v10289_v39, 5  ;;  %v10499_v39 = vld [vmem:[#allocation2 + $0xc0] sm:$0xf] }
 0x3bb   : > { %v10460_v7 = vcombine.low %v4763_v42, %v4766_v60  ;;  %v4770_v62 = vsel %vm9291_vm9, %v6978_v40, %v4769_v26  ;;  %v4784_v17 = vsel %vm9291_vm9, %v6980_v18, %v4783_v6  ;;  %v4785_v16 = vrot.slane %v4783_v6, 4 }
 0x3bc   : > { %7810 = vmatmul.mubr.msk.bf16.vlgmr.msra.gmra.mrb[0].mxu1 %vm780_vm6, %v10386_v47  ;;  %v6982_v35 = vrot.slane %v10293_v21, 9 }
 0x3bd   : > { %7842 = vmatpush3.bf16.msra.mxu1 %v4901_v25  ;;  %7813 = vmatprep.mubr.msk.bf16.mxu1 %vm780_vm6, %v10392_v31  ;;  %v4749_v25 = vsel %vm9291_vm9, %v6975_v49, %v4748_v34  ;;  %v4756_v49 = vsel %vm9291_vm9, %v6976_v51, %v4755_v53  ;;  %v4772_v53 = vrot.slane %v10235_v9, 5  ;;  %v4779_v9 = vrot.slane %v10252_v8, 5 }
 0x3be   : > { %8603 = vmatprep.subr.msk.bf16.mxu1 %vm829_vm2, %v10397_v55  ;;  %v10440_v34 = vcombine.low %v4749_v25, %v4752_v29  ;;  %v10454_v51 = vcombine.low %v4756_v49, %v4759_v50  ;;  %v4777_v25 = vsel %vm9291_vm9, %v6979_v24, %v4776_v38  ;;  %v4790_v29 = vrot.slane %v10281_v23, 5  ;;  %v10510_v38 = vld [vmem:[#allocation2 + $0xc8] sm:$0x1] }
 0x3bf   : > { %v4773_v43 = vsel %vm9291_vm9, %v4771_v10, %v4772_v53  ;;  %v4780_v8 = vsel %vm9291_vm9, %v4778_v5, %v4779_v9  ;;  %v10487_v23 = vcombine.low %v10096_v20, %v10105_v15  ;;  %v4787_v44 = vsel %vm9291_vm9, %v4785_v16, %v4786_v30  ;;  %v10501_v53 = vld [vmem:[#allocation2 + $0xc4] sm:$0xf] }
 0x3c0   : > { %v10474_v49 = vcombine.low %v4770_v62, %v4773_v43  ;;  %v10480_v42 = vcombine.low %v4777_v25, %v4780_v8  ;;  %v4791_v19 = vsel %vm9291_vm9, %v6981_v46, %v4790_v29  ;;  %v4792_v14 = vrot.slane %v4790_v29, 4  ;;  %v8654_v46 = vld [vmem:[#allocation2 + $0x8] sm:$0x1] }
 0x3c1   : > { %v4797_v50 = vrot.slane %v10301_v59, 5  ;;  %v10495_v40 = vcombine.low %v4784_v17, %v4787_v44  ;;  %v4800_v24 = vrot.slane %v10309_v45, 5  ;;  %v7052_v10 = vrot.slane %v10499_v39, 9 }
 0x3c2   : > { %v4794_v26 = vsel %vm9291_vm9, %v4792_v14, %v4793_v33  ;;  %v5533_v9 = vrot.slane %v10501_v53, 5  ;;  %v5536_v6 = vrot.slane %v10510_v38, 5  ;;  %v4692_v30 = vrot.slane %v10329_v54, 5  ;;  %v8655_v54 = vld [vmem:[#allocation2 + $0x1c] sm:$0xf] }
 0x3c3   : > { %v10505_v60 = vcombine.low %v4791_v19, %v4794_v26  ;;  %v4798_v21 = vsel %vm9291_vm9, %v6982_v35, %v4797_v50  ;;  %v4799_v59 = vrot.slane %v4797_v50, 4  ;;  %v4695_v29 = vrot.slane %v8654_v46, 5  ;;  %v8656_v50 = vld [vmem:[#allocation2 + $0x14] sm:$0x1] }
 0x3c4   : > { %7814 = vmatmul.mubr.msk.bf16.gmra.mrb[4].mxu1 %vm780_vm6, %v10405_v37  ;;  %v5534_v5 = vsel %vm9291_vm9, %v7052_v10, %v5533_v9  ;;  %v5535_v18 = vrot.slane %v5533_v9, 4  ;;  %v6967_v8 = vrot.slane %v10327_v2, 9  ;;  %v4694_v17 = vrot.slane %v4692_v30, 4  ;;  %v8659_v9 = vld [vmem:[#allocation2 + $0x18] sm:$0xf] }
 0x3c5   : > { %7817 = vmatprep.mubr.msk.bf16.mxu1 %vm780_vm6, %v10411_v58  ;;  %v4801_v62 = vsel %vm9291_vm9, %v4799_v59, %v4800_v24  ;;  %v4699_v14 = vrot.slane %v10382_v28, 5  ;;  %v4706_v33 = vrot.slane %v8655_v54, 5  ;;  %v4702_v26 = vrot.slane %v8656_v50, 5  ;;  %v8658_v28 = vld [vmem:[#allocation2 + $0x28] sm:$0xf] }
 0x3c6   : > { %v10516_v25 = vcombine.low %v4798_v21, %v4801_v62  ;;  %v5537_v45 = vsel %vm9291_vm9, %v5535_v18, %v5536_v6  ;;  %v4693_v16 = vsel %vm9291_vm9, %v6967_v8, %v4692_v30  ;;  %v4696_v19 = vsel %vm9291_vm9, %v4694_v17, %v4695_v29  ;;  %v8657_v21 = vld [vmem:[#allocation2 + $0x20] sm:$0x1]  ;;  %v7034_v17 = vld [vmem:[%s11040_s2 + $0x8] sm:$0x3] }
 0x3c7   : > { %v10525_v43 = vcombine.low %v5534_v5, %v5537_v45  ;;  %v6984_v44 = vcombine.low %v4693_v16, %v4696_v19  ;;  %v4701_v35 = vrot.slane %v4699_v14, 4  ;;  %v4708_v2 = vrot.slane %v4706_v33, 4  ;;  %v8660_v16 = vld [vmem:[#allocation2 + $0x2c] sm:$0x1] }
 0x3c8   : > { %v4709_v59 = vrot.slane %v8657_v21, 5  ;;  %v6968_v24 = vrot.slane %v10380_v63, 9  ;;  %v4713_v10 = vrot.slane %v8658_v28, 5  ;;  %v6969_v5 = vrot.slane %v8659_v9, 9  ;;  %v11254_v28 = vld [vmem:[#allocation5_spill] sm:$0xff] }
 0x3c9   : > { %v4703_v62 = vsel %vm9291_vm9, %v4701_v35, %v4702_v26  ;;  %v4720_v6 = vrot.slane %v10039_v32, 5  ;;  %v5107_v63 = vsel %vm829_vm2, %v10397_v55, 0  ;;  %v4716_v55 = vrot.slane %v8660_v16, 5  ;;  %v8662_v35 = vld [vmem:[#allocation2 + $0x30] sm:$0xf]  ;;  %v11255_v9 = vld [vmem:[#allocation57_spill] sm:$0xff] }
 0x3ca   : > { %v4710_v18 = vsel %vm9291_vm9, %v4708_v2, %v4709_v59  ;;  %v4700_v45 = vsel %vm9291_vm9, %v6968_v24, %v4699_v14  ;;  %v4707_v46 = vsel %vm9291_vm9, %v6969_v5, %v4706_v33  ;;  %v4715_v8 = vrot.slane %v4713_v10, 4  ;;  %v8661_v14 = vld [vmem:[#allocation2 + $0x24] sm:$0xf] }
 0x3cb   : > { %v10559_v30 = vcombine.low %v4700_v45, %v4703_v62  ;;  %v10565_v29 = vcombine.low %v4707_v46, %v4710_v18  ;;  %v4722_v32 = vrot.slane %v4720_v6, 4  ;;  %v4723_v19 = vrot.slane %v10047_v41, 5 }
 0x3cc   : > { %7818 = vmatmul.mubr.msk.bf16.gmra.mrb[8].mxu1 %vm780_vm6, %v10415_v57  ;;  %v6970_v54 = vrot.slane %v8661_v14, 9  ;;  %v4717_v33 = vsel %vm9291_vm9, %v4715_v8, %v4716_v55  ;;  %v6971_v2 = vrot.slane %v8662_v35, 9  ;;  %v4734_v26 = vrot.slane %v10105_v15, 5  ;;  %v7071_v55 = vld [vmem:[%s11040_s2 + $0xc] sm:$0x3]  ;;  %v11258_v14 = vld [vmem:[#allocation3_spill] sm:$0xff] }
 0x3cd   : > { %7821 = vmatprep.mubr.msk.bf16.mxu1 %vm780_vm6, %v10487_v23  ;;  %v4724_v50 = vsel %vm9291_vm9, %v4722_v32, %v4723_v19  ;;  %v4730_v15 = vrot.slane %v11254_v28, 5  ;;  %v4737_v5 = vrot.slane %v11255_v9, 5  ;;  %v11257_v19 = vld [vmem:[#allocation45_spill] sm:$0xff]  ;;  %v11262_v35 = vld [vmem:[#allocation12_spill] sm:$0xff]  ;;  %v5306_v28 = vshll.u32 %v10499_v39, 16 }
 0x3ce   : > { %v4714_v21 = vsel %vm9291_vm9, %v6970_v54, %v4713_v10  ;;  %v4721_v59 = vsel %vm9291_vm9, %v6971_v2, %v4720_v6  ;;  %v6972_v10 = vrot.slane %v10064_v61, 9  ;;  %v6973_v6 = vrot.slane %v10096_v20, 9  ;;  %v7053_v20 = vld [vmem:[%s11040_s2 + $0xa] sm:$0x3]  ;;  %v11259_v54 = vld [vmem:[#allocation56_spill] sm:$0xff]  ;;  %v11263_v2 = vld [vmem:[#allocation15_spill] sm:$0xff] }
 0x3cf   : > { %v10584_v41 = vcombine.low %v4714_v21, %v4717_v33  ;;  %v10588_v24 = vcombine.low %v4721_v59, %v4724_v50  ;;  %v5335_v61 = vsel %vm829_vm2, %v7034_v17, 0  ;;  %v5547_v16 = vsel %vm829_vm2, %v7053_v20, 0  ;;  %v11260_v33 = vld [vmem:[#allocation8_spill] sm:$0xff]  ;;  %v11264_v50 = vld [vmem:[#allocation18_spill] sm:$0xff] }
 0x3d0   : > { %v4735_v8 = vsel %vm9291_vm9, %v6973_v6, %v4734_v26  ;;  %v11266_v21 = vld [vmem:[#allocation24_spill] sm:$0xff]  ;;  %v5316_v59 = vshrl.u32 %v10501_v53, 16 }
 0x3d2   : > { %v5318_v9 = vrot.slane %v5316_v59, 4 }
 0x3d4   : > { %7822 = vmatmul.mubr.msk.bf16.gmra.mrb[12].mxu1 %vm780_vm6, %v10337_v12 }
 0x3d5   : > { %7825 = vmatprep.mubr.msk.bf16.mxu1 %vm780_vm6, %v10341_v3 }
 0x3dc   : > { %7826 = vmatmul.mubr.msk.bf16.gmra.mrb[16].mxu1 %vm780_vm6, %v10345_v22 }
 0x3dd   : > { %7829 = vmatprep.mubr.msk.bf16.mxu1 %vm780_vm6, %v10353_v27 }
 0x3e4   : > { %7830 = vmatmul.mubr.msk.bf16.gmra.mrb[20].mxu1 %vm780_vm6, %v10357_v0 }
 0x3e5   : > { %7833 = vmatprep.mubr.msk.bf16.mxu1 %vm780_vm6, %v10361_v11 }
 0x3ec   : > { %7834 = vmatmul.mubr.msk.bf16.gmra.mrb[24].mxu1 %vm780_vm6, %v10367_v36 }
 0x3ed   : > { %7837 = vmatprep.mubr.msk.bf16.mxu1 %vm780_vm6, %v10371_v13 }
 0x3f4   : > { %7838 = vmatmul.mubr.msk.bf16.gmra.mrb[28].mxu1 %vm780_vm6, %v10375_v48 }
 0x3f5   : > { %7843 = vmatprep.mubr.msk.bf16.mxu1 %vm780_vm6, %v6984_v44  ;;  %v4727_v44 = vrot.slane %v10086_v1, 5  ;;  %v4736_v1 = vrot.slane %v4734_v26, 4  ;;  %v11265_v26 = vld [vmem:[#allocation21_spill] sm:$0xff] }
 0x3f7   : > { %v4729_v62 = vrot.slane %v4727_v44, 4  ;;  %v4738_v45 = vsel %vm9291_vm9, %v4736_v1, %v4737_v5  ;;  %v5303_v1 = vshrl.u32 %v10499_v39, 16  ;;  %v11267_v5 = vld [vmem:[#allocation27_spill] sm:$0xff] }
 0x3f8   : > { %v10608_v32 = vcombine.low %v4735_v8, %v4738_v45 }
 0x3f9   : > { %v4731_v18 = vsel %vm9291_vm9, %v4729_v62, %v4730_v15  ;;  %v5312_v62 = vshll.u32 %v10501_v53, 16 }
 0x3fb   : > { %v5314_v15 = vrot.slane %v5312_v62, 5 }
 0x3fc   : > { %7844 = vmatmul.mubr.msk.bf16.vlgmr.msra.gmra.mrb[0].mxu1 %vm780_vm6, %v10559_v30 }
 0x3fd   : > { %7876 = vmatpush3.bf16.msra.mxu1 %v5107_v63  ;;  %7847 = vmatprep.mubr.msk.bf16.mxu1 %vm780_vm6, %v10565_v29  ;;  %v4728_v63 = vsel %vm9291_vm9, %v6972_v10, %v4727_v44  ;;  %v11261_v44 = vld [vmem:[#allocation9_spill] sm:$0xff]  ;;  %v5305_v10 = vrot.slane %v5303_v1, 4  ;;  %v5319_v6 = vor.u32 %v5318_v9, %v5314_v15 }
 0x3fe   : > { %8604 = vmatprep.subr.msk.bf16.mxu1 %vm829_vm2, %v7034_v17  ;;  %v10604_v46 = vcombine.low %v4728_v63, %v4731_v18  ;;  %v11256_v17 = vld [vmem:[#allocation40_spill] sm:$0xff]  ;;  %v5308_v18 = vrot.slane %v5306_v28, 5  ;;  %v5322_v63 = vshll.u32 %v10510_v38, 16  ;;  %v5753_v38 = vsel %vm829_vm2, %v7071_v55, 0  ;;  %v7089_v1 = vld [vmem:[%s11040_s2 + $0xe] sm:$0x3] }
 0x3ff   : > { %v5320_v8 = vrot.slane %v5319_v6, 4  ;;  %v11273_v28 = vld [vmem:[#allocation11_spill] sm:$0xff] }
 0x400   : > { %v5309_v45 = vor.u32 %v5308_v18, %v5305_v10  ;;  %v11274_v18 = vld [vmem:[#allocation7_spill] sm:$0xff] }
 0x401   : > { %v6453_v6 = vunpack.c.l.bf16 %v11274_v18 }
 0x404   : > { %7848 = vmatmul.mubr.msk.bf16.gmra.mrb[4].mxu1 %vm780_vm6, %v10584_v41 }
 0x405   : > { %7851 = vmatprep.mubr.msk.bf16.mxu1 %vm780_vm6, %v10588_v24 }
 0x40c   : > { %7852 = vmatmul.mubr.msk.bf16.gmra.mrb[8].mxu1 %vm780_vm6, %v10604_v46 }
 0x40d   : > { %7855 = vmatprep.mubr.msk.bf16.mxu1 %vm780_vm6, %v10608_v32 }
 0x414   : > { %7856 = vmatmul.mubr.msk.bf16.gmra.mrb[12].mxu1 %vm780_vm6, %v10434_v52 }
 0x415   : > { %7859 = vmatprep.mubr.msk.bf16.mxu1 %vm780_vm6, %v10440_v34 }
 0x41c   : > { %7860 = vmatmul.mubr.msk.bf16.gmra.mrb[16].mxu1 %vm780_vm6, %v10454_v51 }
 0x41d   : > { %7863 = vmatprep.mubr.msk.bf16.mxu1 %vm780_vm6, %v10460_v7 }
 0x424   : > { %7864 = vmatmul.mubr.msk.bf16.gmra.mrb[20].mxu1 %vm780_vm6, %v10474_v49 }
 0x425   : > { %7867 = vmatprep.mubr.msk.bf16.mxu1 %vm780_vm6, %v10480_v42 }
 0x42c   : > { %7868 = vmatmul.mubr.msk.bf16.gmra.mrb[24].mxu1 %vm780_vm6, %v10495_v40 }
 0x42d   : > { %7871 = vmatprep.mubr.msk.bf16.mxu1 %vm780_vm6, %v10505_v60 }
 0x434   : > { %7872 = vmatmul.mubr.msk.bf16.gmra.mrb[28].mxu1 %vm780_vm6, %v10516_v25 }
 0x435   : > { %7877 = vmatprep.mubr.msk.bf16.mxu1 %vm780_vm6, %v10386_v47  ;;  %v10669_v47 = vcombine.low %v10499_v39, %v10501_v53  ;;  %v11268_v53 = vld [vmem:[#allocation30_spill] sm:$0xff]  ;;  %v5310_v39 = vrot.slane %v5309_v45, 4 }
 0x437   : > { %v5315_v59 = vsel %vm8815_vm5, %v5310_v39, %v5314_v15  ;;  %v6455_v15 = vunpack.c.l.bf16 %v11273_v28 }
 0x43c   : > { %7878 = vmatmul.mubr.msk.bf16.vlgmr.msra.gmra.mrb[0].mxu1 %vm780_vm6, %v10392_v31 }
 0x43d   : > { %7910 = vmatpush3.bf16.msra.mxu1 %v5335_v61  ;;  %7881 = vmatprep.mubr.msk.bf16.mxu1 %vm780_vm6, %v10405_v37  ;;  %v11269_v61 = vld [vmem:[#allocation34_spill] sm:$0xff] }
 0x43e   : > { %8605 = vmatprep.subr.msk.bf16.mxu1 %vm829_vm2, %v7053_v20  ;;  %v5324_v20 = vrot.slane %v5322_v63, 5 }
 0x444   : > { %7882 = vmatmul.mubr.msk.bf16.gmra.mrb[4].mxu1 %vm780_vm6, %v10411_v58 }
 0x445   : > { %7885 = vmatprep.mubr.msk.bf16.mxu1 %vm780_vm6, %v10415_v57 }
 0x44c   : > { %7886 = vmatmul.mubr.msk.bf16.gmra.mrb[8].mxu1 %vm780_vm6, %v10487_v23 }
 0x44d   : > { %7889 = vmatprep.mubr.msk.bf16.mxu1 %vm780_vm6, %v10337_v12 }
 0x454   : > { %7890 = vmatmul.mubr.msk.bf16.gmra.mrb[12].mxu1 %vm780_vm6, %v10341_v3 }
 0x455   : > { %7893 = vmatprep.mubr.msk.bf16.mxu1 %vm780_vm6, %v10345_v22 }
 0x45c   : > { %7894 = vmatmul.mubr.msk.bf16.gmra.mrb[16].mxu1 %vm780_vm6, %v10353_v27 }
 0x45d   : > { %7897 = vmatprep.mubr.msk.bf16.mxu1 %vm780_vm6, %v10357_v0 }
 0x464   : > { %7898 = vmatmul.mubr.msk.bf16.gmra.mrb[20].mxu1 %vm780_vm6, %v10361_v11 }
 0x465   : > { %7901 = vmatprep.mubr.msk.bf16.mxu1 %vm780_vm6, %v10367_v36 }
 0x46c   : > { %7902 = vmatmul.mubr.msk.bf16.gmra.mrb[24].mxu1 %vm780_vm6, %v10371_v13 }
 0x46d   : > { %7905 = vmatprep.mubr.msk.bf16.mxu1 %vm780_vm6, %v10375_v48 }
 0x474   : > { %7906 = vmatmul.mubr.msk.bf16.gmra.mrb[28].mxu1 %vm780_vm6, %v10669_v47 }
 0x475   : > { %7911 = vmatprep.mubr.msk.bf16.mxu1 %vm780_vm6, %v11256_v17 }
 0x47c   : > { %7912 = vmatmul.mubr.msk.bf16.vlgmr.msra.gmra.mrb[0].mxu1 %vm780_vm6, %v11257_v19 }
 0x47d   : > { %7944 = vmatpush3.bf16.msra.mxu1 %v5547_v16  ;;  %7915 = vmatprep.mubr.msk.bf16.mxu1 %vm780_vm6, %v11258_v14  ;;  %v5325_v16 = vsel %vm8815_vm5, %v5320_v8, %v5324_v20 }
 0x47e   : > { %8606 = vmatprep.subr.msk.bf16.mxu1 %vm829_vm2, %v7071_v55  ;;  %v10717_v62 = vcombine.low %v5315_v59, %v5325_v16  ;;  %v7108_v55 = vld [vmem:[%s11040_s2 + $0x10] sm:$0x3] }
 0x484   : > { %7916 = vmatmul.mubr.msk.bf16.gmra.mrb[4].mxu1 %vm780_vm6, %v11259_v54 }
 0x485   : > { %7919 = vmatprep.mubr.msk.bf16.mxu1 %vm780_vm6, %v11260_v33 }
 0x48c   : > { %7920 = vmatmul.mubr.msk.bf16.gmra.mrb[8].mxu1 %vm780_vm6, %v11261_v44 }
 0x48d   : > { %7923 = vmatprep.mubr.msk.bf16.mxu1 %vm780_vm6, %v11262_v35 }
 0x494   : > { %7924 = vmatmul.mubr.msk.bf16.gmra.mrb[12].mxu1 %vm780_vm6, %v11263_v2 }
 0x495   : > { %7927 = vmatprep.mubr.msk.bf16.mxu1 %vm780_vm6, %v11264_v50 }
 0x49c   : > { %7928 = vmatmul.mubr.msk.bf16.gmra.mrb[16].mxu1 %vm780_vm6, %v11265_v26 }
 0x49d   : > { %7931 = vmatprep.mubr.msk.bf16.mxu1 %vm780_vm6, %v11266_v21 }
 0x4a4   : > { %7932 = vmatmul.mubr.msk.bf16.gmra.mrb[20].mxu1 %vm780_vm6, %v11267_v5 }
 0x4a5   : > { %7935 = vmatprep.mubr.msk.bf16.mxu1 %vm780_vm6, %v10316_v4 }
 0x4ac   : > { %7936 = vmatmul.mubr.msk.bf16.gmra.mrb[24].mxu1 %vm780_vm6, %v11268_v53 }
 0x4ad   : > { %7939 = vmatprep.mubr.msk.bf16.mxu1 %vm780_vm6, %v11269_v61 }
 0x4b4   : > { %7940 = vmatmul.mubr.msk.bf16.gmra.mrb[28].mxu1 %vm780_vm6, %v10717_v62 }
 0x4b5   : > { %7945 = vmatprep.mubr.msk.bf16.mxu1 %vm780_vm6, %v10559_v30  ;;  %v5981_v30 = vsel %vm829_vm2, %v7089_v1, 0 }
 0x4bc   : > { %7946 = vmatmul.mubr.msk.bf16.vlgmr.msra.gmra.mrb[0].mxu1 %vm780_vm6, %v10565_v29 }
 0x4bd   : > { %7978 = vmatpush3.bf16.msra.mxu1 %v5753_v38  ;;  %7949 = vmatprep.mubr.msk.bf16.mxu1 %vm780_vm6, %v10584_v41  ;;  %v11275_v38 = vld [vmem:[#allocation16_spill] sm:$0xff] }
 0x4be   : > { %8607 = vmatprep.subr.msk.bf16.mxu1 %vm829_vm2, %v7089_v1  ;;  %v6458_v1 = vunpack.c.l.bf16 %v11275_v38 }
 0x4c4   : > { %7950 = vmatmul.mubr.msk.bf16.gmra.mrb[4].mxu1 %vm780_vm6, %v10588_v24 }
 0x4c5   : > { %7953 = vmatprep.mubr.msk.bf16.mxu1 %vm780_vm6, %v10604_v46 }
 0x4cc   : > { %7954 = vmatmul.mubr.msk.bf16.gmra.mrb[8].mxu1 %vm780_vm6, %v10608_v32 }
 0x4cd   : > { %7957 = vmatprep.mubr.msk.bf16.mxu1 %vm780_vm6, %v10434_v52 }
 0x4d4   : > { %7958 = vmatmul.mubr.msk.bf16.gmra.mrb[12].mxu1 %vm780_vm6, %v10440_v34 }
 0x4d5   : > { %7961 = vmatprep.mubr.msk.bf16.mxu1 %vm780_vm6, %v10454_v51 }
 0x4dc   : > { %7962 = vmatmul.mubr.msk.bf16.gmra.mrb[16].mxu1 %vm780_vm6, %v10460_v7 }
 0x4dd   : > { %7965 = vmatprep.mubr.msk.bf16.mxu1 %vm780_vm6, %v10474_v49 }
 0x4e4   : > { %7966 = vmatmul.mubr.msk.bf16.gmra.mrb[20].mxu1 %vm780_vm6, %v10480_v42 }
 0x4e5   : > { %7969 = vmatprep.mubr.msk.bf16.mxu1 %vm780_vm6, %v10495_v40 }
 0x4ec   : > { %7970 = vmatmul.mubr.msk.bf16.gmra.mrb[24].mxu1 %vm780_vm6, %v10505_v60 }
 0x4ed   : > { %7973 = vmatprep.mubr.msk.bf16.mxu1 %vm780_vm6, %v10516_v25 }
 0x4f4   : > { %7974 = vmatmul.mubr.msk.bf16.gmra.mrb[28].mxu1 %vm780_vm6, %v10525_v43 }
 0x4f5   : > { %7979 = vmatprep.mubr.msk.bf16.mxu1 %vm780_vm6, %v10392_v31 }
 0x4fc   : > { %7980 = vmatmul.mubr.msk.bf16.vlgmr.msra.gmra.mrb[0].mxu1 %vm780_vm6, %v10405_v37 }
 0x4fd   : > { %8012 = vmatpush3.bf16.msra.mxu1 %v5981_v30  ;;  %7983 = vmatprep.mubr.msk.bf16.mxu1 %vm780_vm6, %v10411_v58 }
 0x4fe   : > { %8608 = vmatprep.subr.msk.bf16.mxu1 %vm829_vm2, %v7108_v55 }
 0x504   : > { %7984 = vmatmul.mubr.msk.bf16.gmra.mrb[4].mxu1 %vm780_vm6, %v10415_v57  ;;  %v3734_v57 = vld [vmem:[#allocation2 + $0xd4] sm:$0x1] }
 0x505   : > { %7987 = vmatprep.mubr.msk.bf16.mxu1 %vm780_vm6, %v10487_v23 }
 0x50c   : > { %7988 = vmatmul.mubr.msk.bf16.gmra.mrb[8].mxu1 %vm780_vm6, %v10337_v12  ;;  %v3732_v12 = vld [vmem:[#allocation2 + $0xcc] sm:$0xf] }
 0x50d   : > { %7991 = vmatprep.mubr.msk.bf16.mxu1 %vm780_vm6, %v10341_v3  ;;  %v3733_v3 = vld [vmem:[#allocation2 + $0xd0] sm:$0xf] }
 0x514   : > { %7992 = vmatmul.mubr.msk.bf16.gmra.mrb[12].mxu1 %vm780_vm6, %v10345_v22  ;;  %v7072_v22 = vcombine.low %v3732_v12, %v3733_v3 }
 0x515   : > { %7995 = vmatprep.mubr.msk.bf16.mxu1 %vm780_vm6, %v10353_v27  ;;  %v6193_v27 = vsel %vm829_vm2, %v7108_v55, 0 }
 0x51c   : > { %7996 = vmatmul.mubr.msk.bf16.gmra.mrb[16].mxu1 %vm780_vm6, %v10357_v0  ;;  %v5949_v0 = vshrl.u32 %v3732_v12, 16 }
 0x51d   : > { %7999 = vmatprep.mubr.msk.bf16.mxu1 %vm780_vm6, %v10361_v11  ;;  %v5952_v11 = vshll.u32 %v3732_v12, 16 }
 0x51f   : > { %v5954_v31 = vrot.slane %v5952_v11, 5 }
 0x524   : > { %8000 = vmatmul.mubr.msk.bf16.gmra.mrb[20].mxu1 %vm780_vm6, %v10367_v36  ;;  %v5962_v36 = vshrl.u32 %v3733_v3, 16 }
 0x525   : > { %8003 = vmatprep.mubr.msk.bf16.mxu1 %vm780_vm6, %v10371_v13  ;;  %v5958_v13 = vshll.u32 %v3733_v3, 16 }
 0x526   : > { %v5964_v58 = vrot.slane %v5962_v36, 4  ;;  %v11277_v36 = vld [vmem:[#allocation17_spill] sm:$0xff] }
 0x527   : > { %v5960_v37 = vrot.slane %v5958_v13, 5  ;;  %v6459_v13 = vunpack.c.l.bf16 %v11277_v36 }
 0x52c   : > { %8004 = vmatmul.mubr.msk.bf16.gmra.mrb[24].mxu1 %vm780_vm6, %v10375_v48  ;;  %v5951_v48 = vrot.slane %v5949_v0, 4 }
 0x52d   : > { %8007 = vmatprep.mubr.msk.bf16.mxu1 %vm780_vm6, %v10669_v47  ;;  %v5965_v47 = vor.u32 %v5964_v58, %v5960_v37  ;;  %v11278_v58 = vld [vmem:[#allocation14_spill] sm:$0xff] }
 0x52e   : > { %v5955_v23 = vor.u32 %v5954_v31, %v5951_v48 }
 0x534   : > { %8008 = vmatmul.mubr.msk.bf16.gmra.mrb[28].mxu1 %vm780_vm6, %v7072_v22 }
 0x535   : > { %8013 = vmatprep.mubr.msk.bf16.mxu1 %vm780_vm6, %v11257_v19  ;;  %v5968_v19 = vshll.u32 %v3734_v57, 16 }
 0x53c   : > { %8014 = vmatmul.mubr.msk.bf16.vlgmr.msra.gmra.mrb[0].mxu1 %vm780_vm6, %v11258_v14  ;;  %v5956_v14 = vrot.slane %v5955_v23, 4 }
 0x53d   : > { %8046 = vmatpush3.bf16.msra.mxu1 %v6193_v27  ;;  %8017 = vmatprep.mubr.msk.bf16.mxu1 %vm780_vm6, %v11259_v54  ;;  %v5966_v54 = vrot.slane %v5965_v47, 4 }
 0x544   : > { %8018 = vmatmul.mubr.msk.bf16.gmra.mrb[4].mxu1 %vm780_vm6, %v11260_v33  ;;  %v5970_v33 = vrot.slane %v5968_v19, 5 }
 0x545   : > { %8021 = vmatprep.mubr.msk.bf16.mxu1 %vm780_vm6, %v11261_v44  ;;  %v5961_v44 = vsel %vm8815_vm5, %v5956_v14, %v5960_v37 }
 0x54c   : > { %8022 = vmatmul.mubr.msk.bf16.gmra.mrb[8].mxu1 %vm780_vm6, %v11262_v35 }
 0x54d   : > { %8025 = vmatprep.mubr.msk.bf16.mxu1 %vm780_vm6, %v11263_v2 }
 0x554   : > { %8026 = vmatmul.mubr.msk.bf16.gmra.mrb[12].mxu1 %vm780_vm6, %v11264_v50  ;;  %v10877_v50 = vld [vmem:[%s11042_s4] ss:$0 sm:$0xff] }
 0x555   : > { %8029 = vmatprep.mubr.msk.bf16.mxu1 %vm780_vm6, %v11265_v26 }
 0x55c   : > { %8030 = vmatmul.mubr.msk.bf16.gmra.mrb[16].mxu1 %vm780_vm6, %v11266_v21 }
 0x55d   : > { %8033 = vmatprep.mubr.msk.bf16.mxu1 %vm780_vm6, %v11267_v5 }
 0x564   : > { %8034 = vmatmul.mubr.msk.bf16.gmra.mrb[20].mxu1 %vm780_vm6, %v10316_v4  ;;  %v5971_v4 = vsel %vm8815_vm5, %v5966_v54, %v5970_v33 }
 0x565   : > { %8037 = vmatprep.mubr.msk.bf16.mxu1 %vm780_vm6, %v11268_v53  ;;  %v7090_v35 = vcombine.low %v5961_v44, %v5971_v4 }
 0x56c   : > { %8038 = vmatmul.mubr.msk.bf16.gmra.mrb[24].mxu1 %vm780_vm6, %v11269_v61 }
 0x56d   : > { %8041 = vmatprep.mubr.msk.bf16.mxu1 %vm780_vm6, %v10717_v62 }
 0x574   : > { %8042 = vmatmul.mubr.msk.bf16.gmra.mrb[28].mxu1 %vm780_vm6, %v7090_v35 }
 0x575   : > { %8047 = vmatprep.mubr.msk.bf16.mxu1 %vm780_vm6, %v10565_v29 }
 0x57c   : > { %8048 = vmatmul.mubr.msk.bf16.vlgmr.msra.gmra.mrb[0].mxu1 %vm780_vm6, %v10584_v41  ;;  %v6182_v41 = vrot.slane %v3734_v57, 5  ;;  %v6457_v57 = vunpack.c.l.bf16 %v11278_v58 }
 0x57d   : > { %8051 = vmatprep.mubr.msk.bf16.mxu1 %vm780_vm6, %v10588_v24 }
 0x584   : > { %8052 = vmatmul.mubr.msk.bf16.gmra.mrb[4].mxu1 %vm780_vm6, %v10604_v46 }
 0x585   : > { %8055 = vmatprep.mubr.msk.bf16.mxu1 %vm780_vm6, %v10608_v32  ;;  %v11272_v32 = vld [vmem:[#allocation6_spill] sm:$0xff] }
 0x586   : > { %v6452_v2 = vunpack.c.l.bf16 %v11272_v32 }
 0x58c   : > { %8056 = vmatmul.mubr.msk.bf16.gmra.mrb[8].mxu1 %vm780_vm6, %v10434_v52  ;;  %v6179_v52 = vrot.slane %v3733_v3, 5  ;;  %v11276_v3 = vld [vmem:[#allocation13_spill] sm:$0xff] }
 0x58d   : > { %8059 = vmatprep.mubr.msk.bf16.mxu1 %vm780_vm6, %v10440_v34  ;;  %v7107_v34 = vrot.slane %v3732_v12, 9  ;;  %v6456_v22 = vunpack.c.l.bf16 %v11276_v3 }
 0x58e   : > { %v6181_v29 = vrot.slane %v6179_v52, 4 }
 0x594   : > { %8060 = vmatmul.mubr.msk.bf16.gmra.mrb[12].mxu1 %vm780_vm6, %v10454_v51  ;;  %v6180_v51 = vsel %vm9291_vm9, %v7107_v34, %v6179_v52 }
 0x595   : > { %8063 = vmatprep.mubr.msk.bf16.mxu1 %vm780_vm6, %v10460_v7  ;;  %v6183_v7 = vsel %vm9291_vm9, %v6181_v29, %v6182_v41  ;;  %v11279_v29 = vld [vmem:[#allocation22_spill] sm:$0xff] }
 0x596   : > { %v6462_v41 = vunpack.c.l.bf16 %v11279_v29 }
 0x59c   : > { %8064 = vmatmul.mubr.msk.bf16.gmra.mrb[16].mxu1 %vm780_vm6, %v10474_v49  ;;  %v7109_v49 = vcombine.low %v6180_v51, %v6183_v7 }
 0x59d   : > { %8067 = vmatprep.mubr.msk.bf16.mxu1 %vm780_vm6, %v10480_v42 }
 0x5a4   : > { %8068 = vmatmul.mubr.msk.bf16.gmra.mrb[20].mxu1 %vm780_vm6, %v10495_v40  ;;  %v10868_v40 = vld [vmem:[%s11041_s3] ss:$0 sm:$0xff] }
 0x5a5   : > { %8071 = vmatprep.mubr.msk.bf16.mxu1 %vm780_vm6, %v10505_v60 }
 0x5ac   : > { %8072 = vmatmul.mubr.msk.bf16.gmra.mrb[24].mxu1 %vm780_vm6, %v10516_v25  ;;  %v11271_v25 = vld [vmem:[#allocation10_spill] sm:$0xff] }
 0x5ad   : > { %8075 = vmatprep.mubr.msk.bf16.mxu1 %vm780_vm6, %v10525_v43  ;;  %v6454_v24 = vunpack.c.l.bf16 %v11271_v25 }
 0x5b4   : > { %8076 = vmatmul.mubr.msk.bf16.gmra.mrb[28].mxu1 %vm780_vm6, %v7109_v49 }
 0x64f   : > { %v8049_v42 = vpop.f32.mrb[0].mxu1 }
 0x650   : > { %v6390_v60 = vmul.f32 %v10868_v40, %v8049_v42  ;;  %v6229_v43 = vpop.f32.mrb[1].mxu1  ;;  %v11280_v42 = vld [vmem:[#allocation19_spill] sm:$0xff] }
 0x651   : > { %v6388_v46 = vmul.f32 %v10868_v40, %v6229_v43  ;;  %v8050_v56 = vpop.f32.mrb[2].mxu1 }
 0x652   : > { %v6422_v26 = vadd.f32 %v10877_v50, %v6390_v60  ;;  %v6391_v21 = vmul.f32 %v10868_v40, %v8050_v56  ;;  %v6232_v9 = vpop.f32.mrb[3].mxu1  ;;  %v6460_v60 = vunpack.c.l.bf16 %v11280_v42 }
 0x653   : > { %v6420_v5 = vadd.f32 %v10877_v50, %v6388_v46  ;;  %v6389_v10 = vmul.f32 %v10868_v40, %v6232_v9  ;;  %v11281_v46 = vld [vmem:[#allocation23_spill] sm:$0xff] }
 0x654   : > { %v6486_v45 = vadd.f32 %v6454_v24, %v6422_v26  ;;  %v6423_v63 = vadd.f32 %v10877_v50, %v6391_v21  ;;  %v6463_v32 = vunpack.c.l.bf16 %v11281_v46  ;;  %v11282_v21 = vld [vmem:[#allocation20_spill] sm:$0xff] }
 0x655   : > { %v6484_v8 = vadd.f32 %v6452_v2, %v6420_v5  ;;  %v6421_v53 = vadd.f32 %v10877_v50, %v6389_v10  ;;  %v6461_v28 = vunpack.c.l.bf16 %v11282_v21 }
 0x656   : > { %v6518_v61 = vmax.f32 %v6486_v45, 0.0  ;;  %v6487_v39 = vadd.f32 %v6455_v15, %v6423_v63 }
 0x657   : > { %v6516_v20 = vmax.f32 %v6484_v8, 0.0  ;;  %v6485_v17 = vadd.f32 %v6453_v6, %v6421_v53  ;;  %v8053_v16 = vpop.f32.mrb[4].mxu1 }
 0x658   : > { %6550 = vst.msk [vmem:[%s8715_s25 + $0x10] sm:$0xff] %vm780_vm6, %v6518_v61  ;;  %v6519_v59 = vmax.f32 %v6487_v39, 0.0  ;;  %v6394_v62 = vmul.f32 %v10868_v40, %v8053_v16  ;;  %v6245_v30 = vpop.f32.mrb[5].mxu1  ;;  %v11283_v39 = vld [vmem:[#allocation28_spill] sm:$0xff] }
 0x659   : > { %6548 = vst.msk [vmem:[%s8715_s25] sm:$0xff] %vm780_vm6, %v6516_v20  ;;  %v6517_v55 = vmax.f32 %v6485_v17, 0.0  ;;  %v6392_v12 = vmul.f32 %v10868_v40, %v6245_v30  ;;  %v8054_v27 = vpop.f32.mrb[6].mxu1  ;;  %v6466_v20 = vunpack.c.l.bf16 %v11283_v39 }
 0x65a   : > { %6551 = vst.msk [vmem:[%s8715_s25 + $0x18] sm:$0xff] %vm780_vm6, %v6519_v59  ;;  %v6426_v0 = vadd.f32 %v10877_v50, %v6394_v62  ;;  %v6395_v11 = vmul.f32 %v10868_v40, %v8054_v27  ;;  %v6248_v48 = vpop.f32.mrb[7].mxu1  ;;  %v11284_v62 = vld [vmem:[#allocation25_spill] sm:$0xff] }
 0x65b   : > { %6549 = vst.msk [vmem:[%s8715_s25 + $0x8] sm:$0xff] %vm780_vm6, %v6517_v55  ;;  %v6424_v31 = vadd.f32 %v10877_v50, %v6392_v12  ;;  %v6393_v37 = vmul.f32 %v10868_v40, %v6248_v48  ;;  %v6464_v38 = vunpack.c.l.bf16 %v11284_v62  ;;  %v11285_v12 = vld [vmem:[#allocation29_spill] sm:$0xff] }
 0x65c   : > { %v6490_v23 = vadd.f32 %v6458_v1, %v6426_v0  ;;  %v6427_v47 = vadd.f32 %v10877_v50, %v6395_v11  ;;  %v6467_v3 = vunpack.c.l.bf16 %v11285_v12  ;;  %v11286_v11 = vld [vmem:[#allocation26_spill] sm:$0xff] }
 0x65d   : > { %v6488_v19 = vadd.f32 %v6456_v22, %v6424_v31  ;;  %v6425_v14 = vadd.f32 %v10877_v50, %v6393_v37  ;;  %v6465_v36 = vunpack.c.l.bf16 %v11286_v11 }
 0x65e   : > { %v6522_v54 = vmax.f32 %v6490_v23, 0.0  ;;  %v6491_v33 = vadd.f32 %v6459_v13, %v6427_v47 }
 0x65f   : > { %v6520_v44 = vmax.f32 %v6488_v19, 0.0  ;;  %v6489_v4 = vadd.f32 %v6457_v57, %v6425_v14  ;;  %v8057_v35 = vpop.f32.mrb[8].mxu1 }
 0x660   : > { %6554 = vst.msk [vmem:[%s8715_s25 + $0x30] sm:$0xff] %vm780_vm6, %v6522_v54  ;;  %v6523_v52 = vmax.f32 %v6491_v33, 0.0  ;;  %v6398_v34 = vmul.f32 %v10868_v40, %v8057_v35  ;;  %v6261_v51 = vpop.f32.mrb[9].mxu1  ;;  %v11287_v33 = vld [vmem:[#allocation35_spill] sm:$0xff] }
 0x661   : > { %6552 = vst.msk [vmem:[%s8715_s25 + $0x20] sm:$0xff] %vm780_vm6, %v6520_v44  ;;  %v6521_v7 = vmax.f32 %v6489_v4, 0.0  ;;  %v6396_v49 = vmul.f32 %v10868_v40, %v6261_v51  ;;  %v8058_v25 = vpop.f32.mrb[10].mxu1  ;;  %v6470_v44 = vunpack.c.l.bf16 %v11287_v33 }
 0x662   : > { %6555 = vst.msk [vmem:[%s8715_s25 + $0x38] sm:$0xff] %vm780_vm6, %v6523_v52  ;;  %v6430_v24 = vadd.f32 %v10877_v50, %v6398_v34  ;;  %v6399_v43 = vmul.f32 %v10868_v40, %v8058_v25  ;;  %v6264_v2 = vpop.f32.mrb[11].mxu1  ;;  %v11288_v34 = vld [vmem:[#allocation31_spill] sm:$0xff] }
 0x663   : > { %6553 = vst.msk [vmem:[%s8715_s25 + $0x28] sm:$0xff] %vm780_vm6, %v6521_v7  ;;  %v6428_v56 = vadd.f32 %v10877_v50, %v6396_v49  ;;  %v6397_v26 = vmul.f32 %v10868_v40, %v6264_v2  ;;  %v6468_v29 = vunpack.c.l.bf16 %v11288_v34  ;;  %v11289_v49 = vld [vmem:[#allocation37_spill] sm:$0xff] }
 0x664   : > { %v6494_v15 = vadd.f32 %v6462_v41, %v6430_v24  ;;  %v6431_v9 = vadd.f32 %v10877_v50, %v6399_v43  ;;  %v6471_v42 = vunpack.c.l.bf16 %v11289_v49  ;;  %v11290_v43 = vld [vmem:[#allocation33_spill] sm:$0xff] }
 0x665   : > { %v6492_v5 = vadd.f32 %v6460_v60, %v6428_v56  ;;  %v6429_v10 = vadd.f32 %v10877_v50, %v6397_v26  ;;  %v6469_v46 = vunpack.c.l.bf16 %v11290_v43 }
 0x666   : > { %v6526_v18 = vmax.f32 %v6494_v15, 0.0  ;;  %v6495_v6 = vadd.f32 %v6463_v32, %v6431_v9 }
 0x667   : > { %v6524_v45 = vmax.f32 %v6492_v5, 0.0  ;;  %v6493_v63 = vadd.f32 %v6461_v28, %v6429_v10  ;;  %v8061_v8 = vpop.f32.mrb[12].mxu1 }
 0x668   : > { %6558 = vst.msk [vmem:[%s8715_s25 + $0x50] sm:$0xff] %vm780_vm6, %v6526_v18  ;;  %v6527_v53 = vmax.f32 %v6495_v6, 0.0  ;;  %v6402_v61 = vmul.f32 %v10868_v40, %v8061_v8  ;;  %v6277_v17 = vpop.f32.mrb[13].mxu1  ;;  %v11291_v6 = vld [vmem:[#allocation43_spill] sm:$0xff] }
 0x669   : > { %6556 = vst.msk [vmem:[%s8715_s25 + $0x40] sm:$0xff] %vm780_vm6, %v6524_v45  ;;  %v6525_v16 = vmax.f32 %v6493_v63, 0.0  ;;  %v6400_v59 = vmul.f32 %v10868_v40, %v6277_v17  ;;  %v8062_v1 = vpop.f32.mrb[14].mxu1  ;;  %v6474_v45 = vunpack.c.l.bf16 %v11291_v6 }
 0x66a   : > { %6559 = vst.msk [vmem:[%s8715_s25 + $0x58] sm:$0xff] %vm780_vm6, %v6527_v53  ;;  %v6434_v30 = vadd.f32 %v10877_v50, %v6402_v61  ;;  %v6403_v55 = vmul.f32 %v10868_v40, %v8062_v1  ;;  %v6280_v22 = vpop.f32.mrb[15].mxu1  ;;  %v11292_v61 = vld [vmem:[#allocation39_spill] sm:$0xff] }
 0x66b   : > { %6557 = vst.msk [vmem:[%s8715_s25 + $0x48] sm:$0xff] %vm780_vm6, %v6525_v16  ;;  %v6432_v27 = vadd.f32 %v10877_v50, %v6400_v59  ;;  %v6401_v0 = vmul.f32 %v10868_v40, %v6280_v22  ;;  %v6472_v39 = vunpack.c.l.bf16 %v11292_v61  ;;  %v11293_v59 = vld [vmem:[#allocation44_spill] sm:$0xff] }
 0x66c   : > { %v6498_v13 = vadd.f32 %v6466_v20, %v6434_v30  ;;  %v6435_v48 = vadd.f32 %v10877_v50, %v6403_v55  ;;  %v6475_v62 = vunpack.c.l.bf16 %v11293_v59  ;;  %v11294_v55 = vld [vmem:[#allocation41_spill] sm:$0xff] }
 0x66d   : > { %v6496_v31 = vadd.f32 %v6464_v38, %v6432_v27  ;;  %v6433_v37 = vadd.f32 %v10877_v50, %v6401_v0  ;;  %v6473_v12 = vunpack.c.l.bf16 %v11294_v55 }
 0x66e   : > { %v6530_v58 = vmax.f32 %v6498_v13, 0.0  ;;  %v6499_v57 = vadd.f32 %v6467_v3, %v6435_v48 }
 0x66f   : > { %v6528_v23 = vmax.f32 %v6496_v31, 0.0  ;;  %v6497_v47 = vadd.f32 %v6465_v36, %v6433_v37  ;;  %v8065_v19 = vpop.f32.mrb[16].mxu1 }
 0x670   : > { %6562 = vst.msk [vmem:[%s8715_s25 + $0x70] sm:$0xff] %vm780_vm6, %v6530_v58  ;;  %v6531_v14 = vmax.f32 %v6499_v57, 0.0  ;;  %v6406_v54 = vmul.f32 %v10868_v40, %v8065_v19  ;;  %v6293_v4 = vpop.f32.mrb[17].mxu1  ;;  %v11295_v57 = vld [vmem:[#allocation50_spill] sm:$0xff] }
 0x671   : > { %6560 = vst.msk [vmem:[%s8715_s25 + $0x60] sm:$0xff] %vm780_vm6, %v6528_v23  ;;  %v6529_v35 = vmax.f32 %v6497_v47, 0.0  ;;  %v6404_v52 = vmul.f32 %v10868_v40, %v6293_v4  ;;  %v8066_v41 = vpop.f32.mrb[18].mxu1  ;;  %v6478_v23 = vunpack.c.l.bf16 %v11295_v57 }
 0x672   : > { %6563 = vst.msk [vmem:[%s8715_s25 + $0x78] sm:$0xff] %vm780_vm6, %v6531_v14  ;;  %v6438_v51 = vadd.f32 %v10877_v50, %v6406_v54  ;;  %v6407_v7 = vmul.f32 %v10868_v40, %v8066_v41  ;;  %v6296_v60 = vpop.f32.mrb[19].mxu1  ;;  %v11296_v54 = vld [vmem:[#allocation47_spill] sm:$0xff] }
 0x673   : > { %6561 = vst.msk [vmem:[%s8715_s25 + $0x68] sm:$0xff] %vm780_vm6, %v6529_v35  ;;  %v6436_v25 = vadd.f32 %v10877_v50, %v6404_v52  ;;  %v6405_v24 = vmul.f32 %v10868_v40, %v6296_v60  ;;  %v6476_v33 = vunpack.c.l.bf16 %v11296_v54  ;;  %v11297_v52 = vld [vmem:[#allocation51_spill] sm:$0xff] }
 0x674   : > { %v6502_v32 = vadd.f32 %v6470_v44, %v6438_v51  ;;  %v6439_v2 = vadd.f32 %v10877_v50, %v6407_v7  ;;  %v6479_v34 = vunpack.c.l.bf16 %v11297_v52  ;;  %v11298_v7 = vld [vmem:[#allocation48_spill] sm:$0xff] }
 0x675   : > { %v6500_v56 = vadd.f32 %v6468_v29, %v6436_v25  ;;  %v6437_v26 = vadd.f32 %v10877_v50, %v6405_v24  ;;  %v6477_v49 = vunpack.c.l.bf16 %v11298_v7 }
 0x676   : > { %v6534_v21 = vmax.f32 %v6502_v32, 0.0  ;;  %v6503_v28 = vadd.f32 %v6471_v42, %v6439_v2 }
 0x677   : > { %v6532_v15 = vmax.f32 %v6500_v56, 0.0  ;;  %v6501_v9 = vadd.f32 %v6469_v46, %v6437_v26  ;;  %v8069_v5 = vpop.f32.mrb[20].mxu1 }
 0x678   : > { %6566 = vst.msk [vmem:[%s8715_s25 + $0x90] sm:$0xff] %vm780_vm6, %v6534_v21  ;;  %v6535_v10 = vmax.f32 %v6503_v28, 0.0  ;;  %v6410_v18 = vmul.f32 %v10868_v40, %v8069_v5  ;;  %v6309_v63 = vpop.f32.mrb[21].mxu1  ;;  %v11299_v28 = vld [vmem:[#allocation32_spill] sm:$0xff] }
 0x679   : > { %6564 = vst.msk [vmem:[%s8715_s25 + $0x80] sm:$0xff] %vm780_vm6, %v6532_v15  ;;  %v6533_v8 = vmax.f32 %v6501_v9, 0.0  ;;  %v6408_v53 = vmul.f32 %v10868_v40, %v6309_v63  ;;  %v8070_v20 = vpop.f32.mrb[22].mxu1  ;;  %v6482_v15 = vunpack.c.l.bf16 %v11299_v28 }
 0x67a   : > { %6567 = vst.msk [vmem:[%s8715_s25 + $0x98] sm:$0xff] %vm780_vm6, %v6535_v10  ;;  %v6442_v17 = vadd.f32 %v10877_v50, %v6410_v18  ;;  %v6411_v16 = vmul.f32 %v10868_v40, %v8070_v20  ;;  %v6312_v38 = vpop.f32.mrb[23].mxu1  ;;  %v11300_v18 = vld [vmem:[#allocation53_spill] sm:$0xff] }
 0x67b   : > { %6565 = vst.msk [vmem:[%s8715_s25 + $0x88] sm:$0xff] %vm780_vm6, %v6533_v8  ;;  %v6440_v1 = vadd.f32 %v10877_v50, %v6408_v53  ;;  %v6409_v30 = vmul.f32 %v10868_v40, %v6312_v38  ;;  %v6480_v6 = vunpack.c.l.bf16 %v11300_v18  ;;  %v11301_v53 = vld [vmem:[#allocation36_spill] sm:$0xff] }
 0x67c   : > { %v6506_v3 = vadd.f32 %v6474_v45, %v6442_v17  ;;  %v6443_v22 = vadd.f32 %v10877_v50, %v6411_v16  ;;  %v6483_v61 = vunpack.c.l.bf16 %v11301_v53  ;;  %v11302_v16 = vld [vmem:[#allocation54_spill] sm:$0xff] }
 0x67d   : > { %v6504_v27 = vadd.f32 %v6472_v39, %v6440_v1  ;;  %v6441_v0 = vadd.f32 %v10877_v50, %v6409_v30  ;;  %v6481_v59 = vunpack.c.l.bf16 %v11302_v16 }
 0x67e   : > { %v6538_v11 = vmax.f32 %v6506_v3, 0.0  ;;  %v6507_v36 = vadd.f32 %v6475_v62, %v6443_v22 }
 0x67f   : > { %v6536_v13 = vmax.f32 %v6504_v27, 0.0  ;;  %v6505_v48 = vadd.f32 %v6473_v12, %v6441_v0  ;;  %v8073_v31 = vpop.f32.mrb[24].mxu1 }
 0x680   : > { %6570 = vst.msk [vmem:[%s8715_s25 + $0xb0] sm:$0xff] %vm780_vm6, %v6538_v11  ;;  %v6539_v37 = vmax.f32 %v6507_v36, 0.0  ;;  %v6414_v58 = vmul.f32 %v10868_v40, %v8073_v31  ;;  %v6325_v47 = vpop.f32.mrb[25].mxu1 }
 0x681   : > { %6568 = vst.msk [vmem:[%s8715_s25 + $0xa0] sm:$0xff] %vm780_vm6, %v6536_v13  ;;  %v6537_v19 = vmax.f32 %v6505_v48, 0.0  ;;  %v6412_v14 = vmul.f32 %v10868_v40, %v6325_v47  ;;  %v8074_v44 = vpop.f32.mrb[26].mxu1 }
 0x682   : > { %6571 = vst.msk [vmem:[%s8715_s25 + $0xb8] sm:$0xff] %vm780_vm6, %v6539_v37  ;;  %v6446_v4 = vadd.f32 %v10877_v50, %v6414_v58  ;;  %v6415_v35 = vmul.f32 %v10868_v40, %v8074_v44  ;;  %v6328_v29 = vpop.f32.mrb[27].mxu1 }
 0x683   : > { %6569 = vst.msk [vmem:[%s8715_s25 + $0xa8] sm:$0xff] %vm780_vm6, %v6537_v19  ;;  %v6444_v41 = vadd.f32 %v10877_v50, %v6412_v14  ;;  %v6413_v51 = vmul.f32 %v10868_v40, %v6328_v29 }
 0x684   : > { %v6510_v42 = vadd.f32 %v6478_v23, %v6446_v4  ;;  %v6447_v60 = vadd.f32 %v10877_v50, %v6415_v35 }
 0x685   : > { %v6508_v25 = vadd.f32 %v6476_v33, %v6444_v41  ;;  %v6445_v24 = vadd.f32 %v10877_v50, %v6413_v51 }
 0x686   : > { %v6542_v43 = vmax.f32 %v6510_v42, 0.0  ;;  %v6511_v46 = vadd.f32 %v6479_v34, %v6447_v60 }
 0x687   : > { %v6540_v32 = vmax.f32 %v6508_v25, 0.0  ;;  %v6509_v2 = vadd.f32 %v6477_v49, %v6445_v24  ;;  %v8077_v56 = vpop.f32.mrb[28].mxu1 }
 0x688   : > { %6574 = vst.msk [vmem:[%s8715_s25 + $0xd0] sm:$0xff] %vm780_vm6, %v6542_v43  ;;  %v6543_v26 = vmax.f32 %v6511_v46, 0.0  ;;  %v6418_v21 = vmul.f32 %v10868_v40, %v8077_v56  ;;  %v6341_v9 = vpop.f32.mrb[29].mxu1 }
 0x689   : > { %6572 = vst.msk [vmem:[%s8715_s25 + $0xc0] sm:$0xff] %vm780_vm6, %v6540_v32  ;;  %v6541_v5 = vmax.f32 %v6509_v2, 0.0  ;;  %v6416_v10 = vmul.f32 %v10868_v40, %v6341_v9  ;;  %v8078_v45 = vpop.f32.mrb[30].mxu1 }
 0x68a   : > { %6575 = vst.msk [vmem:[%s8715_s25 + $0xd8] sm:$0xff] %vm780_vm6, %v6543_v26  ;;  %v6450_v63 = vadd.f32 %v10877_v50, %v6418_v21  ;;  %v6419_v8 = vmul.f32 %v10868_v40, %v8078_v45  ;;  %v6344_v39 = vpop.f32.mrb[31].mxu1 }
 0x68b   : > { %6573 = vst.msk [vmem:[%s8715_s25 + $0xc8] sm:$0xff] %vm780_vm6, %v6541_v5  ;;  %v6448_v20 = vadd.f32 %v10877_v50, %v6416_v10  ;;  %v6417_v17 = vmul.f32 %v10868_v40, %v6344_v39 }
 0x68c   : > { %v6514_v62 = vadd.f32 %v6482_v15, %v6450_v63  ;;  %v6451_v38 = vadd.f32 %v10877_v50, %v6419_v8 }
 0x68d   : > { %v6512_v1 = vadd.f32 %v6480_v6, %v6448_v20  ;;  %v6449_v30 = vadd.f32 %v10877_v50, %v6417_v17 }
 0x68e   : > { %v6546_v55 = vmax.f32 %v6514_v62, 0.0  ;;  %v6515_v12 = vadd.f32 %v6483_v61, %v6451_v38 }
 0x68f   : > { %v6544_v3 = vmax.f32 %v6512_v1, 0.0  ;;  %v6513_v22 = vadd.f32 %v6481_v59, %v6449_v30 }
 0x690   : > { %6578 = vst.msk [vmem:[%s8715_s25 + $0xf0] sm:$0xff] %vm780_vm6, %v6546_v55  ;;  %v6547_v27 = vmax.f32 %v6515_v12, 0.0 }
 0x691   : > { %6576 = vst.msk [vmem:[%s8715_s25 + $0xe0] sm:$0xff] %vm780_vm6, %v6544_v3  ;;  %v6545_v0 = vmax.f32 %v6513_v22, 0.0 }
 0x692   : > { %6579 = vst.msk [vmem:[%s8715_s25 + $0xf8] sm:$0xff] %vm780_vm6, %v6547_v27 }
 0x693   : > { %6577 = vst.msk [vmem:[%s8715_s25 + $0xe8] sm:$0xff] %vm780_vm6, %v6545_v0 }
 0x694 PF: > { %s15_s18 = sadd.s32 1, %s8671_s18  }
 0x695   : > { %p12_p5 = scmp.ge.s32.totalorder %s15_s18, 4  }
 0x697   :  { %14 = sbr.rel (!%p12_p5) target bundleno = 1 (0x1), region = 91 }

</bundles_post_ra>
